<compile_context>
chip_gen: v7x
topology: tpu7x:2x2x1
jax: 0.10.0
libtpu: 0.0.40
codegen_flags: <defaults>
</compile_context>

<pallas_src>
import math
import jax
import jax.numpy as jnp
from jax.experimental import pallas as pl
from jax.experimental.pallas import tpu as pltpu

F32 = jnp.float32


# ----------------------------- in-kernel math -------------------------------
def _erf(x):
    # Abramowitz & Stegun 7.1.26 rational approximation, |err| <= 1.5e-7
    # (float32-exact for GELU purposes); avoids relying on an erf lowering.
    a1, a2, a3, a4, a5 = (0.254829592, -0.284496736, 1.421413741,
                          -1.453152027, 1.061405429)
    p = 0.3275911
    s = jnp.where(x >= 0.0, 1.0, -1.0)
    ax = jnp.abs(x)
    t = 1.0 / (1.0 + p * ax)
    poly = ((((a5 * t + a4) * t + a3) * t + a2) * t + a1) * t
    return s * (1.0 - poly * jnp.exp(-ax * ax))


def _gelu_exact(x):
    # matches torch.nn.GELU() (erf form)
    return 0.5 * x * (1.0 + _erf(x * 0.7071067811865476))


# ------------------------------- fused kernel --------------------------------
def _make_fused_kernel(T, N, H1, H2, O2, ns, t_out):
    def lstm_layer(x_val, wih_ref, bih_ref, whhf_ref, whhb_ref,
                   wlf_ref, wlb_ref, bl_ref, H, hf_ref, hb_ref):
        # Input-gate projection for BOTH directions, biases folded, hoisted out
        # of the recurrence: (T*N, D) @ (D, 8H) -> (T*N, 8H).
        xg = jnp.dot(x_val, wih_ref[...], preferred_element_type=F32) + bih_ref[...]
        whh_f = whhf_ref[...]
        whh_b = whhb_ref[...]

        def cell(pre, h, c, whh):
            gates = pre + jnp.dot(h, whh, preferred_element_type=F32)  # (N, 4H)
            sig = jax.nn.sigmoid(gates)          # one full-tile EUP pass
            i = sig[:, 0 * H:1 * H]
            f = sig[:, 1 * H:2 * H]
            o = sig[:, 3 * H:4 * H]
            g = jnp.tanh(gates[:, 2 * H:3 * H])
            c_new = f * c + i * g
            h_new = o * jnp.tanh(c_new)
            return h_new, c_new

        h_f = jnp.zeros((N, H), F32)
        c_f = jnp.zeros((N, H), F32)
        h_b = jnp.zeros((N, H), F32)
        c_b = jnp.zeros((N, H), F32)
        # Fully unrolled recurrence (T is small & static); forward step s and
        # backward step T-1-s are independent -> scheduler interleaves them.
        for s in range(T):
            tb = T - 1 - s
            h_f, c_f = cell(xg[s * N:(s + 1) * N, :4 * H], h_f, c_f, whh_f)
            h_b, c_b = cell(xg[tb * N:(tb + 1) * N, 4 * H:], h_b, c_b, whh_b)
            hf_ref[s * N:(s + 1) * N, :] = h_f
            hb_ref[tb * N:(tb + 1) * N, :] = h_b

        # Batched output projection: out = Hf @ Wl_f + Hb @ Wl_b + b  over all
        # T*N rows at once (replaces T per-timestep tiny matmuls).
        return (jnp.dot(hf_ref[...], wlf_ref[...], preferred_element_type=F32)
                + jnp.dot(hb_ref[...], wlb_ref[...], preferred_element_type=F32)
                + bl_ref[...])

    def kernel(x_ref,
               wih1, bih1, whh1f, whh1b, wl1f, wl1b, bl1,
               wih2, bih2, whh2f, whh2b, wl2f, wl2b, bl2,
               wp, bp, w1, b1, w2, b2, w3, b3,
               out_ref,
               hf1_ref, hb1_ref, hf2_ref, hb2_ref, xw_ref):
        x = x_ref[...]                                             # (T*N, D0)
        h1 = lstm_layer(x, wih1, bih1, whh1f, whh1b, wl1f, wl1b, bl1,
                        H1, hf1_ref, hb1_ref)                      # (T*N, O1)
        h2 = lstm_layer(h1, wih2, bih2, whh2f, whh2b, wl2f, wl2b, bl2,
                        H2, hf2_ref, hb2_ref)                      # (T*N, O2)

        # pool1: Conv1d(kernel==stride) fold — scatter each time window (k)
        # into the lane axis, then one matmul.  xw row index = to*N + n.
        for to in range(t_out):
            for k in range(ns):
                r = (to * ns + k) * N
                xw_ref[to * N:(to + 1) * N, k * O2:(k + 1) * O2] = h2[r:r + N, :]
        xw = xw_ref[...]                                           # (rows, ns*O2)

        y = jnp.dot(xw, wp[...], preferred_element_type=F32) + bp[...]
        h = jnp.dot(y, w1[...], preferred_element_type=F32) + b1[...]
        h = _gelu_exact(h)
        h = jnp.dot(h, w2[...], preferred_element_type=F32) + b2[...]
        out_ref[...] = jnp.dot(h, w3[...], preferred_element_type=F32) + b3[...]

    return kernel


# ------------------------------ parameter init -------------------------------
def _uniform(key, shape, fan):
    bound = 1.0 / math.sqrt(fan)
    return jax.random.uniform(key, shape, F32, -bound, bound)


def init_bilstm_params(key, D, H, O):
    ks = jax.random.split(key, 10)
    w_ih_f = _uniform(ks[0], (4 * H, D), H)   # PyTorch gate order [i, f, g, o]
    w_hh_f = _uniform(ks[1], (4 * H, H), H)
    b_ih_f = _uniform(ks[2], (4 * H,), H)
    b_hh_f = _uniform(ks[3], (4 * H,), H)
    w_ih_b = _uniform(ks[4], (4 * H, D), H)
    w_hh_b = _uniform(ks[5], (4 * H, H), H)
    b_ih_b = _uniform(ks[6], (4 * H,), H)
    b_hh_b = _uniform(ks[7], (4 * H,), H)
    w_lin = _uniform(ks[8], (O, 2 * H), 2 * H)
    b_lin = _uniform(ks[9], (O,), 2 * H)
    return {
        # input projection (both directions concatenated, biases folded)
        "wih": jnp.concatenate([w_ih_f.T, w_ih_b.T], axis=1),               # (D, 8H)
        "bih": jnp.concatenate([b_ih_f + b_hh_f, b_ih_b + b_hh_b])[None, :],  # (1, 8H)
        "whh_f": w_hh_f.T, "whh_b": w_hh_b.T,                               # (H, 4H)
        "wl_f": w_lin[:, :H].T, "wl_b": w_lin[:, H:].T,                     # (H, O)
        "bl": b_lin[None, :],
    }


def init_head_params(key, d_in, d_pool, ns, d_hidden, d_mlp_out):
    ks = jax.random.split(key, 8)
    w_conv = _uniform(ks[0], (d_pool, d_in, ns), d_in * ns)  # Conv1d (Cout,Cin,K)
    b_conv = _uniform(ks[1], (d_pool,), d_in * ns)
    w1 = _uniform(ks[2], (d_hidden, d_pool), d_pool)         # mlp.fc1
    b1 = _uniform(ks[3], (d_hidden,), d_pool)
    w2 = _uniform(ks[4], (d_mlp_out, d_hidden), d_hidden)    # mlp.fc2
    b2 = _uniform(ks[5], (d_mlp_out,), d_hidden)
    w3 = _uniform(ks[6], (1, d_mlp_out), d_mlp_out)          # fc_out
    b3 = _uniform(ks[7], (1,), d_mlp_out)
    # fold conv (kernel==stride) into matmul: row index = k*d_in + c_in
    wp = jnp.transpose(w_conv, (2, 1, 0)).reshape(ns * d_in, d_pool)
    return {
        "wp": wp, "bp": b_conv[None, :],
        "w1": w1.T, "b1": b1[None, :],
        "w2": w2.T, "b2": b2[None, :],
        "w3": w3.T, "b3": b3[None, :],
    }


# --------------------------------- forward -----------------------------------
def basemodel_forward(x, params, n_sample):
    N, T, Vi, Ci = x.shape
    D0 = Vi * Ci
    p1, p2, ph = params["lstm1"], params["lstm2"], params["head"]
    H1 = p1["whh_f"].shape[0]
    O1 = p1["wl_f"].shape[1]
    H2 = p2["whh_f"].shape[0]
    O2 = p2["wl_f"].shape[1]
    d_pool = ph["wp"].shape[1]
    d_hidden = ph["w1"].shape[1]
    d_mlp = ph["w2"].shape[1]
    t_out = (T - n_sample) // n_sample + 1          # Conv1d output length
    rows = t_out * N

    # time-major (T, N, D) flattened to (T*N, D): recurrence steps are
    # contiguous N-row slabs inside the kernel.
    x_tm = jnp.transpose(x.reshape(N, T, D0).astype(F32), (1, 0, 2)).reshape(T * N, D0)

    args = (x_tm,
            p1["wih"], p1["bih"], p1["whh_f"], p1["whh_b"],
            p1["wl_f"], p1["wl_b"], p1["bl"],
            p2["wih"], p2["bih"], p2["whh_f"], p2["whh_b"],
            p2["wl_f"], p2["wl_b"], p2["bl"],
            ph["wp"], ph["bp"], ph["w1"], ph["b1"],
            ph["w2"], ph["b2"], ph["w3"], ph["b3"])

    # advisory cost estimate (gate matmuls dominate)
    flops = 2 * (T * N * D0 * 8 * H1 + 2 * T * N * H1 * 4 * H1 + T * N * 2 * H1 * O1
                 + T * N * O1 * 8 * H2 + 2 * T * N * H2 * 4 * H2 + T * N * 2 * H2 * O2
                 + rows * (n_sample * O2 * d_pool + d_pool * d_hidden
                           + d_hidden * d_mlp + d_mlp))
    transcendentals = 2 * T * N * 6 * (H1 + H2) + rows * d_hidden
    bytes_accessed = 4 * (sum(int(a.size) for a in args) + rows)

    kernel = _make_fused_kernel(T, N, H1, H2, O2, n_sample, t_out)
    vmem = pl.BlockSpec(memory_space=pltpu.MemorySpace.VMEM)

    z = pl.pallas_call(
        kernel,
        out_shape=jax.ShapeDtypeStruct((rows, 1), F32),
        in_specs=[vmem] * len(args),
        out_specs=vmem,
        scratch_shapes=[pltpu.VMEM((T * N, H1), F32),          # h_fwd layer 1
                        pltpu.VMEM((T * N, H1), F32),          # h_bwd layer 1
                        pltpu.VMEM((T * N, H2), F32),          # h_fwd layer 2
                        pltpu.VMEM((T * N, H2), F32),          # h_bwd layer 2
                        pltpu.VMEM((rows, n_sample * O2), F32)],  # conv-window slab
        compiler_params=pltpu.CompilerParams(vmem_limit_bytes=32 * 1024 * 1024),
        cost_estimate=pl.CostEstimate(flops=flops,
                                      transcendentals=transcendentals,
                                      bytes_accessed=bytes_accessed),
    )(*args)

    # kernel rows are time-major (to*N + n); present as (N, t_out) like
    # fc_out(...).flatten(1) in the PyTorch module.
    return z.reshape(t_out, N).T


if __name__ == "__main__":
    # Basemodel(window_size=2, n_sample=4, V=2, C=4, L=2)  -> V*C*L = 16
    V, C, L = 2, 4, 2
    n_sample = 4
    VCL = V * C * L                   # 16
    N, T = 2, 8
    Vi, Ci = 4, 4                     # input's V*C must equal constructor V*C*L

    key = jax.random.PRNGKey(0)
    k_in, k1, k2, k3 = jax.random.split(key, 4)
    x = jax.random.normal(k_in, (N, T, Vi, Ci), F32)

    params = {
        "lstm1": init_bilstm_params(k1, D=VCL, H=2 * VCL, O=2 * VCL),
        "lstm2": init_bilstm_params(k2, D=2 * VCL, H=2 * VCL, O=VCL),
        "head": init_head_params(k3, d_in=VCL, d_pool=2 * VCL, ns=n_sample,
                                 d_hidden=VCL, d_mlp_out=C * L),
    }

    fwd = jax.jit(lambda xx, pp: basemodel_forward(xx, pp, n_sample))
    z = fwd(x, params)
    jax.block_until_ready(z)
    assert z.shape == (N, (T - n_sample) // n_sample + 1), z.shape
    assert bool(jnp.all(jnp.isfinite(z)))
    print("KERNEL_OK")
</pallas_src>

<mosaic_0001>
module attributes {stable_mosaic.version = 11 : i64} {
  func.func @kernel(%arg0: memref<16x16xf32, #tpu.memory_space<vmem>>, %arg1: memref<16x256xf32, #tpu.memory_space<vmem>>, %arg2: memref<1x256xf32, #tpu.memory_space<vmem>>, %arg3: memref<32x128xf32, #tpu.memory_space<vmem>>, %arg4: memref<32x128xf32, #tpu.memory_space<vmem>>, %arg5: memref<32x32xf32, #tpu.memory_space<vmem>>, %arg6: memref<32x32xf32, #tpu.memory_space<vmem>>, %arg7: memref<1x32xf32, #tpu.memory_space<vmem>>, %arg8: memref<32x256xf32, #tpu.memory_space<vmem>>, %arg9: memref<1x256xf32, #tpu.memory_space<vmem>>, %arg10: memref<32x128xf32, #tpu.memory_space<vmem>>, %arg11: memref<32x128xf32, #tpu.memory_space<vmem>>, %arg12: memref<32x16xf32, #tpu.memory_space<vmem>>, %arg13: memref<32x16xf32, #tpu.memory_space<vmem>>, %arg14: memref<1x16xf32, #tpu.memory_space<vmem>>, %arg15: memref<64x32xf32, #tpu.memory_space<vmem>>, %arg16: memref<1x32xf32, #tpu.memory_space<vmem>>, %arg17: memref<32x16xf32, #tpu.memory_space<vmem>>, %arg18: memref<1x16xf32, #tpu.memory_space<vmem>>, %arg19: memref<16x8xf32, #tpu.memory_space<vmem>>, %arg20: memref<1x8xf32, #tpu.memory_space<vmem>>, %arg21: memref<8x1xf32, #tpu.memory_space<vmem>>, %arg22: memref<1x1xf32, #tpu.memory_space<vmem>>, %arg23: memref<4x1xf32, #tpu.memory_space<vmem>>, %arg24: memref<16x32xf32, #tpu.memory_space<vmem>>, %arg25: memref<16x32xf32, #tpu.memory_space<vmem>>, %arg26: memref<16x32xf32, #tpu.memory_space<vmem>>, %arg27: memref<16x32xf32, #tpu.memory_space<vmem>>, %arg28: memref<4x64xf32, #tpu.memory_space<vmem>>) attributes {dimension_semantics = [], scalar_prefetch = 0 : i64, scratch_operands = 5 : i64, tpu.core_type = #tpu.core_type<tc>} {
    %c0 = arith.constant 0 : index
    %c0_0 = arith.constant 0 : index
    %0 = vector.load %arg0[%c0, %c0_0] : memref<16x16xf32, #tpu.memory_space<vmem>>, vector<16x16xf32>
    %c0_1 = arith.constant 0 : index
    %c0_2 = arith.constant 0 : index
    %1 = vector.load %arg1[%c0_1, %c0_2] : memref<16x256xf32, #tpu.memory_space<vmem>>, vector<16x256xf32>
    %cst = arith.constant dense<0.000000e+00> : vector<16x256xf32>
    %2 = tpu.matmul %0, %1, %cst {dimension_numbers = #tpu.dot_dimension_numbers<[1], [0], [0], [1], [0, 0, 1, 1], [], []>} : vector<16x16xf32>, vector<16x256xf32>, vector<16x256xf32> -> vector<16x256xf32>
    %c0_3 = arith.constant 0 : index
    %c0_4 = arith.constant 0 : index
    %3 = vector.load %arg2[%c0_3, %c0_4] : memref<1x256xf32, #tpu.memory_space<vmem>>, vector<1x256xf32>
    %4 = vector.broadcast %3 : vector<1x256xf32> to vector<16x256xf32>
    %5 = arith.addf %2, %4 : vector<16x256xf32>
    %c0_5 = arith.constant 0 : index
    %c0_6 = arith.constant 0 : index
    %6 = vector.load %arg3[%c0_5, %c0_6] : memref<32x128xf32, #tpu.memory_space<vmem>>, vector<32x128xf32>
    %c0_7 = arith.constant 0 : index
    %c0_8 = arith.constant 0 : index
    %7 = vector.load %arg4[%c0_7, %c0_8] : memref<32x128xf32, #tpu.memory_space<vmem>>, vector<32x128xf32>
    %cst_9 = arith.constant 0.000000e+00 : f32
    %8 = vector.broadcast %cst_9 : f32 to vector<2x32xf32>
    %cst_10 = arith.constant 0.000000e+00 : f32
    %9 = vector.broadcast %cst_10 : f32 to vector<2x32xf32>
    %cst_11 = arith.constant 0.000000e+00 : f32
    %10 = vector.broadcast %cst_11 : f32 to vector<2x32xf32>
    %cst_12 = arith.constant 0.000000e+00 : f32
    %11 = vector.broadcast %cst_12 : f32 to vector<2x32xf32>
    %12 = vector.extract_strided_slice %5 {offsets = [0, 0], sizes = [2, 128], strides = [1, 1]} : vector<16x256xf32> to vector<2x128xf32>
    %cst_13 = arith.constant dense<0.000000e+00> : vector<2x128xf32>
    %13 = tpu.matmul %8, %6, %cst_13 {dimension_numbers = #tpu.dot_dimension_numbers<[1], [0], [0], [1], [0, 0, 1, 1], [], []>} : vector<2x32xf32>, vector<32x128xf32>, vector<2x128xf32> -> vector<2x128xf32>
    %14 = arith.addf %12, %13 : vector<2x128xf32>
    %15 = arith.negf %14 : vector<2x128xf32>
    %16 = math.exp %15 : vector<2x128xf32>
    %cst_14 = arith.constant 1.000000e+00 : f32
    %17 = vector.broadcast %cst_14 : f32 to vector<2x128xf32>
    %18 = arith.addf %17, %16 : vector<2x128xf32>
    %19 = arith.divf %17, %18 : vector<2x128xf32>
    %20 = vector.extract_strided_slice %19 {offsets = [0, 0], sizes = [2, 32], strides = [1, 1]} : vector<2x128xf32> to vector<2x32xf32>
    %21 = vector.extract_strided_slice %19 {offsets = [0, 32], sizes = [2, 32], strides = [1, 1]} : vector<2x128xf32> to vector<2x32xf32>
    %22 = vector.extract_strided_slice %19 {offsets = [0, 96], sizes = [2, 32], strides = [1, 1]} : vector<2x128xf32> to vector<2x32xf32>
    %23 = vector.extract_strided_slice %14 {offsets = [0, 64], sizes = [2, 32], strides = [1, 1]} : vector<2x128xf32> to vector<2x32xf32>
    %24 = math.tanh %23 : vector<2x32xf32>
    %25 = arith.mulf %21, %9 : vector<2x32xf32>
    %26 = arith.mulf %20, %24 : vector<2x32xf32>
    %27 = arith.addf %25, %26 : vector<2x32xf32>
    %28 = math.tanh %27 : vector<2x32xf32>
    %29 = arith.mulf %22, %28 : vector<2x32xf32>
    %30 = vector.extract_strided_slice %5 {offsets = [14, 128], sizes = [2, 128], strides = [1, 1]} : vector<16x256xf32> to vector<2x128xf32>
    %cst_15 = arith.constant dense<0.000000e+00> : vector<2x128xf32>
    %31 = tpu.matmul %10, %7, %cst_15 {dimension_numbers = #tpu.dot_dimension_numbers<[1], [0], [0], [1], [0, 0, 1, 1], [], []>} : vector<2x32xf32>, vector<32x128xf32>, vector<2x128xf32> -> vector<2x128xf32>
    %32 = arith.addf %30, %31 : vector<2x128xf32>
    %33 = arith.negf %32 : vector<2x128xf32>
    %34 = math.exp %33 : vector<2x128xf32>
    %cst_16 = arith.constant 1.000000e+00 : f32
    %35 = vector.broadcast %cst_16 : f32 to vector<2x128xf32>
    %36 = arith.addf %35, %34 : vector<2x128xf32>
    %37 = arith.divf %35, %36 : vector<2x128xf32>
    %38 = vector.extract_strided_slice %37 {offsets = [0, 0], sizes = [2, 32], strides = [1, 1]} : vector<2x128xf32> to vector<2x32xf32>
    %39 = vector.extract_strided_slice %37 {offsets = [0, 32], sizes = [2, 32], strides = [1, 1]} : vector<2x128xf32> to vector<2x32xf32>
    %40 = vector.extract_strided_slice %37 {offsets = [0, 96], sizes = [2, 32], strides = [1, 1]} : vector<2x128xf32> to vector<2x32xf32>
    %41 = vector.extract_strided_slice %32 {offsets = [0, 64], sizes = [2, 32], strides = [1, 1]} : vector<2x128xf32> to vector<2x32xf32>
    %42 = math.tanh %41 : vector<2x32xf32>
    %43 = arith.mulf %39, %11 : vector<2x32xf32>
    %44 = arith.mulf %38, %42 : vector<2x32xf32>
    %45 = arith.addf %43, %44 : vector<2x32xf32>
    %46 = math.tanh %45 : vector<2x32xf32>
    %47 = arith.mulf %40, %46 : vector<2x32xf32>
    %c0_17 = arith.constant 0 : index
    %c0_18 = arith.constant 0 : index
    %48 = vector.load %arg24[%c0_17, %c0_18] : memref<16x32xf32, #tpu.memory_space<vmem>>, vector<2x32xf32>
    tpu.vector_store %arg24[%c0_17, %c0_18], %29 {strides = array<i32>} : memref<16x32xf32, #tpu.memory_space<vmem>>, vector<2x32xf32>,
    %c14 = arith.constant 14 : index
    %c0_19 = arith.constant 0 : index
    %49 = vector.load %arg25[%c14, %c0_19] : memref<16x32xf32, #tpu.memory_space<vmem>>, vector<2x32xf32>
    tpu.vector_store %arg25[%c14, %c0_19], %47 {strides = array<i32>} : memref<16x32xf32, #tpu.memory_space<vmem>>, vector<2x32xf32>,
    %50 = vector.extract_strided_slice %5 {offsets = [2, 0], sizes = [2, 128], strides = [1, 1]} : vector<16x256xf32> to vector<2x128xf32>
    %cst_20 = arith.constant dense<0.000000e+00> : vector<2x128xf32>
    %51 = tpu.matmul %29, %6, %cst_20 {dimension_numbers = #tpu.dot_dimension_numbers<[1], [0], [0], [1], [0, 0, 1, 1], [], []>} : vector<2x32xf32>, vector<32x128xf32>, vector<2x128xf32> -> vector<2x128xf32>
    %52 = arith.addf %50, %51 : vector<2x128xf32>
    %53 = arith.negf %52 : vector<2x128xf32>
    %54 = math.exp %53 : vector<2x128xf32>
    %cst_21 = arith.constant 1.000000e+00 : f32
    %55 = vector.broadcast %cst_21 : f32 to vector<2x128xf32>
    %56 = arith.addf %55, %54 : vector<2x128xf32>
    %57 = arith.divf %55, %56 : vector<2x128xf32>
    %58 = vector.extract_strided_slice %57 {offsets = [0, 0], sizes = [2, 32], strides = [1, 1]} : vector<2x128xf32> to vector<2x32xf32>
    %59 = vector.extract_strided_slice %57 {offsets = [0, 32], sizes = [2, 32], strides = [1, 1]} : vector<2x128xf32> to vector<2x32xf32>
    %60 = vector.extract_strided_slice %57 {offsets = [0, 96], sizes = [2, 32], strides = [1, 1]} : vector<2x128xf32> to vector<2x32xf32>
    %61 = vector.extract_strided_slice %52 {offsets = [0, 64], sizes = [2, 32], strides = [1, 1]} : vector<2x128xf32> to vector<2x32xf32>
    %62 = math.tanh %61 : vector<2x32xf32>
    %63 = arith.mulf %59, %27 : vector<2x32xf32>
    %64 = arith.mulf %58, %62 : vector<2x32xf32>
    %65 = arith.addf %63, %64 : vector<2x32xf32>
    %66 = math.tanh %65 : vector<2x32xf32>
    %67 = arith.mulf %60, %66 : vector<2x32xf32>
    %68 = vector.extract_strided_slice %5 {offsets = [12, 128], sizes = [2, 128], strides = [1, 1]} : vector<16x256xf32> to vector<2x128xf32>
    %cst_22 = arith.constant dense<0.000000e+00> : vector<2x128xf32>
    %69 = tpu.matmul %47, %7, %cst_22 {dimension_numbers = #tpu.dot_dimension_numbers<[1], [0], [0], [1], [0, 0, 1, 1], [], []>} : vector<2x32xf32>, vector<32x128xf32>, vector<2x128xf32> -> vector<2x128xf32>
    %70 = arith.addf %68, %69 : vector<2x128xf32>
    %71 = arith.negf %70 : vector<2x128xf32>
    %72 = math.exp %71 : vector<2x128xf32>
    %cst_23 = arith.constant 1.000000e+00 : f32
    %73 = vector.broadcast %cst_23 : f32 to vector<2x128xf32>
    %74 = arith.addf %73, %72 : vector<2x128xf32>
    %75 = arith.divf %73, %74 : vector<2x128xf32>
    %76 = vector.extract_strided_slice %75 {offsets = [0, 0], sizes = [2, 32], strides = [1, 1]} : vector<2x128xf32> to vector<2x32xf32>
    %77 = vector.extract_strided_slice %75 {offsets = [0, 32], sizes = [2, 32], strides = [1, 1]} : vector<2x128xf32> to vector<2x32xf32>
    %78 = vector.extract_strided_slice %75 {offsets = [0, 96], sizes = [2, 32], strides = [1, 1]} : vector<2x128xf32> to vector<2x32xf32>
    %79 = vector.extract_strided_slice %70 {offsets = [0, 64], sizes = [2, 32], strides = [1, 1]} : vector<2x128xf32> to vector<2x32xf32>
    %80 = math.tanh %79 : vector<2x32xf32>
    %81 = arith.mulf %77, %45 : vector<2x32xf32>
    %82 = arith.mulf %76, %80 : vector<2x32xf32>
    %83 = arith.addf %81, %82 : vector<2x32xf32>
    %84 = math.tanh %83 : vector<2x32xf32>
    %85 = arith.mulf %78, %84 : vector<2x32xf32>
    %c2 = arith.constant 2 : index
    %c0_24 = arith.constant 0 : index
    %86 = vector.load %arg24[%c2, %c0_24] : memref<16x32xf32, #tpu.memory_space<vmem>>, vector<2x32xf32>
    tpu.vector_store %arg24[%c2, %c0_24], %67 {strides = array<i32>} : memref<16x32xf32, #tpu.memory_space<vmem>>, vector<2x32xf32>,
    %c12 = arith.constant 12 : index
    %c0_25 = arith.constant 0 : index
    %87 = vector.load %arg25[%c12, %c0_25] : memref<16x32xf32, #tpu.memory_space<vmem>>, vector<2x32xf32>
    tpu.vector_store %arg25[%c12, %c0_25], %85 {strides = array<i32>} : memref<16x32xf32, #tpu.memory_space<vmem>>, vector<2x32xf32>,
    %88 = vector.extract_strided_slice %5 {offsets = [4, 0], sizes = [2, 128], strides = [1, 1]} : vector<16x256xf32> to vector<2x128xf32>
    %cst_26 = arith.constant dense<0.000000e+00> : vector<2x128xf32>
    %89 = tpu.matmul %67, %6, %cst_26 {dimension_numbers = #tpu.dot_dimension_numbers<[1], [0], [0], [1], [0, 0, 1, 1], [], []>} : vector<2x32xf32>, vector<32x128xf32>, vector<2x128xf32> -> vector<2x128xf32>
    %90 = arith.addf %88, %89 : vector<2x128xf32>
    %91 = arith.negf %90 : vector<2x128xf32>
    %92 = math.exp %91 : vector<2x128xf32>
    %cst_27 = arith.constant 1.000000e+00 : f32
    %93 = vector.broadcast %cst_27 : f32 to vector<2x128xf32>
    %94 = arith.addf %93, %92 : vector<2x128xf32>
    %95 = arith.divf %93, %94 : vector<2x128xf32>
    %96 = vector.extract_strided_slice %95 {offsets = [0, 0], sizes = [2, 32], strides = [1, 1]} : vector<2x128xf32> to vector<2x32xf32>
    %97 = vector.extract_strided_slice %95 {offsets = [0, 32], sizes = [2, 32], strides = [1, 1]} : vector<2x128xf32> to vector<2x32xf32>
    %98 = vector.extract_strided_slice %95 {offsets = [0, 96], sizes = [2, 32], strides = [1, 1]} : vector<2x128xf32> to vector<2x32xf32>
    %99 = vector.extract_strided_slice %90 {offsets = [0, 64], sizes = [2, 32], strides = [1, 1]} : vector<2x128xf32> to vector<2x32xf32>
    %100 = math.tanh %99 : vector<2x32xf32>
    %101 = arith.mulf %97, %65 : vector<2x32xf32>
    %102 = arith.mulf %96, %100 : vector<2x32xf32>
    %103 = arith.addf %101, %102 : vector<2x32xf32>
    %104 = math.tanh %103 : vector<2x32xf32>
    %105 = arith.mulf %98, %104 : vector<2x32xf32>
    %106 = vector.extract_strided_slice %5 {offsets = [10, 128], sizes = [2, 128], strides = [1, 1]} : vector<16x256xf32> to vector<2x128xf32>
    %cst_28 = arith.constant dense<0.000000e+00> : vector<2x128xf32>
    %107 = tpu.matmul %85, %7, %cst_28 {dimension_numbers = #tpu.dot_dimension_numbers<[1], [0], [0], [1], [0, 0, 1, 1], [], []>} : vector<2x32xf32>, vector<32x128xf32>, vector<2x128xf32> -> vector<2x128xf32>
    %108 = arith.addf %106, %107 : vector<2x128xf32>
    %109 = arith.negf %108 : vector<2x128xf32>
    %110 = math.exp %109 : vector<2x128xf32>
    %cst_29 = arith.constant 1.000000e+00 : f32
    %111 = vector.broadcast %cst_29 : f32 to vector<2x128xf32>
    %112 = arith.addf %111, %110 : vector<2x128xf32>
    %113 = arith.divf %111, %112 : vector<2x128xf32>
    %114 = vector.extract_strided_slice %113 {offsets = [0, 0], sizes = [2, 32], strides = [1, 1]} : vector<2x128xf32> to vector<2x32xf32>
    %115 = vector.extract_strided_slice %113 {offsets = [0, 32], sizes = [2, 32], strides = [1, 1]} : vector<2x128xf32> to vector<2x32xf32>
    %116 = vector.extract_strided_slice %113 {offsets = [0, 96], sizes = [2, 32], strides = [1, 1]} : vector<2x128xf32> to vector<2x32xf32>
    %117 = vector.extract_strided_slice %108 {offsets = [0, 64], sizes = [2, 32], strides = [1, 1]} : vector<2x128xf32> to vector<2x32xf32>
    %118 = math.tanh %117 : vector<2x32xf32>
    %119 = arith.mulf %115, %83 : vector<2x32xf32>
    %120 = arith.mulf %114, %118 : vector<2x32xf32>
    %121 = arith.addf %119, %120 : vector<2x32xf32>
    %122 = math.tanh %121 : vector<2x32xf32>
    %123 = arith.mulf %116, %122 : vector<2x32xf32>
    %c4 = arith.constant 4 : index
    %c0_30 = arith.constant 0 : index
    %124 = vector.load %arg24[%c4, %c0_30] : memref<16x32xf32, #tpu.memory_space<vmem>>, vector<2x32xf32>
    tpu.vector_store %arg24[%c4, %c0_30], %105 {strides = array<i32>} : memref<16x32xf32, #tpu.memory_space<vmem>>, vector<2x32xf32>,
    %c10 = arith.constant 10 : index
    %c0_31 = arith.constant 0 : index
    %125 = vector.load %arg25[%c10, %c0_31] : memref<16x32xf32, #tpu.memory_space<vmem>>, vector<2x32xf32>
    tpu.vector_store %arg25[%c10, %c0_31], %123 {strides = array<i32>} : memref<16x32xf32, #tpu.memory_space<vmem>>, vector<2x32xf32>,
    %126 = vector.extract_strided_slice %5 {offsets = [6, 0], sizes = [2, 128], strides = [1, 1]} : vector<16x256xf32> to vector<2x128xf32>
    %cst_32 = arith.constant dense<0.000000e+00> : vector<2x128xf32>
    %127 = tpu.matmul %105, %6, %cst_32 {dimension_numbers = #tpu.dot_dimension_numbers<[1], [0], [0], [1], [0, 0, 1, 1], [], []>} : vector<2x32xf32>, vector<32x128xf32>, vector<2x128xf32> -> vector<2x128xf32>
    %128 = arith.addf %126, %127 : vector<2x128xf32>
    %129 = arith.negf %128 : vector<2x128xf32>
    %130 = math.exp %129 : vector<2x128xf32>
    %cst_33 = arith.constant 1.000000e+00 : f32
    %131 = vector.broadcast %cst_33 : f32 to vector<2x128xf32>
    %132 = arith.addf %131, %130 : vector<2x128xf32>
    %133 = arith.divf %131, %132 : vector<2x128xf32>
    %134 = vector.extract_strided_slice %133 {offsets = [0, 0], sizes = [2, 32], strides = [1, 1]} : vector<2x128xf32> to vector<2x32xf32>
    %135 = vector.extract_strided_slice %133 {offsets = [0, 32], sizes = [2, 32], strides = [1, 1]} : vector<2x128xf32> to vector<2x32xf32>
    %136 = vector.extract_strided_slice %133 {offsets = [0, 96], sizes = [2, 32], strides = [1, 1]} : vector<2x128xf32> to vector<2x32xf32>
    %137 = vector.extract_strided_slice %128 {offsets = [0, 64], sizes = [2, 32], strides = [1, 1]} : vector<2x128xf32> to vector<2x32xf32>
    %138 = math.tanh %137 : vector<2x32xf32>
    %139 = arith.mulf %135, %103 : vector<2x32xf32>
    %140 = arith.mulf %134, %138 : vector<2x32xf32>
    %141 = arith.addf %139, %140 : vector<2x32xf32>
    %142 = math.tanh %141 : vector<2x32xf32>
    %143 = arith.mulf %136, %142 : vector<2x32xf32>
    %144 = vector.extract_strided_slice %5 {offsets = [8, 128], sizes = [2, 128], strides = [1, 1]} : vector<16x256xf32> to vector<2x128xf32>
    %cst_34 = arith.constant dense<0.000000e+00> : vector<2x128xf32>
    %145 = tpu.matmul %123, %7, %cst_34 {dimension_numbers = #tpu.dot_dimension_numbers<[1], [0], [0], [1], [0, 0, 1, 1], [], []>} : vector<2x32xf32>, vector<32x128xf32>, vector<2x128xf32> -> vector<2x128xf32>
    %146 = arith.addf %144, %145 : vector<2x128xf32>
    %147 = arith.negf %146 : vector<2x128xf32>
    %148 = math.exp %147 : vector<2x128xf32>
    %cst_35 = arith.constant 1.000000e+00 : f32
    %149 = vector.broadcast %cst_35 : f32 to vector<2x128xf32>
    %150 = arith.addf %149, %148 : vector<2x128xf32>
    %151 = arith.divf %149, %150 : vector<2x128xf32>
    %152 = vector.extract_strided_slice %151 {offsets = [0, 0], sizes = [2, 32], strides = [1, 1]} : vector<2x128xf32> to vector<2x32xf32>
    %153 = vector.extract_strided_slice %151 {offsets = [0, 32], sizes = [2, 32], strides = [1, 1]} : vector<2x128xf32> to vector<2x32xf32>
    %154 = vector.extract_strided_slice %151 {offsets = [0, 96], sizes = [2, 32], strides = [1, 1]} : vector<2x128xf32> to vector<2x32xf32>
    %155 = vector.extract_strided_slice %146 {offsets = [0, 64], sizes = [2, 32], strides = [1, 1]} : vector<2x128xf32> to vector<2x32xf32>
    %156 = math.tanh %155 : vector<2x32xf32>
    %157 = arith.mulf %153, %121 : vector<2x32xf32>
    %158 = arith.mulf %152, %156 : vector<2x32xf32>
    %159 = arith.addf %157, %158 : vector<2x32xf32>
    %160 = math.tanh %159 : vector<2x32xf32>
    %161 = arith.mulf %154, %160 : vector<2x32xf32>
    %c6 = arith.constant 6 : index
    %c0_36 = arith.constant 0 : index
    %162 = vector.load %arg24[%c6, %c0_36] : memref<16x32xf32, #tpu.memory_space<vmem>>, vector<2x32xf32>
    tpu.vector_store %arg24[%c6, %c0_36], %143 {strides = array<i32>} : memref<16x32xf32, #tpu.memory_space<vmem>>, vector<2x32xf32>,
    %c8 = arith.constant 8 : index
    %c0_37 = arith.constant 0 : index
    %163 = vector.load %arg25[%c8, %c0_37] : memref<16x32xf32, #tpu.memory_space<vmem>>, vector<2x32xf32>
    tpu.vector_store %arg25[%c8, %c0_37], %161 {strides = array<i32>} : memref<16x32xf32, #tpu.memory_space<vmem>>, vector<2x32xf32>,
    %164 = vector.extract_strided_slice %5 {offsets = [8, 0], sizes = [2, 128], strides = [1, 1]} : vector<16x256xf32> to vector<2x128xf32>
    %cst_38 = arith.constant dense<0.000000e+00> : vector<2x128xf32>
    %165 = tpu.matmul %143, %6, %cst_38 {dimension_numbers = #tpu.dot_dimension_numbers<[1], [0], [0], [1], [0, 0, 1, 1], [], []>} : vector<2x32xf32>, vector<32x128xf32>, vector<2x128xf32> -> vector<2x128xf32>
    %166 = arith.addf %164, %165 : vector<2x128xf32>
    %167 = arith.negf %166 : vector<2x128xf32>
    %168 = math.exp %167 : vector<2x128xf32>
    %cst_39 = arith.constant 1.000000e+00 : f32
    %169 = vector.broadcast %cst_39 : f32 to vector<2x128xf32>
    %170 = arith.addf %169, %168 : vector<2x128xf32>
    %171 = arith.divf %169, %170 : vector<2x128xf32>
    %172 = vector.extract_strided_slice %171 {offsets = [0, 0], sizes = [2, 32], strides = [1, 1]} : vector<2x128xf32> to vector<2x32xf32>
    %173 = vector.extract_strided_slice %171 {offsets = [0, 32], sizes = [2, 32], strides = [1, 1]} : vector<2x128xf32> to vector<2x32xf32>
    %174 = vector.extract_strided_slice %171 {offsets = [0, 96], sizes = [2, 32], strides = [1, 1]} : vector<2x128xf32> to vector<2x32xf32>
    %175 = vector.extract_strided_slice %166 {offsets = [0, 64], sizes = [2, 32], strides = [1, 1]} : vector<2x128xf32> to vector<2x32xf32>
    %176 = math.tanh %175 : vector<2x32xf32>
    %177 = arith.mulf %173, %141 : vector<2x32xf32>
    %178 = arith.mulf %172, %176 : vector<2x32xf32>
    %179 = arith.addf %177, %178 : vector<2x32xf32>
    %180 = math.tanh %179 : vector<2x32xf32>
    %181 = arith.mulf %174, %180 : vector<2x32xf32>
    %182 = vector.extract_strided_slice %5 {offsets = [6, 128], sizes = [2, 128], strides = [1, 1]} : vector<16x256xf32> to vector<2x128xf32>
    %cst_40 = arith.constant dense<0.000000e+00> : vector<2x128xf32>
    %183 = tpu.matmul %161, %7, %cst_40 {dimension_numbers = #tpu.dot_dimension_numbers<[1], [0], [0], [1], [0, 0, 1, 1], [], []>} : vector<2x32xf32>, vector<32x128xf32>, vector<2x128xf32> -> vector<2x128xf32>
    %184 = arith.addf %182, %183 : vector<2x128xf32>
    %185 = arith.negf %184 : vector<2x128xf32>
    %186 = math.exp %185 : vector<2x128xf32>
    %cst_41 = arith.constant 1.000000e+00 : f32
    %187 = vector.broadcast %cst_41 : f32 to vector<2x128xf32>
    %188 = arith.addf %187, %186 : vector<2x128xf32>
    %189 = arith.divf %187, %188 : vector<2x128xf32>
    %190 = vector.extract_strided_slice %189 {offsets = [0, 0], sizes = [2, 32], strides = [1, 1]} : vector<2x128xf32> to vector<2x32xf32>
    %191 = vector.extract_strided_slice %189 {offsets = [0, 32], sizes = [2, 32], strides = [1, 1]} : vector<2x128xf32> to vector<2x32xf32>
    %192 = vector.extract_strided_slice %189 {offsets = [0, 96], sizes = [2, 32], strides = [1, 1]} : vector<2x128xf32> to vector<2x32xf32>
    %193 = vector.extract_strided_slice %184 {offsets = [0, 64], sizes = [2, 32], strides = [1, 1]} : vector<2x128xf32> to vector<2x32xf32>
    %194 = math.tanh %193 : vector<2x32xf32>
    %195 = arith.mulf %191, %159 : vector<2x32xf32>
    %196 = arith.mulf %190, %194 : vector<2x32xf32>
    %197 = arith.addf %195, %196 : vector<2x32xf32>
    %198 = math.tanh %197 : vector<2x32xf32>
    %199 = arith.mulf %192, %198 : vector<2x32xf32>
    %c8_42 = arith.constant 8 : index
    %c0_43 = arith.constant 0 : index
    %200 = vector.load %arg24[%c8_42, %c0_43] : memref<16x32xf32, #tpu.memory_space<vmem>>, vector<2x32xf32>
    tpu.vector_store %arg24[%c8_42, %c0_43], %181 {strides = array<i32>} : memref<16x32xf32, #tpu.memory_space<vmem>>, vector<2x32xf32>,
    %c6_44 = arith.constant 6 : index
    %c0_45 = arith.constant 0 : index
    %201 = vector.load %arg25[%c6_44, %c0_45] : memref<16x32xf32, #tpu.memory_space<vmem>>, vector<2x32xf32>
    tpu.vector_store %arg25[%c6_44, %c0_45], %199 {strides = array<i32>} : memref<16x32xf32, #tpu.memory_space<vmem>>, vector<2x32xf32>,
    %202 = vector.extract_strided_slice %5 {offsets = [10, 0], sizes = [2, 128], strides = [1, 1]} : vector<16x256xf32> to vector<2x128xf32>
    %cst_46 = arith.constant dense<0.000000e+00> : vector<2x128xf32>
    %203 = tpu.matmul %181, %6, %cst_46 {dimension_numbers = #tpu.dot_dimension_numbers<[1], [0], [0], [1], [0, 0, 1, 1], [], []>} : vector<2x32xf32>, vector<32x128xf32>, vector<2x128xf32> -> vector<2x128xf32>
    %204 = arith.addf %202, %203 : vector<2x128xf32>
    %205 = arith.negf %204 : vector<2x128xf32>
    %206 = math.exp %205 : vector<2x128xf32>
    %cst_47 = arith.constant 1.000000e+00 : f32
    %207 = vector.broadcast %cst_47 : f32 to vector<2x128xf32>
    %208 = arith.addf %207, %206 : vector<2x128xf32>
    %209 = arith.divf %207, %208 : vector<2x128xf32>
    %210 = vector.extract_strided_slice %209 {offsets = [0, 0], sizes = [2, 32], strides = [1, 1]} : vector<2x128xf32> to vector<2x32xf32>
    %211 = vector.extract_strided_slice %209 {offsets = [0, 32], sizes = [2, 32], strides = [1, 1]} : vector<2x128xf32> to vector<2x32xf32>
    %212 = vector.extract_strided_slice %209 {offsets = [0, 96], sizes = [2, 32], strides = [1, 1]} : vector<2x128xf32> to vector<2x32xf32>
    %213 = vector.extract_strided_slice %204 {offsets = [0, 64], sizes = [2, 32], strides = [1, 1]} : vector<2x128xf32> to vector<2x32xf32>
    %214 = math.tanh %213 : vector<2x32xf32>
    %215 = arith.mulf %211, %179 : vector<2x32xf32>
    %216 = arith.mulf %210, %214 : vector<2x32xf32>
    %217 = arith.addf %215, %216 : vector<2x32xf32>
    %218 = math.tanh %217 : vector<2x32xf32>
    %219 = arith.mulf %212, %218 : vector<2x32xf32>
    %220 = vector.extract_strided_slice %5 {offsets = [4, 128], sizes = [2, 128], strides = [1, 1]} : vector<16x256xf32> to vector<2x128xf32>
    %cst_48 = arith.constant dense<0.000000e+00> : vector<2x128xf32>
    %221 = tpu.matmul %199, %7, %cst_48 {dimension_numbers = #tpu.dot_dimension_numbers<[1], [0], [0], [1], [0, 0, 1, 1], [], []>} : vector<2x32xf32>, vector<32x128xf32>, vector<2x128xf32> -> vector<2x128xf32>
    %222 = arith.addf %220, %221 : vector<2x128xf32>
    %223 = arith.negf %222 : vector<2x128xf32>
    %224 = math.exp %223 : vector<2x128xf32>
    %cst_49 = arith.constant 1.000000e+00 : f32
    %225 = vector.broadcast %cst_49 : f32 to vector<2x128xf32>
    %226 = arith.addf %225, %224 : vector<2x128xf32>
    %227 = arith.divf %225, %226 : vector<2x128xf32>
    %228 = vector.extract_strided_slice %227 {offsets = [0, 0], sizes = [2, 32], strides = [1, 1]} : vector<2x128xf32> to vector<2x32xf32>
    %229 = vector.extract_strided_slice %227 {offsets = [0, 32], sizes = [2, 32], strides = [1, 1]} : vector<2x128xf32> to vector<2x32xf32>
    %230 = vector.extract_strided_slice %227 {offsets = [0, 96], sizes = [2, 32], strides = [1, 1]} : vector<2x128xf32> to vector<2x32xf32>
    %231 = vector.extract_strided_slice %222 {offsets = [0, 64], sizes = [2, 32], strides = [1, 1]} : vector<2x128xf32> to vector<2x32xf32>
    %232 = math.tanh %231 : vector<2x32xf32>
    %233 = arith.mulf %229, %197 : vector<2x32xf32>
    %234 = arith.mulf %228, %232 : vector<2x32xf32>
    %235 = arith.addf %233, %234 : vector<2x32xf32>
    %236 = math.tanh %235 : vector<2x32xf32>
    %237 = arith.mulf %230, %236 : vector<2x32xf32>
    %c10_50 = arith.constant 10 : index
    %c0_51 = arith.constant 0 : index
    %238 = vector.load %arg24[%c10_50, %c0_51] : memref<16x32xf32, #tpu.memory_space<vmem>>, vector<2x32xf32>
    tpu.vector_store %arg24[%c10_50, %c0_51], %219 {strides = array<i32>} : memref<16x32xf32, #tpu.memory_space<vmem>>, vector<2x32xf32>,
    %c4_52 = arith.constant 4 : index
    %c0_53 = arith.constant 0 : index
    %239 = vector.load %arg25[%c4_52, %c0_53] : memref<16x32xf32, #tpu.memory_space<vmem>>, vector<2x32xf32>
    tpu.vector_store %arg25[%c4_52, %c0_53], %237 {strides = array<i32>} : memref<16x32xf32, #tpu.memory_space<vmem>>, vector<2x32xf32>,
    %240 = vector.extract_strided_slice %5 {offsets = [12, 0], sizes = [2, 128], strides = [1, 1]} : vector<16x256xf32> to vector<2x128xf32>
    %cst_54 = arith.constant dense<0.000000e+00> : vector<2x128xf32>
    %241 = tpu.matmul %219, %6, %cst_54 {dimension_numbers = #tpu.dot_dimension_numbers<[1], [0], [0], [1], [0, 0, 1, 1], [], []>} : vector<2x32xf32>, vector<32x128xf32>, vector<2x128xf32> -> vector<2x128xf32>
    %242 = arith.addf %240, %241 : vector<2x128xf32>
    %243 = arith.negf %242 : vector<2x128xf32>
    %244 = math.exp %243 : vector<2x128xf32>
    %cst_55 = arith.constant 1.000000e+00 : f32
    %245 = vector.broadcast %cst_55 : f32 to vector<2x128xf32>
    %246 = arith.addf %245, %244 : vector<2x128xf32>
    %247 = arith.divf %245, %246 : vector<2x128xf32>
    %248 = vector.extract_strided_slice %247 {offsets = [0, 0], sizes = [2, 32], strides = [1, 1]} : vector<2x128xf32> to vector<2x32xf32>
    %249 = vector.extract_strided_slice %247 {offsets = [0, 32], sizes = [2, 32], strides = [1, 1]} : vector<2x128xf32> to vector<2x32xf32>
    %250 = vector.extract_strided_slice %247 {offsets = [0, 96], sizes = [2, 32], strides = [1, 1]} : vector<2x128xf32> to vector<2x32xf32>
    %251 = vector.extract_strided_slice %242 {offsets = [0, 64], sizes = [2, 32], strides = [1, 1]} : vector<2x128xf32> to vector<2x32xf32>
    %252 = math.tanh %251 : vector<2x32xf32>
    %253 = arith.mulf %249, %217 : vector<2x32xf32>
    %254 = arith.mulf %248, %252 : vector<2x32xf32>
    %255 = arith.addf %253, %254 : vector<2x32xf32>
    %256 = math.tanh %255 : vector<2x32xf32>
    %257 = arith.mulf %250, %256 : vector<2x32xf32>
    %258 = vector.extract_strided_slice %5 {offsets = [2, 128], sizes = [2, 128], strides = [1, 1]} : vector<16x256xf32> to vector<2x128xf32>
    %cst_56 = arith.constant dense<0.000000e+00> : vector<2x128xf32>
    %259 = tpu.matmul %237, %7, %cst_56 {dimension_numbers = #tpu.dot_dimension_numbers<[1], [0], [0], [1], [0, 0, 1, 1], [], []>} : vector<2x32xf32>, vector<32x128xf32>, vector<2x128xf32> -> vector<2x128xf32>
    %260 = arith.addf %258, %259 : vector<2x128xf32>
    %261 = arith.negf %260 : vector<2x128xf32>
    %262 = math.exp %261 : vector<2x128xf32>
    %cst_57 = arith.constant 1.000000e+00 : f32
    %263 = vector.broadcast %cst_57 : f32 to vector<2x128xf32>
    %264 = arith.addf %263, %262 : vector<2x128xf32>
    %265 = arith.divf %263, %264 : vector<2x128xf32>
    %266 = vector.extract_strided_slice %265 {offsets = [0, 0], sizes = [2, 32], strides = [1, 1]} : vector<2x128xf32> to vector<2x32xf32>
    %267 = vector.extract_strided_slice %265 {offsets = [0, 32], sizes = [2, 32], strides = [1, 1]} : vector<2x128xf32> to vector<2x32xf32>
    %268 = vector.extract_strided_slice %265 {offsets = [0, 96], sizes = [2, 32], strides = [1, 1]} : vector<2x128xf32> to vector<2x32xf32>
    %269 = vector.extract_strided_slice %260 {offsets = [0, 64], sizes = [2, 32], strides = [1, 1]} : vector<2x128xf32> to vector<2x32xf32>
    %270 = math.tanh %269 : vector<2x32xf32>
    %271 = arith.mulf %267, %235 : vector<2x32xf32>
    %272 = arith.mulf %266, %270 : vector<2x32xf32>
    %273 = arith.addf %271, %272 : vector<2x32xf32>
    %274 = math.tanh %273 : vector<2x32xf32>
    %275 = arith.mulf %268, %274 : vector<2x32xf32>
    %c12_58 = arith.constant 12 : index
    %c0_59 = arith.constant 0 : index
    %276 = vector.load %arg24[%c12_58, %c0_59] : memref<16x32xf32, #tpu.memory_space<vmem>>, vector<2x32xf32>
    tpu.vector_store %arg24[%c12_58, %c0_59], %257 {strides = array<i32>} : memref<16x32xf32, #tpu.memory_space<vmem>>, vector<2x32xf32>,
    %c2_60 = arith.constant 2 : index
    %c0_61 = arith.constant 0 : index
    %277 = vector.load %arg25[%c2_60, %c0_61] : memref<16x32xf32, #tpu.memory_space<vmem>>, vector<2x32xf32>
    tpu.vector_store %arg25[%c2_60, %c0_61], %275 {strides = array<i32>} : memref<16x32xf32, #tpu.memory_space<vmem>>, vector<2x32xf32>,
    %278 = vector.extract_strided_slice %5 {offsets = [14, 0], sizes = [2, 128], strides = [1, 1]} : vector<16x256xf32> to vector<2x128xf32>
    %cst_62 = arith.constant dense<0.000000e+00> : vector<2x128xf32>
    %279 = tpu.matmul %257, %6, %cst_62 {dimension_numbers = #tpu.dot_dimension_numbers<[1], [0], [0], [1], [0, 0, 1, 1], [], []>} : vector<2x32xf32>, vector<32x128xf32>, vector<2x128xf32> -> vector<2x128xf32>
    %280 = arith.addf %278, %279 : vector<2x128xf32>
    %281 = arith.negf %280 : vector<2x128xf32>
    %282 = math.exp %281 : vector<2x128xf32>
    %cst_63 = arith.constant 1.000000e+00 : f32
    %283 = vector.broadcast %cst_63 : f32 to vector<2x128xf32>
    %284 = arith.addf %283, %282 : vector<2x128xf32>
    %285 = arith.divf %283, %284 : vector<2x128xf32>
    %286 = vector.extract_strided_slice %285 {offsets = [0, 0], sizes = [2, 32], strides = [1, 1]} : vector<2x128xf32> to vector<2x32xf32>
    %287 = vector.extract_strided_slice %285 {offsets = [0, 32], sizes = [2, 32], strides = [1, 1]} : vector<2x128xf32> to vector<2x32xf32>
    %288 = vector.extract_strided_slice %285 {offsets = [0, 96], sizes = [2, 32], strides = [1, 1]} : vector<2x128xf32> to vector<2x32xf32>
    %289 = vector.extract_strided_slice %280 {offsets = [0, 64], sizes = [2, 32], strides = [1, 1]} : vector<2x128xf32> to vector<2x32xf32>
    %290 = math.tanh %289 : vector<2x32xf32>
    %291 = arith.mulf %287, %255 : vector<2x32xf32>
    %292 = arith.mulf %286, %290 : vector<2x32xf32>
    %293 = arith.addf %291, %292 : vector<2x32xf32>
    %294 = math.tanh %293 : vector<2x32xf32>
    %295 = arith.mulf %288, %294 : vector<2x32xf32>
    %296 = vector.extract_strided_slice %5 {offsets = [0, 128], sizes = [2, 128], strides = [1, 1]} : vector<16x256xf32> to vector<2x128xf32>
    %cst_64 = arith.constant dense<0.000000e+00> : vector<2x128xf32>
    %297 = tpu.matmul %275, %7, %cst_64 {dimension_numbers = #tpu.dot_dimension_numbers<[1], [0], [0], [1], [0, 0, 1, 1], [], []>} : vector<2x32xf32>, vector<32x128xf32>, vector<2x128xf32> -> vector<2x128xf32>
    %298 = arith.addf %296, %297 : vector<2x128xf32>
    %299 = arith.negf %298 : vector<2x128xf32>
    %300 = math.exp %299 : vector<2x128xf32>
    %cst_65 = arith.constant 1.000000e+00 : f32
    %301 = vector.broadcast %cst_65 : f32 to vector<2x128xf32>
    %302 = arith.addf %301, %300 : vector<2x128xf32>
    %303 = arith.divf %301, %302 : vector<2x128xf32>
    %304 = vector.extract_strided_slice %303 {offsets = [0, 0], sizes = [2, 32], strides = [1, 1]} : vector<2x128xf32> to vector<2x32xf32>
    %305 = vector.extract_strided_slice %303 {offsets = [0, 32], sizes = [2, 32], strides = [1, 1]} : vector<2x128xf32> to vector<2x32xf32>
    %306 = vector.extract_strided_slice %303 {offsets = [0, 96], sizes = [2, 32], strides = [1, 1]} : vector<2x128xf32> to vector<2x32xf32>
    %307 = vector.extract_strided_slice %298 {offsets = [0, 64], sizes = [2, 32], strides = [1, 1]} : vector<2x128xf32> to vector<2x32xf32>
    %308 = math.tanh %307 : vector<2x32xf32>
    %309 = arith.mulf %305, %273 : vector<2x32xf32>
    %310 = arith.mulf %304, %308 : vector<2x32xf32>
    %311 = arith.addf %309, %310 : vector<2x32xf32>
    %312 = math.tanh %311 : vector<2x32xf32>
    %313 = arith.mulf %306, %312 : vector<2x32xf32>
    %c14_66 = arith.constant 14 : index
    %c0_67 = arith.constant 0 : index
    %314 = vector.load %arg24[%c14_66, %c0_67] : memref<16x32xf32, #tpu.memory_space<vmem>>, vector<2x32xf32>
    tpu.vector_store %arg24[%c14_66, %c0_67], %295 {strides = array<i32>} : memref<16x32xf32, #tpu.memory_space<vmem>>, vector<2x32xf32>,
    %c0_68 = arith.constant 0 : index
    %c0_69 = arith.constant 0 : index
    %315 = vector.load %arg25[%c0_68, %c0_69] : memref<16x32xf32, #tpu.memory_space<vmem>>, vector<2x32xf32>
    tpu.vector_store %arg25[%c0_68, %c0_69], %313 {strides = array<i32>} : memref<16x32xf32, #tpu.memory_space<vmem>>, vector<2x32xf32>,
    %c0_70 = arith.constant 0 : index
    %c0_71 = arith.constant 0 : index
    %316 = vector.load %arg24[%c0_70, %c0_71] : memref<16x32xf32, #tpu.memory_space<vmem>>, vector<16x32xf32>
    %c0_72 = arith.constant 0 : index
    %c0_73 = arith.constant 0 : index
    %317 = vector.load %arg5[%c0_72, %c0_73] : memref<32x32xf32, #tpu.memory_space<vmem>>, vector<32x32xf32>
    %cst_74 = arith.constant dense<0.000000e+00> : vector<16x32xf32>
    %318 = tpu.matmul %316, %317, %cst_74 {dimension_numbers = #tpu.dot_dimension_numbers<[1], [0], [0], [1], [0, 0, 1, 1], [], []>} : vector<16x32xf32>, vector<32x32xf32>, vector<16x32xf32> -> vector<16x32xf32>
    %c0_75 = arith.constant 0 : index
    %c0_76 = arith.constant 0 : index
    %319 = vector.load %arg25[%c0_75, %c0_76] : memref<16x32xf32, #tpu.memory_space<vmem>>, vector<16x32xf32>
    %c0_77 = arith.constant 0 : index
    %c0_78 = arith.constant 0 : index
    %320 = vector.load %arg6[%c0_77, %c0_78] : memref<32x32xf32, #tpu.memory_space<vmem>>, vector<32x32xf32>
    %cst_79 = arith.constant dense<0.000000e+00> : vector<16x32xf32>
    %321 = tpu.matmul %319, %320, %cst_79 {dimension_numbers = #tpu.dot_dimension_numbers<[1], [0], [0], [1], [0, 0, 1, 1], [], []>} : vector<16x32xf32>, vector<32x32xf32>, vector<16x32xf32> -> vector<16x32xf32>
    %322 = arith.addf %318, %321 : vector<16x32xf32>
    %c0_80 = arith.constant 0 : index
    %c0_81 = arith.constant 0 : index
    %323 = vector.load %arg7[%c0_80, %c0_81] : memref<1x32xf32, #tpu.memory_space<vmem>>, vector<1x32xf32>
    %324 = vector.broadcast %323 : vector<1x32xf32> to vector<16x32xf32>
    %325 = arith.addf %322, %324 : vector<16x32xf32>
    %c0_82 = arith.constant 0 : index
    %c0_83 = arith.constant 0 : index
    %326 = vector.load %arg8[%c0_82, %c0_83] : memref<32x256xf32, #tpu.memory_space<vmem>>, vector<32x256xf32>
    %cst_84 = arith.constant dense<0.000000e+00> : vector<16x256xf32>
    %327 = tpu.matmul %325, %326, %cst_84 {dimension_numbers = #tpu.dot_dimension_numbers<[1], [0], [0], [1], [0, 0, 1, 1], [], []>} : vector<16x32xf32>, vector<32x256xf32>, vector<16x256xf32> -> vector<16x256xf32>
    %c0_85 = arith.constant 0 : index
    %c0_86 = arith.constant 0 : index
    %328 = vector.load %arg9[%c0_85, %c0_86] : memref<1x256xf32, #tpu.memory_space<vmem>>, vector<1x256xf32>
    %329 = vector.broadcast %328 : vector<1x256xf32> to vector<16x256xf32>
    %330 = arith.addf %327, %329 : vector<16x256xf32>
    %c0_87 = arith.constant 0 : index
    %c0_88 = arith.constant 0 : index
    %331 = vector.load %arg10[%c0_87, %c0_88] : memref<32x128xf32, #tpu.memory_space<vmem>>, vector<32x128xf32>
    %c0_89 = arith.constant 0 : index
    %c0_90 = arith.constant 0 : index
    %332 = vector.load %arg11[%c0_89, %c0_90] : memref<32x128xf32, #tpu.memory_space<vmem>>, vector<32x128xf32>
    %cst_91 = arith.constant 0.000000e+00 : f32
    %333 = vector.broadcast %cst_91 : f32 to vector<2x32xf32>
    %cst_92 = arith.constant 0.000000e+00 : f32
    %334 = vector.broadcast %cst_92 : f32 to vector<2x32xf32>
    %cst_93 = arith.constant 0.000000e+00 : f32
    %335 = vector.broadcast %cst_93 : f32 to vector<2x32xf32>
    %cst_94 = arith.constant 0.000000e+00 : f32
    %336 = vector.broadcast %cst_94 : f32 to vector<2x32xf32>
    %337 = vector.extract_strided_slice %330 {offsets = [0, 0], sizes = [2, 128], strides = [1, 1]} : vector<16x256xf32> to vector<2x128xf32>
    %cst_95 = arith.constant dense<0.000000e+00> : vector<2x128xf32>
    %338 = tpu.matmul %333, %331, %cst_95 {dimension_numbers = #tpu.dot_dimension_numbers<[1], [0], [0], [1], [0, 0, 1, 1], [], []>} : vector<2x32xf32>, vector<32x128xf32>, vector<2x128xf32> -> vector<2x128xf32>
    %339 = arith.addf %337, %338 : vector<2x128xf32>
    %340 = arith.negf %339 : vector<2x128xf32>
    %341 = math.exp %340 : vector<2x128xf32>
    %cst_96 = arith.constant 1.000000e+00 : f32
    %342 = vector.broadcast %cst_96 : f32 to vector<2x128xf32>
    %343 = arith.addf %342, %341 : vector<2x128xf32>
    %344 = arith.divf %342, %343 : vector<2x128xf32>
    %345 = vector.extract_strided_slice %344 {offsets = [0, 0], sizes = [2, 32], strides = [1, 1]} : vector<2x128xf32> to vector<2x32xf32>
    %346 = vector.extract_strided_slice %344 {offsets = [0, 32], sizes = [2, 32], strides = [1, 1]} : vector<2x128xf32> to vector<2x32xf32>
    %347 = vector.extract_strided_slice %344 {offsets = [0, 96], sizes = [2, 32], strides = [1, 1]} : vector<2x128xf32> to vector<2x32xf32>
    %348 = vector.extract_strided_slice %339 {offsets = [0, 64], sizes = [2, 32], strides = [1, 1]} : vector<2x128xf32> to vector<2x32xf32>
    %349 = math.tanh %348 : vector<2x32xf32>
    %350 = arith.mulf %346, %334 : vector<2x32xf32>
    %351 = arith.mulf %345, %349 : vector<2x32xf32>
    %352 = arith.addf %350, %351 : vector<2x32xf32>
    %353 = math.tanh %352 : vector<2x32xf32>
    %354 = arith.mulf %347, %353 : vector<2x32xf32>
    %355 = vector.extract_strided_slice %330 {offsets = [14, 128], sizes = [2, 128], strides = [1, 1]} : vector<16x256xf32> to vector<2x128xf32>
    %cst_97 = arith.constant dense<0.000000e+00> : vector<2x128xf32>
    %356 = tpu.matmul %335, %332, %cst_97 {dimension_numbers = #tpu.dot_dimension_numbers<[1], [0], [0], [1], [0, 0, 1, 1], [], []>} : vector<2x32xf32>, vector<32x128xf32>, vector<2x128xf32> -> vector<2x128xf32>
    %357 = arith.addf %355, %356 : vector<2x128xf32>
    %358 = arith.negf %357 : vector<2x128xf32>
    %359 = math.exp %358 : vector<2x128xf32>
    %cst_98 = arith.constant 1.000000e+00 : f32
    %360 = vector.broadcast %cst_98 : f32 to vector<2x128xf32>
    %361 = arith.addf %360, %359 : vector<2x128xf32>
    %362 = arith.divf %360, %361 : vector<2x128xf32>
    %363 = vector.extract_strided_slice %362 {offsets = [0, 0], sizes = [2, 32], strides = [1, 1]} : vector<2x128xf32> to vector<2x32xf32>
    %364 = vector.extract_strided_slice %362 {offsets = [0, 32], sizes = [2, 32], strides = [1, 1]} : vector<2x128xf32> to vector<2x32xf32>
    %365 = vector.extract_strided_slice %362 {offsets = [0, 96], sizes = [2, 32], strides = [1, 1]} : vector<2x128xf32> to vector<2x32xf32>
    %366 = vector.extract_strided_slice %357 {offsets = [0, 64], sizes = [2, 32], strides = [1, 1]} : vector<2x128xf32> to vector<2x32xf32>
    %367 = math.tanh %366 : vector<2x32xf32>
    %368 = arith.mulf %364, %336 : vector<2x32xf32>
    %369 = arith.mulf %363, %367 : vector<2x32xf32>
    %370 = arith.addf %368, %369 : vector<2x32xf32>
    %371 = math.tanh %370 : vector<2x32xf32>
    %372 = arith.mulf %365, %371 : vector<2x32xf32>
    %c0_99 = arith.constant 0 : index
    %c0_100 = arith.constant 0 : index
    %373 = vector.load %arg26[%c0_99, %c0_100] : memref<16x32xf32, #tpu.memory_space<vmem>>, vector<2x32xf32>
    tpu.vector_store %arg26[%c0_99, %c0_100], %354 {strides = array<i32>} : memref<16x32xf32, #tpu.memory_space<vmem>>, vector<2x32xf32>,
    %c14_101 = arith.constant 14 : index
    %c0_102 = arith.constant 0 : index
    %374 = vector.load %arg27[%c14_101, %c0_102] : memref<16x32xf32, #tpu.memory_space<vmem>>, vector<2x32xf32>
    tpu.vector_store %arg27[%c14_101, %c0_102], %372 {strides = array<i32>} : memref<16x32xf32, #tpu.memory_space<vmem>>, vector<2x32xf32>,
    %375 = vector.extract_strided_slice %330 {offsets = [2, 0], sizes = [2, 128], strides = [1, 1]} : vector<16x256xf32> to vector<2x128xf32>
    %cst_103 = arith.constant dense<0.000000e+00> : vector<2x128xf32>
    %376 = tpu.matmul %354, %331, %cst_103 {dimension_numbers = #tpu.dot_dimension_numbers<[1], [0], [0], [1], [0, 0, 1, 1], [], []>} : vector<2x32xf32>, vector<32x128xf32>, vector<2x128xf32> -> vector<2x128xf32>
    %377 = arith.addf %375, %376 : vector<2x128xf32>
    %378 = arith.negf %377 : vector<2x128xf32>
    %379 = math.exp %378 : vector<2x128xf32>
    %cst_104 = arith.constant 1.000000e+00 : f32
    %380 = vector.broadcast %cst_104 : f32 to vector<2x128xf32>
    %381 = arith.addf %380, %379 : vector<2x128xf32>
    %382 = arith.divf %380, %381 : vector<2x128xf32>
    %383 = vector.extract_strided_slice %382 {offsets = [0, 0], sizes = [2, 32], strides = [1, 1]} : vector<2x128xf32> to vector<2x32xf32>
    %384 = vector.extract_strided_slice %382 {offsets = [0, 32], sizes = [2, 32], strides = [1, 1]} : vector<2x128xf32> to vector<2x32xf32>
    %385 = vector.extract_strided_slice %382 {offsets = [0, 96], sizes = [2, 32], strides = [1, 1]} : vector<2x128xf32> to vector<2x32xf32>
    %386 = vector.extract_strided_slice %377 {offsets = [0, 64], sizes = [2, 32], strides = [1, 1]} : vector<2x128xf32> to vector<2x32xf32>
    %387 = math.tanh %386 : vector<2x32xf32>
    %388 = arith.mulf %384, %352 : vector<2x32xf32>
    %389 = arith.mulf %383, %387 : vector<2x32xf32>
    %390 = arith.addf %388, %389 : vector<2x32xf32>
    %391 = math.tanh %390 : vector<2x32xf32>
    %392 = arith.mulf %385, %391 : vector<2x32xf32>
    %393 = vector.extract_strided_slice %330 {offsets = [12, 128], sizes = [2, 128], strides = [1, 1]} : vector<16x256xf32> to vector<2x128xf32>
    %cst_105 = arith.constant dense<0.000000e+00> : vector<2x128xf32>
    %394 = tpu.matmul %372, %332, %cst_105 {dimension_numbers = #tpu.dot_dimension_numbers<[1], [0], [0], [1], [0, 0, 1, 1], [], []>} : vector<2x32xf32>, vector<32x128xf32>, vector<2x128xf32> -> vector<2x128xf32>
    %395 = arith.addf %393, %394 : vector<2x128xf32>
    %396 = arith.negf %395 : vector<2x128xf32>
    %397 = math.exp %396 : vector<2x128xf32>
    %cst_106 = arith.constant 1.000000e+00 : f32
    %398 = vector.broadcast %cst_106 : f32 to vector<2x128xf32>
    %399 = arith.addf %398, %397 : vector<2x128xf32>
    %400 = arith.divf %398, %399 : vector<2x128xf32>
    %401 = vector.extract_strided_slice %400 {offsets = [0, 0], sizes = [2, 32], strides = [1, 1]} : vector<2x128xf32> to vector<2x32xf32>
    %402 = vector.extract_strided_slice %400 {offsets = [0, 32], sizes = [2, 32], strides = [1, 1]} : vector<2x128xf32> to vector<2x32xf32>
    %403 = vector.extract_strided_slice %400 {offsets = [0, 96], sizes = [2, 32], strides = [1, 1]} : vector<2x128xf32> to vector<2x32xf32>
    %404 = vector.extract_strided_slice %395 {offsets = [0, 64], sizes = [2, 32], strides = [1, 1]} : vector<2x128xf32> to vector<2x32xf32>
    %405 = math.tanh %404 : vector<2x32xf32>
    %406 = arith.mulf %402, %370 : vector<2x32xf32>
    %407 = arith.mulf %401, %405 : vector<2x32xf32>
    %408 = arith.addf %406, %407 : vector<2x32xf32>
    %409 = math.tanh %408 : vector<2x32xf32>
    %410 = arith.mulf %403, %409 : vector<2x32xf32>
    %c2_107 = arith.constant 2 : index
    %c0_108 = arith.constant 0 : index
    %411 = vector.load %arg26[%c2_107, %c0_108] : memref<16x32xf32, #tpu.memory_space<vmem>>, vector<2x32xf32>
    tpu.vector_store %arg26[%c2_107, %c0_108], %392 {strides = array<i32>} : memref<16x32xf32, #tpu.memory_space<vmem>>, vector<2x32xf32>,
    %c12_109 = arith.constant 12 : index
    %c0_110 = arith.constant 0 : index
    %412 = vector.load %arg27[%c12_109, %c0_110] : memref<16x32xf32, #tpu.memory_space<vmem>>, vector<2x32xf32>
    tpu.vector_store %arg27[%c12_109, %c0_110], %410 {strides = array<i32>} : memref<16x32xf32, #tpu.memory_space<vmem>>, vector<2x32xf32>,
    %413 = vector.extract_strided_slice %330 {offsets = [4, 0], sizes = [2, 128], strides = [1, 1]} : vector<16x256xf32> to vector<2x128xf32>
    %cst_111 = arith.constant dense<0.000000e+00> : vector<2x128xf32>
    %414 = tpu.matmul %392, %331, %cst_111 {dimension_numbers = #tpu.dot_dimension_numbers<[1], [0], [0], [1], [0, 0, 1, 1], [], []>} : vector<2x32xf32>, vector<32x128xf32>, vector<2x128xf32> -> vector<2x128xf32>
    %415 = arith.addf %413, %414 : vector<2x128xf32>
    %416 = arith.negf %415 : vector<2x128xf32>
    %417 = math.exp %416 : vector<2x128xf32>
    %cst_112 = arith.constant 1.000000e+00 : f32
    %418 = vector.broadcast %cst_112 : f32 to vector<2x128xf32>
    %419 = arith.addf %418, %417 : vector<2x128xf32>
    %420 = arith.divf %418, %419 : vector<2x128xf32>
    %421 = vector.extract_strided_slice %420 {offsets = [0, 0], sizes = [2, 32], strides = [1, 1]} : vector<2x128xf32> to vector<2x32xf32>
    %422 = vector.extract_strided_slice %420 {offsets = [0, 32], sizes = [2, 32], strides = [1, 1]} : vector<2x128xf32> to vector<2x32xf32>
    %423 = vector.extract_strided_slice %420 {offsets = [0, 96], sizes = [2, 32], strides = [1, 1]} : vector<2x128xf32> to vector<2x32xf32>
    %424 = vector.extract_strided_slice %415 {offsets = [0, 64], sizes = [2, 32], strides = [1, 1]} : vector<2x128xf32> to vector<2x32xf32>
    %425 = math.tanh %424 : vector<2x32xf32>
    %426 = arith.mulf %422, %390 : vector<2x32xf32>
    %427 = arith.mulf %421, %425 : vector<2x32xf32>
    %428 = arith.addf %426, %427 : vector<2x32xf32>
    %429 = math.tanh %428 : vector<2x32xf32>
    %430 = arith.mulf %423, %429 : vector<2x32xf32>
    %431 = vector.extract_strided_slice %330 {offsets = [10, 128], sizes = [2, 128], strides = [1, 1]} : vector<16x256xf32> to vector<2x128xf32>
    %cst_113 = arith.constant dense<0.000000e+00> : vector<2x128xf32>
    %432 = tpu.matmul %410, %332, %cst_113 {dimension_numbers = #tpu.dot_dimension_numbers<[1], [0], [0], [1], [0, 0, 1, 1], [], []>} : vector<2x32xf32>, vector<32x128xf32>, vector<2x128xf32> -> vector<2x128xf32>
    %433 = arith.addf %431, %432 : vector<2x128xf32>
    %434 = arith.negf %433 : vector<2x128xf32>
    %435 = math.exp %434 : vector<2x128xf32>
    %cst_114 = arith.constant 1.000000e+00 : f32
    %436 = vector.broadcast %cst_114 : f32 to vector<2x128xf32>
    %437 = arith.addf %436, %435 : vector<2x128xf32>
    %438 = arith.divf %436, %437 : vector<2x128xf32>
    %439 = vector.extract_strided_slice %438 {offsets = [0, 0], sizes = [2, 32], strides = [1, 1]} : vector<2x128xf32> to vector<2x32xf32>
    %440 = vector.extract_strided_slice %438 {offsets = [0, 32], sizes = [2, 32], strides = [1, 1]} : vector<2x128xf32> to vector<2x32xf32>
    %441 = vector.extract_strided_slice %438 {offsets = [0, 96], sizes = [2, 32], strides = [1, 1]} : vector<2x128xf32> to vector<2x32xf32>
    %442 = vector.extract_strided_slice %433 {offsets = [0, 64], sizes = [2, 32], strides = [1, 1]} : vector<2x128xf32> to vector<2x32xf32>
    %443 = math.tanh %442 : vector<2x32xf32>
    %444 = arith.mulf %440, %408 : vector<2x32xf32>
    %445 = arith.mulf %439, %443 : vector<2x32xf32>
    %446 = arith.addf %444, %445 : vector<2x32xf32>
    %447 = math.tanh %446 : vector<2x32xf32>
    %448 = arith.mulf %441, %447 : vector<2x32xf32>
    %c4_115 = arith.constant 4 : index
    %c0_116 = arith.constant 0 : index
    %449 = vector.load %arg26[%c4_115, %c0_116] : memref<16x32xf32, #tpu.memory_space<vmem>>, vector<2x32xf32>
    tpu.vector_store %arg26[%c4_115, %c0_116], %430 {strides = array<i32>} : memref<16x32xf32, #tpu.memory_space<vmem>>, vector<2x32xf32>,
    %c10_117 = arith.constant 10 : index
    %c0_118 = arith.constant 0 : index
    %450 = vector.load %arg27[%c10_117, %c0_118] : memref<16x32xf32, #tpu.memory_space<vmem>>, vector<2x32xf32>
    tpu.vector_store %arg27[%c10_117, %c0_118], %448 {strides = array<i32>} : memref<16x32xf32, #tpu.memory_space<vmem>>, vector<2x32xf32>,
    %451 = vector.extract_strided_slice %330 {offsets = [6, 0], sizes = [2, 128], strides = [1, 1]} : vector<16x256xf32> to vector<2x128xf32>
    %cst_119 = arith.constant dense<0.000000e+00> : vector<2x128xf32>
    %452 = tpu.matmul %430, %331, %cst_119 {dimension_numbers = #tpu.dot_dimension_numbers<[1], [0], [0], [1], [0, 0, 1, 1], [], []>} : vector<2x32xf32>, vector<32x128xf32>, vector<2x128xf32> -> vector<2x128xf32>
    %453 = arith.addf %451, %452 : vector<2x128xf32>
    %454 = arith.negf %453 : vector<2x128xf32>
    %455 = math.exp %454 : vector<2x128xf32>
    %cst_120 = arith.constant 1.000000e+00 : f32
    %456 = vector.broadcast %cst_120 : f32 to vector<2x128xf32>
    %457 = arith.addf %456, %455 : vector<2x128xf32>
    %458 = arith.divf %456, %457 : vector<2x128xf32>
    %459 = vector.extract_strided_slice %458 {offsets = [0, 0], sizes = [2, 32], strides = [1, 1]} : vector<2x128xf32> to vector<2x32xf32>
    %460 = vector.extract_strided_slice %458 {offsets = [0, 32], sizes = [2, 32], strides = [1, 1]} : vector<2x128xf32> to vector<2x32xf32>
    %461 = vector.extract_strided_slice %458 {offsets = [0, 96], sizes = [2, 32], strides = [1, 1]} : vector<2x128xf32> to vector<2x32xf32>
    %462 = vector.extract_strided_slice %453 {offsets = [0, 64], sizes = [2, 32], strides = [1, 1]} : vector<2x128xf32> to vector<2x32xf32>
    %463 = math.tanh %462 : vector<2x32xf32>
    %464 = arith.mulf %460, %428 : vector<2x32xf32>
    %465 = arith.mulf %459, %463 : vector<2x32xf32>
    %466 = arith.addf %464, %465 : vector<2x32xf32>
    %467 = math.tanh %466 : vector<2x32xf32>
    %468 = arith.mulf %461, %467 : vector<2x32xf32>
    %469 = vector.extract_strided_slice %330 {offsets = [8, 128], sizes = [2, 128], strides = [1, 1]} : vector<16x256xf32> to vector<2x128xf32>
    %cst_121 = arith.constant dense<0.000000e+00> : vector<2x128xf32>
    %470 = tpu.matmul %448, %332, %cst_121 {dimension_numbers = #tpu.dot_dimension_numbers<[1], [0], [0], [1], [0, 0, 1, 1], [], []>} : vector<2x32xf32>, vector<32x128xf32>, vector<2x128xf32> -> vector<2x128xf32>
    %471 = arith.addf %469, %470 : vector<2x128xf32>
    %472 = arith.negf %471 : vector<2x128xf32>
    %473 = math.exp %472 : vector<2x128xf32>
    %cst_122 = arith.constant 1.000000e+00 : f32
    %474 = vector.broadcast %cst_122 : f32 to vector<2x128xf32>
    %475 = arith.addf %474, %473 : vector<2x128xf32>
    %476 = arith.divf %474, %475 : vector<2x128xf32>
    %477 = vector.extract_strided_slice %476 {offsets = [0, 0], sizes = [2, 32], strides = [1, 1]} : vector<2x128xf32> to vector<2x32xf32>
    %478 = vector.extract_strided_slice %476 {offsets = [0, 32], sizes = [2, 32], strides = [1, 1]} : vector<2x128xf32> to vector<2x32xf32>
    %479 = vector.extract_strided_slice %476 {offsets = [0, 96], sizes = [2, 32], strides = [1, 1]} : vector<2x128xf32> to vector<2x32xf32>
    %480 = vector.extract_strided_slice %471 {offsets = [0, 64], sizes = [2, 32], strides = [1, 1]} : vector<2x128xf32> to vector<2x32xf32>
    %481 = math.tanh %480 : vector<2x32xf32>
    %482 = arith.mulf %478, %446 : vector<2x32xf32>
    %483 = arith.mulf %477, %481 : vector<2x32xf32>
    %484 = arith.addf %482, %483 : vector<2x32xf32>
    %485 = math.tanh %484 : vector<2x32xf32>
    %486 = arith.mulf %479, %485 : vector<2x32xf32>
    %c6_123 = arith.constant 6 : index
    %c0_124 = arith.constant 0 : index
    %487 = vector.load %arg26[%c6_123, %c0_124] : memref<16x32xf32, #tpu.memory_space<vmem>>, vector<2x32xf32>
    tpu.vector_store %arg26[%c6_123, %c0_124], %468 {strides = array<i32>} : memref<16x32xf32, #tpu.memory_space<vmem>>, vector<2x32xf32>,
    %c8_125 = arith.constant 8 : index
    %c0_126 = arith.constant 0 : index
    %488 = vector.load %arg27[%c8_125, %c0_126] : memref<16x32xf32, #tpu.memory_space<vmem>>, vector<2x32xf32>
    tpu.vector_store %arg27[%c8_125, %c0_126], %486 {strides = array<i32>} : memref<16x32xf32, #tpu.memory_space<vmem>>, vector<2x32xf32>,
    %489 = vector.extract_strided_slice %330 {offsets = [8, 0], sizes = [2, 128], strides = [1, 1]} : vector<16x256xf32> to vector<2x128xf32>
    %cst_127 = arith.constant dense<0.000000e+00> : vector<2x128xf32>
    %490 = tpu.matmul %468, %331, %cst_127 {dimension_numbers = #tpu.dot_dimension_numbers<[1], [0], [0], [1], [0, 0, 1, 1], [], []>} : vector<2x32xf32>, vector<32x128xf32>, vector<2x128xf32> -> vector<2x128xf32>
    %491 = arith.addf %489, %490 : vector<2x128xf32>
    %492 = arith.negf %491 : vector<2x128xf32>
    %493 = math.exp %492 : vector<2x128xf32>
    %cst_128 = arith.constant 1.000000e+00 : f32
    %494 = vector.broadcast %cst_128 : f32 to vector<2x128xf32>
    %495 = arith.addf %494, %493 : vector<2x128xf32>
    %496 = arith.divf %494, %495 : vector<2x128xf32>
    %497 = vector.extract_strided_slice %496 {offsets = [0, 0], sizes = [2, 32], strides = [1, 1]} : vector<2x128xf32> to vector<2x32xf32>
    %498 = vector.extract_strided_slice %496 {offsets = [0, 32], sizes = [2, 32], strides = [1, 1]} : vector<2x128xf32> to vector<2x32xf32>
    %499 = vector.extract_strided_slice %496 {offsets = [0, 96], sizes = [2, 32], strides = [1, 1]} : vector<2x128xf32> to vector<2x32xf32>
    %500 = vector.extract_strided_slice %491 {offsets = [0, 64], sizes = [2, 32], strides = [1, 1]} : vector<2x128xf32> to vector<2x32xf32>
    %501 = math.tanh %500 : vector<2x32xf32>
    %502 = arith.mulf %498, %466 : vector<2x32xf32>
    %503 = arith.mulf %497, %501 : vector<2x32xf32>
    %504 = arith.addf %502, %503 : vector<2x32xf32>
    %505 = math.tanh %504 : vector<2x32xf32>
    %506 = arith.mulf %499, %505 : vector<2x32xf32>
    %507 = vector.extract_strided_slice %330 {offsets = [6, 128], sizes = [2, 128], strides = [1, 1]} : vector<16x256xf32> to vector<2x128xf32>
    %cst_129 = arith.constant dense<0.000000e+00> : vector<2x128xf32>
    %508 = tpu.matmul %486, %332, %cst_129 {dimension_numbers = #tpu.dot_dimension_numbers<[1], [0], [0], [1], [0, 0, 1, 1], [], []>} : vector<2x32xf32>, vector<32x128xf32>, vector<2x128xf32> -> vector<2x128xf32>
    %509 = arith.addf %507, %508 : vector<2x128xf32>
    %510 = arith.negf %509 : vector<2x128xf32>
    %511 = math.exp %510 : vector<2x128xf32>
    %cst_130 = arith.constant 1.000000e+00 : f32
    %512 = vector.broadcast %cst_130 : f32 to vector<2x128xf32>
    %513 = arith.addf %512, %511 : vector<2x128xf32>
    %514 = arith.divf %512, %513 : vector<2x128xf32>
    %515 = vector.extract_strided_slice %514 {offsets = [0, 0], sizes = [2, 32], strides = [1, 1]} : vector<2x128xf32> to vector<2x32xf32>
    %516 = vector.extract_strided_slice %514 {offsets = [0, 32], sizes = [2, 32], strides = [1, 1]} : vector<2x128xf32> to vector<2x32xf32>
    %517 = vector.extract_strided_slice %514 {offsets = [0, 96], sizes = [2, 32], strides = [1, 1]} : vector<2x128xf32> to vector<2x32xf32>
    %518 = vector.extract_strided_slice %509 {offsets = [0, 64], sizes = [2, 32], strides = [1, 1]} : vector<2x128xf32> to vector<2x32xf32>
    %519 = math.tanh %518 : vector<2x32xf32>
    %520 = arith.mulf %516, %484 : vector<2x32xf32>
    %521 = arith.mulf %515, %519 : vector<2x32xf32>
    %522 = arith.addf %520, %521 : vector<2x32xf32>
    %523 = math.tanh %522 : vector<2x32xf32>
    %524 = arith.mulf %517, %523 : vector<2x32xf32>
    %c8_131 = arith.constant 8 : index
    %c0_132 = arith.constant 0 : index
    %525 = vector.load %arg26[%c8_131, %c0_132] : memref<16x32xf32, #tpu.memory_space<vmem>>, vector<2x32xf32>
    tpu.vector_store %arg26[%c8_131, %c0_132], %506 {strides = array<i32>} : memref<16x32xf32, #tpu.memory_space<vmem>>, vector<2x32xf32>,
    %c6_133 = arith.constant 6 : index
    %c0_134 = arith.constant 0 : index
    %526 = vector.load %arg27[%c6_133, %c0_134] : memref<16x32xf32, #tpu.memory_space<vmem>>, vector<2x32xf32>
    tpu.vector_store %arg27[%c6_133, %c0_134], %524 {strides = array<i32>} : memref<16x32xf32, #tpu.memory_space<vmem>>, vector<2x32xf32>,
    %527 = vector.extract_strided_slice %330 {offsets = [10, 0], sizes = [2, 128], strides = [1, 1]} : vector<16x256xf32> to vector<2x128xf32>
    %cst_135 = arith.constant dense<0.000000e+00> : vector<2x128xf32>
    %528 = tpu.matmul %506, %331, %cst_135 {dimension_numbers = #tpu.dot_dimension_numbers<[1], [0], [0], [1], [0, 0, 1, 1], [], []>} : vector<2x32xf32>, vector<32x128xf32>, vector<2x128xf32> -> vector<2x128xf32>
    %529 = arith.addf %527, %528 : vector<2x128xf32>
    %530 = arith.negf %529 : vector<2x128xf32>
    %531 = math.exp %530 : vector<2x128xf32>
    %cst_136 = arith.constant 1.000000e+00 : f32
    %532 = vector.broadcast %cst_136 : f32 to vector<2x128xf32>
    %533 = arith.addf %532, %531 : vector<2x128xf32>
    %534 = arith.divf %532, %533 : vector<2x128xf32>
    %535 = vector.extract_strided_slice %534 {offsets = [0, 0], sizes = [2, 32], strides = [1, 1]} : vector<2x128xf32> to vector<2x32xf32>
    %536 = vector.extract_strided_slice %534 {offsets = [0, 32], sizes = [2, 32], strides = [1, 1]} : vector<2x128xf32> to vector<2x32xf32>
    %537 = vector.extract_strided_slice %534 {offsets = [0, 96], sizes = [2, 32], strides = [1, 1]} : vector<2x128xf32> to vector<2x32xf32>
    %538 = vector.extract_strided_slice %529 {offsets = [0, 64], sizes = [2, 32], strides = [1, 1]} : vector<2x128xf32> to vector<2x32xf32>
    %539 = math.tanh %538 : vector<2x32xf32>
    %540 = arith.mulf %536, %504 : vector<2x32xf32>
    %541 = arith.mulf %535, %539 : vector<2x32xf32>
    %542 = arith.addf %540, %541 : vector<2x32xf32>
    %543 = math.tanh %542 : vector<2x32xf32>
    %544 = arith.mulf %537, %543 : vector<2x32xf32>
    %545 = vector.extract_strided_slice %330 {offsets = [4, 128], sizes = [2, 128], strides = [1, 1]} : vector<16x256xf32> to vector<2x128xf32>
    %cst_137 = arith.constant dense<0.000000e+00> : vector<2x128xf32>
    %546 = tpu.matmul %524, %332, %cst_137 {dimension_numbers = #tpu.dot_dimension_numbers<[1], [0], [0], [1], [0, 0, 1, 1], [], []>} : vector<2x32xf32>, vector<32x128xf32>, vector<2x128xf32> -> vector<2x128xf32>
    %547 = arith.addf %545, %546 : vector<2x128xf32>
    %548 = arith.negf %547 : vector<2x128xf32>
    %549 = math.exp %548 : vector<2x128xf32>
    %cst_138 = arith.constant 1.000000e+00 : f32
    %550 = vector.broadcast %cst_138 : f32 to vector<2x128xf32>
    %551 = arith.addf %550, %549 : vector<2x128xf32>
    %552 = arith.divf %550, %551 : vector<2x128xf32>
    %553 = vector.extract_strided_slice %552 {offsets = [0, 0], sizes = [2, 32], strides = [1, 1]} : vector<2x128xf32> to vector<2x32xf32>
    %554 = vector.extract_strided_slice %552 {offsets = [0, 32], sizes = [2, 32], strides = [1, 1]} : vector<2x128xf32> to vector<2x32xf32>
    %555 = vector.extract_strided_slice %552 {offsets = [0, 96], sizes = [2, 32], strides = [1, 1]} : vector<2x128xf32> to vector<2x32xf32>
    %556 = vector.extract_strided_slice %547 {offsets = [0, 64], sizes = [2, 32], strides = [1, 1]} : vector<2x128xf32> to vector<2x32xf32>
    %557 = math.tanh %556 : vector<2x32xf32>
    %558 = arith.mulf %554, %522 : vector<2x32xf32>
    %559 = arith.mulf %553, %557 : vector<2x32xf32>
    %560 = arith.addf %558, %559 : vector<2x32xf32>
    %561 = math.tanh %560 : vector<2x32xf32>
    %562 = arith.mulf %555, %561 : vector<2x32xf32>
    %c10_139 = arith.constant 10 : index
    %c0_140 = arith.constant 0 : index
    %563 = vector.load %arg26[%c10_139, %c0_140] : memref<16x32xf32, #tpu.memory_space<vmem>>, vector<2x32xf32>
    tpu.vector_store %arg26[%c10_139, %c0_140], %544 {strides = array<i32>} : memref<16x32xf32, #tpu.memory_space<vmem>>, vector<2x32xf32>,
    %c4_141 = arith.constant 4 : index
    %c0_142 = arith.constant 0 : index
    %564 = vector.load %arg27[%c4_141, %c0_142] : memref<16x32xf32, #tpu.memory_space<vmem>>, vector<2x32xf32>
    tpu.vector_store %arg27[%c4_141, %c0_142], %562 {strides = array<i32>} : memref<16x32xf32, #tpu.memory_space<vmem>>, vector<2x32xf32>,
    %565 = vector.extract_strided_slice %330 {offsets = [12, 0], sizes = [2, 128], strides = [1, 1]} : vector<16x256xf32> to vector<2x128xf32>
    %cst_143 = arith.constant dense<0.000000e+00> : vector<2x128xf32>
    %566 = tpu.matmul %544, %331, %cst_143 {dimension_numbers = #tpu.dot_dimension_numbers<[1], [0], [0], [1], [0, 0, 1, 1], [], []>} : vector<2x32xf32>, vector<32x128xf32>, vector<2x128xf32> -> vector<2x128xf32>
    %567 = arith.addf %565, %566 : vector<2x128xf32>
    %568 = arith.negf %567 : vector<2x128xf32>
    %569 = math.exp %568 : vector<2x128xf32>
    %cst_144 = arith.constant 1.000000e+00 : f32
    %570 = vector.broadcast %cst_144 : f32 to vector<2x128xf32>
    %571 = arith.addf %570, %569 : vector<2x128xf32>
    %572 = arith.divf %570, %571 : vector<2x128xf32>
    %573 = vector.extract_strided_slice %572 {offsets = [0, 0], sizes = [2, 32], strides = [1, 1]} : vector<2x128xf32> to vector<2x32xf32>
    %574 = vector.extract_strided_slice %572 {offsets = [0, 32], sizes = [2, 32], strides = [1, 1]} : vector<2x128xf32> to vector<2x32xf32>
    %575 = vector.extract_strided_slice %572 {offsets = [0, 96], sizes = [2, 32], strides = [1, 1]} : vector<2x128xf32> to vector<2x32xf32>
    %576 = vector.extract_strided_slice %567 {offsets = [0, 64], sizes = [2, 32], strides = [1, 1]} : vector<2x128xf32> to vector<2x32xf32>
    %577 = math.tanh %576 : vector<2x32xf32>
    %578 = arith.mulf %574, %542 : vector<2x32xf32>
    %579 = arith.mulf %573, %577 : vector<2x32xf32>
    %580 = arith.addf %578, %579 : vector<2x32xf32>
    %581 = math.tanh %580 : vector<2x32xf32>
    %582 = arith.mulf %575, %581 : vector<2x32xf32>
    %583 = vector.extract_strided_slice %330 {offsets = [2, 128], sizes = [2, 128], strides = [1, 1]} : vector<16x256xf32> to vector<2x128xf32>
    %cst_145 = arith.constant dense<0.000000e+00> : vector<2x128xf32>
    %584 = tpu.matmul %562, %332, %cst_145 {dimension_numbers = #tpu.dot_dimension_numbers<[1], [0], [0], [1], [0, 0, 1, 1], [], []>} : vector<2x32xf32>, vector<32x128xf32>, vector<2x128xf32> -> vector<2x128xf32>
    %585 = arith.addf %583, %584 : vector<2x128xf32>
    %586 = arith.negf %585 : vector<2x128xf32>
    %587 = math.exp %586 : vector<2x128xf32>
    %cst_146 = arith.constant 1.000000e+00 : f32
    %588 = vector.broadcast %cst_146 : f32 to vector<2x128xf32>
    %589 = arith.addf %588, %587 : vector<2x128xf32>
    %590 = arith.divf %588, %589 : vector<2x128xf32>
    %591 = vector.extract_strided_slice %590 {offsets = [0, 0], sizes = [2, 32], strides = [1, 1]} : vector<2x128xf32> to vector<2x32xf32>
    %592 = vector.extract_strided_slice %590 {offsets = [0, 32], sizes = [2, 32], strides = [1, 1]} : vector<2x128xf32> to vector<2x32xf32>
    %593 = vector.extract_strided_slice %590 {offsets = [0, 96], sizes = [2, 32], strides = [1, 1]} : vector<2x128xf32> to vector<2x32xf32>
    %594 = vector.extract_strided_slice %585 {offsets = [0, 64], sizes = [2, 32], strides = [1, 1]} : vector<2x128xf32> to vector<2x32xf32>
    %595 = math.tanh %594 : vector<2x32xf32>
    %596 = arith.mulf %592, %560 : vector<2x32xf32>
    %597 = arith.mulf %591, %595 : vector<2x32xf32>
    %598 = arith.addf %596, %597 : vector<2x32xf32>
    %599 = math.tanh %598 : vector<2x32xf32>
    %600 = arith.mulf %593, %599 : vector<2x32xf32>
    %c12_147 = arith.constant 12 : index
    %c0_148 = arith.constant 0 : index
    %601 = vector.load %arg26[%c12_147, %c0_148] : memref<16x32xf32, #tpu.memory_space<vmem>>, vector<2x32xf32>
    tpu.vector_store %arg26[%c12_147, %c0_148], %582 {strides = array<i32>} : memref<16x32xf32, #tpu.memory_space<vmem>>, vector<2x32xf32>,
    %c2_149 = arith.constant 2 : index
    %c0_150 = arith.constant 0 : index
    %602 = vector.load %arg27[%c2_149, %c0_150] : memref<16x32xf32, #tpu.memory_space<vmem>>, vector<2x32xf32>
    tpu.vector_store %arg27[%c2_149, %c0_150], %600 {strides = array<i32>} : memref<16x32xf32, #tpu.memory_space<vmem>>, vector<2x32xf32>,
    %603 = vector.extract_strided_slice %330 {offsets = [14, 0], sizes = [2, 128], strides = [1, 1]} : vector<16x256xf32> to vector<2x128xf32>
    %cst_151 = arith.constant dense<0.000000e+00> : vector<2x128xf32>
    %604 = tpu.matmul %582, %331, %cst_151 {dimension_numbers = #tpu.dot_dimension_numbers<[1], [0], [0], [1], [0, 0, 1, 1], [], []>} : vector<2x32xf32>, vector<32x128xf32>, vector<2x128xf32> -> vector<2x128xf32>
    %605 = arith.addf %603, %604 : vector<2x128xf32>
    %606 = arith.negf %605 : vector<2x128xf32>
    %607 = math.exp %606 : vector<2x128xf32>
    %cst_152 = arith.constant 1.000000e+00 : f32
    %608 = vector.broadcast %cst_152 : f32 to vector<2x128xf32>
    %609 = arith.addf %608, %607 : vector<2x128xf32>
    %610 = arith.divf %608, %609 : vector<2x128xf32>
    %611 = vector.extract_strided_slice %610 {offsets = [0, 0], sizes = [2, 32], strides = [1, 1]} : vector<2x128xf32> to vector<2x32xf32>
    %612 = vector.extract_strided_slice %610 {offsets = [0, 32], sizes = [2, 32], strides = [1, 1]} : vector<2x128xf32> to vector<2x32xf32>
    %613 = vector.extract_strided_slice %610 {offsets = [0, 96], sizes = [2, 32], strides = [1, 1]} : vector<2x128xf32> to vector<2x32xf32>
    %614 = vector.extract_strided_slice %605 {offsets = [0, 64], sizes = [2, 32], strides = [1, 1]} : vector<2x128xf32> to vector<2x32xf32>
    %615 = math.tanh %614 : vector<2x32xf32>
    %616 = arith.mulf %612, %580 : vector<2x32xf32>
    %617 = arith.mulf %611, %615 : vector<2x32xf32>
    %618 = arith.addf %616, %617 : vector<2x32xf32>
    %619 = math.tanh %618 : vector<2x32xf32>
    %620 = arith.mulf %613, %619 : vector<2x32xf32>
    %621 = vector.extract_strided_slice %330 {offsets = [0, 128], sizes = [2, 128], strides = [1, 1]} : vector<16x256xf32> to vector<2x128xf32>
    %cst_153 = arith.constant dense<0.000000e+00> : vector<2x128xf32>
    %622 = tpu.matmul %600, %332, %cst_153 {dimension_numbers = #tpu.dot_dimension_numbers<[1], [0], [0], [1], [0, 0, 1, 1], [], []>} : vector<2x32xf32>, vector<32x128xf32>, vector<2x128xf32> -> vector<2x128xf32>
    %623 = arith.addf %621, %622 : vector<2x128xf32>
    %624 = arith.negf %623 : vector<2x128xf32>
    %625 = math.exp %624 : vector<2x128xf32>
    %cst_154 = arith.constant 1.000000e+00 : f32
    %626 = vector.broadcast %cst_154 : f32 to vector<2x128xf32>
    %627 = arith.addf %626, %625 : vector<2x128xf32>
    %628 = arith.divf %626, %627 : vector<2x128xf32>
    %629 = vector.extract_strided_slice %628 {offsets = [0, 0], sizes = [2, 32], strides = [1, 1]} : vector<2x128xf32> to vector<2x32xf32>
    %630 = vector.extract_strided_slice %628 {offsets = [0, 32], sizes = [2, 32], strides = [1, 1]} : vector<2x128xf32> to vector<2x32xf32>
    %631 = vector.extract_strided_slice %628 {offsets = [0, 96], sizes = [2, 32], strides = [1, 1]} : vector<2x128xf32> to vector<2x32xf32>
    %632 = vector.extract_strided_slice %623 {offsets = [0, 64], sizes = [2, 32], strides = [1, 1]} : vector<2x128xf32> to vector<2x32xf32>
    %633 = math.tanh %632 : vector<2x32xf32>
    %634 = arith.mulf %630, %598 : vector<2x32xf32>
    %635 = arith.mulf %629, %633 : vector<2x32xf32>
    %636 = arith.addf %634, %635 : vector<2x32xf32>
    %637 = math.tanh %636 : vector<2x32xf32>
    %638 = arith.mulf %631, %637 : vector<2x32xf32>
    %c14_155 = arith.constant 14 : index
    %c0_156 = arith.constant 0 : index
    %639 = vector.load %arg26[%c14_155, %c0_156] : memref<16x32xf32, #tpu.memory_space<vmem>>, vector<2x32xf32>
    tpu.vector_store %arg26[%c14_155, %c0_156], %620 {strides = array<i32>} : memref<16x32xf32, #tpu.memory_space<vmem>>, vector<2x32xf32>,
    %c0_157 = arith.constant 0 : index
    %c0_158 = arith.constant 0 : index
    %640 = vector.load %arg27[%c0_157, %c0_158] : memref<16x32xf32, #tpu.memory_space<vmem>>, vector<2x32xf32>
    tpu.vector_store %arg27[%c0_157, %c0_158], %638 {strides = array<i32>} : memref<16x32xf32, #tpu.memory_space<vmem>>, vector<2x32xf32>,
    %c0_159 = arith.constant 0 : index
    %c0_160 = arith.constant 0 : index
    %641 = vector.load %arg26[%c0_159, %c0_160] : memref<16x32xf32, #tpu.memory_space<vmem>>, vector<16x32xf32>
    %c0_161 = arith.constant 0 : index
    %c0_162 = arith.constant 0 : index
    %642 = vector.load %arg12[%c0_161, %c0_162] : memref<32x16xf32, #tpu.memory_space<vmem>>, vector<32x16xf32>
    %cst_163 = arith.constant dense<0.000000e+00> : vector<16x16xf32>
    %643 = tpu.matmul %641, %642, %cst_163 {dimension_numbers = #tpu.dot_dimension_numbers<[1], [0], [0], [1], [0, 0, 1, 1], [], []>} : vector<16x32xf32>, vector<32x16xf32>, vector<16x16xf32> -> vector<16x16xf32>
    %c0_164 = arith.constant 0 : index
    %c0_165 = arith.constant 0 : index
    %644 = vector.load %arg27[%c0_164, %c0_165] : memref<16x32xf32, #tpu.memory_space<vmem>>, vector<16x32xf32>
    %c0_166 = arith.constant 0 : index
    %c0_167 = arith.constant 0 : index
    %645 = vector.load %arg13[%c0_166, %c0_167] : memref<32x16xf32, #tpu.memory_space<vmem>>, vector<32x16xf32>
    %cst_168 = arith.constant dense<0.000000e+00> : vector<16x16xf32>
    %646 = tpu.matmul %644, %645, %cst_168 {dimension_numbers = #tpu.dot_dimension_numbers<[1], [0], [0], [1], [0, 0, 1, 1], [], []>} : vector<16x32xf32>, vector<32x16xf32>, vector<16x16xf32> -> vector<16x16xf32>
    %647 = arith.addf %643, %646 : vector<16x16xf32>
    %c0_169 = arith.constant 0 : index
    %c0_170 = arith.constant 0 : index
    %648 = vector.load %arg14[%c0_169, %c0_170] : memref<1x16xf32, #tpu.memory_space<vmem>>, vector<1x16xf32>
    %649 = vector.broadcast %648 : vector<1x16xf32> to vector<16x16xf32>
    %650 = arith.addf %647, %649 : vector<16x16xf32>
    %651 = vector.extract_strided_slice %650 {offsets = [0, 0], sizes = [2, 16], strides = [1, 1]} : vector<16x16xf32> to vector<2x16xf32>
    %c0_171 = arith.constant 0 : index
    %c0_172 = arith.constant 0 : index
    %652 = vector.load %arg28[%c0_171, %c0_172] : memref<4x64xf32, #tpu.memory_space<vmem>>, vector<2x16xf32>
    tpu.vector_store %arg28[%c0_171, %c0_172], %651 {strides = array<i32>} : memref<4x64xf32, #tpu.memory_space<vmem>>, vector<2x16xf32>,
    %653 = vector.extract_strided_slice %650 {offsets = [2, 0], sizes = [2, 16], strides = [1, 1]} : vector<16x16xf32> to vector<2x16xf32>
    %c0_173 = arith.constant 0 : index
    %c16 = arith.constant 16 : index
    %654 = vector.load %arg28[%c0_173, %c16] : memref<4x64xf32, #tpu.memory_space<vmem>>, vector<2x16xf32>
    tpu.vector_store %arg28[%c0_173, %c16], %653 {strides = array<i32>} : memref<4x64xf32, #tpu.memory_space<vmem>>, vector<2x16xf32>,
    %655 = vector.extract_strided_slice %650 {offsets = [4, 0], sizes = [2, 16], strides = [1, 1]} : vector<16x16xf32> to vector<2x16xf32>
    %c0_174 = arith.constant 0 : index
    %c32 = arith.constant 32 : index
    %656 = vector.load %arg28[%c0_174, %c32] : memref<4x64xf32, #tpu.memory_space<vmem>>, vector<2x16xf32>
    tpu.vector_store %arg28[%c0_174, %c32], %655 {strides = array<i32>} : memref<4x64xf32, #tpu.memory_space<vmem>>, vector<2x16xf32>,
    %657 = vector.extract_strided_slice %650 {offsets = [6, 0], sizes = [2, 16], strides = [1, 1]} : vector<16x16xf32> to vector<2x16xf32>
    %c0_175 = arith.constant 0 : index
    %c48 = arith.constant 48 : index
    %658 = vector.load %arg28[%c0_175, %c48] : memref<4x64xf32, #tpu.memory_space<vmem>>, vector<2x16xf32>
    tpu.vector_store %arg28[%c0_175, %c48], %657 {strides = array<i32>} : memref<4x64xf32, #tpu.memory_space<vmem>>, vector<2x16xf32>,
    %659 = vector.extract_strided_slice %650 {offsets = [8, 0], sizes = [2, 16], strides = [1, 1]} : vector<16x16xf32> to vector<2x16xf32>
    %c2_176 = arith.constant 2 : index
    %c0_177 = arith.constant 0 : index
    %660 = vector.load %arg28[%c2_176, %c0_177] : memref<4x64xf32, #tpu.memory_space<vmem>>, vector<2x16xf32>
    tpu.vector_store %arg28[%c2_176, %c0_177], %659 {strides = array<i32>} : memref<4x64xf32, #tpu.memory_space<vmem>>, vector<2x16xf32>,
    %661 = vector.extract_strided_slice %650 {offsets = [10, 0], sizes = [2, 16], strides = [1, 1]} : vector<16x16xf32> to vector<2x16xf32>
    %c2_178 = arith.constant 2 : index
    %c16_179 = arith.constant 16 : index
    %662 = vector.load %arg28[%c2_178, %c16_179] : memref<4x64xf32, #tpu.memory_space<vmem>>, vector<2x16xf32>
    tpu.vector_store %arg28[%c2_178, %c16_179], %661 {strides = array<i32>} : memref<4x64xf32, #tpu.memory_space<vmem>>, vector<2x16xf32>,
    %663 = vector.extract_strided_slice %650 {offsets = [12, 0], sizes = [2, 16], strides = [1, 1]} : vector<16x16xf32> to vector<2x16xf32>
    %c2_180 = arith.constant 2 : index
    %c32_181 = arith.constant 32 : index
    %664 = vector.load %arg28[%c2_180, %c32_181] : memref<4x64xf32, #tpu.memory_space<vmem>>, vector<2x16xf32>
    tpu.vector_store %arg28[%c2_180, %c32_181], %663 {strides = array<i32>} : memref<4x64xf32, #tpu.memory_space<vmem>>, vector<2x16xf32>,
    %665 = vector.extract_strided_slice %650 {offsets = [14, 0], sizes = [2, 16], strides = [1, 1]} : vector<16x16xf32> to vector<2x16xf32>
    %c2_182 = arith.constant 2 : index
    %c48_183 = arith.constant 48 : index
    %666 = vector.load %arg28[%c2_182, %c48_183] : memref<4x64xf32, #tpu.memory_space<vmem>>, vector<2x16xf32>
    tpu.vector_store %arg28[%c2_182, %c48_183], %665 {strides = array<i32>} : memref<4x64xf32, #tpu.memory_space<vmem>>, vector<2x16xf32>,
    %c0_184 = arith.constant 0 : index
    %c0_185 = arith.constant 0 : index
    %667 = vector.load %arg28[%c0_184, %c0_185] : memref<4x64xf32, #tpu.memory_space<vmem>>, vector<4x64xf32>
    %c0_186 = arith.constant 0 : index
    %c0_187 = arith.constant 0 : index
    %668 = vector.load %arg15[%c0_186, %c0_187] : memref<64x32xf32, #tpu.memory_space<vmem>>, vector<64x32xf32>
    %cst_188 = arith.constant dense<0.000000e+00> : vector<4x32xf32>
    %669 = tpu.matmul %667, %668, %cst_188 {dimension_numbers = #tpu.dot_dimension_numbers<[1], [0], [0], [1], [0, 0, 1, 1], [], []>} : vector<4x64xf32>, vector<64x32xf32>, vector<4x32xf32> -> vector<4x32xf32>
    %c0_189 = arith.constant 0 : index
    %c0_190 = arith.constant 0 : index
    %670 = vector.load %arg16[%c0_189, %c0_190] : memref<1x32xf32, #tpu.memory_space<vmem>>, vector<1x32xf32>
    %671 = vector.broadcast %670 : vector<1x32xf32> to vector<4x32xf32>
    %672 = arith.addf %669, %671 : vector<4x32xf32>
    %c0_191 = arith.constant 0 : index
    %c0_192 = arith.constant 0 : index
    %673 = vector.load %arg17[%c0_191, %c0_192] : memref<32x16xf32, #tpu.memory_space<vmem>>, vector<32x16xf32>
    %cst_193 = arith.constant dense<0.000000e+00> : vector<4x16xf32>
    %674 = tpu.matmul %672, %673, %cst_193 {dimension_numbers = #tpu.dot_dimension_numbers<[1], [0], [0], [1], [0, 0, 1, 1], [], []>} : vector<4x32xf32>, vector<32x16xf32>, vector<4x16xf32> -> vector<4x16xf32>
    %c0_194 = arith.constant 0 : index
    %c0_195 = arith.constant 0 : index
    %675 = vector.load %arg18[%c0_194, %c0_195] : memref<1x16xf32, #tpu.memory_space<vmem>>, vector<1x16xf32>
    %676 = vector.broadcast %675 : vector<1x16xf32> to vector<4x16xf32>
    %677 = arith.addf %674, %676 : vector<4x16xf32>
    %cst_196 = arith.constant 5.000000e-01 : f32
    %678 = vector.broadcast %cst_196 : f32 to vector<4x16xf32>
    %679 = arith.mulf %678, %677 : vector<4x16xf32>
    %cst_197 = arith.constant 0.707106769 : f32
    %680 = vector.broadcast %cst_197 : f32 to vector<4x16xf32>
    %681 = arith.mulf %677, %680 : vector<4x16xf32>
    %cst_198 = arith.constant 0.000000e+00 : f32
    %682 = vector.broadcast %cst_198 : f32 to vector<4x16xf32>
    %683 = arith.cmpf oge, %681, %682 : vector<4x16xf32>
    %cst_199 = arith.constant 1.000000e+00 : f32
    %cst_200 = arith.constant -1.000000e+00 : f32
    %684 = vector.broadcast %cst_199 : f32 to vector<4x16xf32>
    %685 = vector.broadcast %cst_200 : f32 to vector<4x16xf32>
    %686 = arith.select %683, %684, %685 : vector<4x16xi1>, vector<4x16xf32>
    %687 = math.absf %681 : vector<4x16xf32>
    %cst_201 = arith.constant 0.327591091 : f32
    %688 = vector.broadcast %cst_201 : f32 to vector<4x16xf32>
    %689 = arith.mulf %688, %687 : vector<4x16xf32>
    %cst_202 = arith.constant 1.000000e+00 : f32
    %690 = vector.broadcast %cst_202 : f32 to vector<4x16xf32>
    %691 = arith.addf %690, %689 : vector<4x16xf32>
    %cst_203 = arith.constant 1.000000e+00 : f32
    %692 = vector.broadcast %cst_203 : f32 to vector<4x16xf32>
    %693 = arith.divf %692, %691 : vector<4x16xf32>
    %cst_204 = arith.constant 1.06140542 : f32
    %694 = vector.broadcast %cst_204 : f32 to vector<4x16xf32>
    %695 = arith.mulf %694, %693 : vector<4x16xf32>
    %cst_205 = arith.constant -1.45315206 : f32
    %696 = vector.broadcast %cst_205 : f32 to vector<4x16xf32>
    %697 = arith.addf %695, %696 : vector<4x16xf32>
    %698 = arith.mulf %697, %693 : vector<4x16xf32>
    %cst_206 = arith.constant 1.42141378 : f32
    %699 = vector.broadcast %cst_206 : f32 to vector<4x16xf32>
    %700 = arith.addf %698, %699 : vector<4x16xf32>
    %701 = arith.mulf %700, %693 : vector<4x16xf32>
    %cst_207 = arith.constant -0.284496725 : f32
    %702 = vector.broadcast %cst_207 : f32 to vector<4x16xf32>
    %703 = arith.addf %701, %702 : vector<4x16xf32>
    %704 = arith.mulf %703, %693 : vector<4x16xf32>
    %cst_208 = arith.constant 0.254829586 : f32
    %705 = vector.broadcast %cst_208 : f32 to vector<4x16xf32>
    %706 = arith.addf %704, %705 : vector<4x16xf32>
    %707 = arith.mulf %706, %693 : vector<4x16xf32>
    %cst_209 = arith.constant 0.000000e+00 : f32
    %708 = vector.broadcast %cst_209 : f32 to vector<4x16xf32>
    %709 = arith.subf %708, %687 : vector<4x16xf32>
    %710 = arith.mulf %709, %687 : vector<4x16xf32>
    %711 = math.exp %710 : vector<4x16xf32>
    %712 = arith.mulf %707, %711 : vector<4x16xf32>
    %cst_210 = arith.constant 1.000000e+00 : f32
    %713 = vector.broadcast %cst_210 : f32 to vector<4x16xf32>
    %714 = arith.subf %713, %712 : vector<4x16xf32>
    %715 = arith.mulf %686, %714 : vector<4x16xf32>
    %cst_211 = arith.constant 1.000000e+00 : f32
    %716 = vector.broadcast %cst_211 : f32 to vector<4x16xf32>
    %717 = arith.addf %716, %715 : vector<4x16xf32>
    %718 = arith.mulf %679, %717 : vector<4x16xf32>
    %c0_212 = arith.constant 0 : index
    %c0_213 = arith.constant 0 : index
    %719 = vector.load %arg19[%c0_212, %c0_213] : memref<16x8xf32, #tpu.memory_space<vmem>>, vector<16x8xf32>
    %cst_214 = arith.constant dense<0.000000e+00> : vector<4x8xf32>
    %720 = tpu.matmul %718, %719, %cst_214 {dimension_numbers = #tpu.dot_dimension_numbers<[1], [0], [0], [1], [0, 0, 1, 1], [], []>} : vector<4x16xf32>, vector<16x8xf32>, vector<4x8xf32> -> vector<4x8xf32>
    %c0_215 = arith.constant 0 : index
    %c0_216 = arith.constant 0 : index
    %721 = vector.load %arg20[%c0_215, %c0_216] : memref<1x8xf32, #tpu.memory_space<vmem>>, vector<1x8xf32>
    %722 = vector.broadcast %721 : vector<1x8xf32> to vector<4x8xf32>
    %723 = arith.addf %720, %722 : vector<4x8xf32>
    %c0_217 = arith.constant 0 : index
    %c0_218 = arith.constant 0 : index
    %724 = vector.load %arg21[%c0_217, %c0_218] : memref<8x1xf32, #tpu.memory_space<vmem>>, vector<8x1xf32>
    %cst_219 = arith.constant dense<0.000000e+00> : vector<4x1xf32>
    %725 = tpu.matmul %723, %724, %cst_219 {dimension_numbers = #tpu.dot_dimension_numbers<[1], [0], [0], [1], [0, 0, 1, 1], [], []>} : vector<4x8xf32>, vector<8x1xf32>, vector<4x1xf32> -> vector<4x1xf32>
    %c0_220 = arith.constant 0 : index
    %c0_221 = arith.constant 0 : index
    %726 = vector.load %arg22[%c0_220, %c0_221] : memref<1x1xf32, #tpu.memory_space<vmem>>, vector<1x1xf32>
    %727 = vector.broadcast %726 : vector<1x1xf32> to vector<4x1xf32>
    %728 = arith.addf %725, %727 : vector<4x1xf32>
    %c0_222 = arith.constant 0 : index
    %c0_223 = arith.constant 0 : index
    %729 = vector.load %arg23[%c0_222, %c0_223] : memref<4x1xf32, #tpu.memory_space<vmem>>, vector<4x1xf32>
    tpu.vector_store %arg23[%c0_222, %c0_223], %728 {strides = array<i32>} : memref<4x1xf32, #tpu.memory_space<vmem>>, vector<4x1xf32>,
    return
  }
}

</mosaic_0001>

<bundles_post_ra>
// kernel: _lambda_.1
= control target key start
LH: loop header
LB: loop body
LE: loop exit
PB: predicated region body
PF: predicated region fallthrough
CT: control target
= control target key end

     0   :  { %s7024_s0 = inlined_call_operand.vmem [shape: f32[16,16], index: 0, kind: input, shape index: {}]   ;;  %s7025_s1 = inlined_call_operand.vmem [shape: f32[16,256], index: 1, kind: input, shape index: {}]   ;;  %s7026_s2 = inlined_call_operand.vmem [shape: f32[1,256], index: 2, kind: input, shape index: {}]   ;;  %s7027_s3 = inlined_call_operand.vmem [shape: f32[32,128], index: 3, kind: input, shape index: {}]   ;;  %s7028_s4 = inlined_call_operand.vmem [shape: f32[32,128], index: 4, kind: input, shape index: {}]   ;;  %s7029_s5 = inlined_call_operand.vmem [shape: f32[32,32], index: 5, kind: input, shape index: {}]   ;;  %s7030_s6 = inlined_call_operand.vmem [shape: f32[32,32], index: 6, kind: input, shape index: {}]   ;;  %s7031_s7 = inlined_call_operand.hbm [shape: f32[1,32], index: 7, kind: input, shape index: {}]   ;;  %s7032_s8 = inlined_call_operand.vmem [shape: f32[32,256], index: 8, kind: input, shape index: {}]   ;;  %s7033_s9 = inlined_call_operand.vmem [shape: f32[1,256], index: 9, kind: input, shape index: {}]   ;;  %s7034_s10 = inlined_call_operand.vmem [shape: f32[32,128], index: 10, kind: input, shape index: {}]   ;;  %s7035_s11 = inlined_call_operand.vmem [shape: f32[32,128], index: 11, kind: input, shape index: {}]   ;;  %s7036_s12 = inlined_call_operand.vmem [shape: f32[32,16], index: 12, kind: input, shape index: {}]   ;;  %s7037_s13 = inlined_call_operand.vmem [shape: f32[32,16], index: 13, kind: input, shape index: {}]   ;;  %s7038_s14 = inlined_call_operand.vmem [shape: f32[1,16], index: 14, kind: input, shape index: {}]   ;;  %s7039_s15 = inlined_call_operand.vmem [shape: f32[64,32], index: 15, kind: input, shape index: {}]   ;;  %s7040_s16 = inlined_call_operand.hbm [shape: f32[1,32], index: 16, kind: input, shape index: {}]   ;;  %s7041_s17 = inlined_call_operand.vmem [shape: f32[32,16], index: 17, kind: input, shape index: {}]   ;;  %s7042_s18 = inlined_call_operand.hbm [shape: f32[1,16], index: 18, kind: input, shape index: {}]   ;;  %s7043_s19 = inlined_call_operand.vmem [shape: f32[16,8], index: 19, kind: input, shape index: {}]   ;;  %s7044_s20 = inlined_call_operand.hbm [shape: f32[1,8], index: 20, kind: input, shape index: {}]   ;;  %s7045_s21 = inlined_call_operand.vmem [shape: f32[8,1], index: 21, kind: input, shape index: {}]   ;;  %s7046_s22 = inlined_call_operand.<no memory space> [shape: f32[1,1], index: 22, kind: input, shape index: {}]   ;;  %s7047_s23 = inlined_call_operand.vmem [shape: f32[4,1], index: 23, kind: output, shape index: {}]  }
   0x1   :  { %7055 = sst [smem:[#allocation18_spill]] %s7024_s0  ;;  %v28_v0 = vstv %s7046_s22 }
   0x2   :  { %7056 = sst [smem:[#allocation19_spill]] %s7025_s1  ;;  %29 = vst [vmem:[#allocation7] sm:$0x1] %v28_v0 }
   0x3   :  { %7057 = sst [smem:[#allocation20_spill]] %s7026_s2 }
   0x4   :  { %7058 = sst [smem:[#allocation21_spill]] %s7027_s3 }
   0x5   :  { %7059 = sst [smem:[#allocation22_spill]] %s7028_s4 }
   0x6   :  { %7060 = sst [smem:[#allocation23_spill]] %s7029_s5 }
   0x7   :  { %7061 = sst [smem:[#allocation24_spill]] %s7030_s6 }
   0x8   :  { %7062 = sst [smem:[#allocation25_spill]] %s7031_s7 }
   0x9   :  { %30 = vsyncpa [#allocation9], 0 }
   0xa   :  { %31 = vsyncpa [#allocation11], 0 }
   0xb   :  { %32 = vsyncpa [#allocation14], 0  ;;  %s5952_s24 = smov [#allocation10]   ;;  %s5953_s5 = smov [#allocation8]  }
   0xc   :  { %s79_s25 = sshll.u32 %s5952_s24, 4  ;;  %s53_s1 = sshll.u32 %s5953_s5, 4  ;;  %s80_s25 = int_to_ptr.vmem [resolvable:$true] %s79_s25  ;;  %s54_s1 = int_to_ptr.vmem [resolvable:$true] %s53_s1 }
   0xd   :  { %s5858_s6 = scalar_lea.hbm %s7040_s16, 16 }
   0xe   :  { %p5859_p0 = scmp.ne.s32.totalorder %s7040_s16, %s5858_s6  ;;  %p5862_p1 = scmp.lt.u32.totalorder %s5858_s6, %s7040_s16 }
  0x10   :  { %p5864_p2 = pnand %p5862_p1, %p5859_p0 }
  0x12   :  { %5867 = shalt.err (!%p5864_p2)
}
  0x13   :  { %s5868_s29 = scalar_lea.vmem %s80_s25, 16  ;;  %s5872_s3 = scalar_lea.vmem %s80_s25, 32 }
  0x14   :  { %p5869_p3 = scmp.ne.s32.totalorder %s80_s25, %s5868_s29  ;;  %p5873_p4 = scmp.lt.s32.totalorder %s80_s25, %s80_s25 }
  0x15   :  { %p5874_p5 = scmp.lt.s32.totalorder %s5872_s3, %s5868_s29 }
  0x17   :  { %p5875_p6 = por %p5874_p5, %p5873_p4 }
  0x19   :  { %p5876_p7 = pnand %p5875_p6, %p5869_p3 }
  0x1b   :  { %5879 = shalt.err (!%p5876_p7)
}
  0x1c   :  { %82 = dma.hbm_to_vmem [thread:$0]  %s7040_s16, 16, %s80_s25, [#allocation11]  }
  0x1d   :  { %s7063_s5 = sld [smem:[#allocation25_spill]] }
  0x23   :  { %s5880_s26 = scalar_lea.hbm %s7063_s5, 16 }
  0x24   :  { %p5881_p8 = scmp.ne.s32.totalorder %s7063_s5, %s5880_s26  ;;  %p5884_p9 = scmp.lt.u32.totalorder %s5880_s26, %s7063_s5 }
  0x26   :  { %p5886_p10 = pnand %p5884_p9, %p5881_p8 }
  0x28   :  { %5889 = shalt.err (!%p5886_p10)
}
  0x29   :  { %s5890_s28 = scalar_lea.vmem %s54_s1, 16  ;;  %s5894_s22 = scalar_lea.vmem %s54_s1, 32 }
  0x2a   :  { %p5891_p11 = scmp.ne.s32.totalorder %s54_s1, %s5890_s28  ;;  %p5895_p12 = scmp.lt.s32.totalorder %s54_s1, %s54_s1 }
  0x2b   :  { %p5896_p13 = scmp.lt.s32.totalorder %s5894_s22, %s5890_s28 }
  0x2d   :  { %p5897_p0 = por %p5896_p13, %p5895_p12 }
  0x2f   :  { %p5898_p1 = pnand %p5897_p0, %p5891_p11 }
  0x31   :  { %5901 = shalt.err (!%p5898_p1)
}
  0x32   :  { %56 = dma.hbm_to_vmem [thread:$0]  %s7063_s5, 16, %s54_s1, [#allocation9]  }
  0x33   :  { %s5954_s29 = smov [#allocation12]   ;;  %s5955_s0 = smov [#allocation13]  }
  0x34   :  { %s91_s3 = sshll.u32 %s5954_s29, 4  ;;  %s103_s4 = sshll.u32 %s5955_s0, 4  ;;  %s92_s3 = int_to_ptr.vmem [resolvable:$true] %s91_s3  ;;  %s104_s4 = int_to_ptr.vmem [resolvable:$true] %s103_s4 }
  0x35   :  { %s5902_s26 = scalar_lea.hbm %s7042_s18, 16 }
  0x36   :  { %p5903_p2 = scmp.ne.s32.totalorder %s7042_s18, %s5902_s26  ;;  %p5906_p3 = scmp.lt.u32.totalorder %s5902_s26, %s7042_s18 }
  0x38   :  { %p5908_p4 = pnand %p5906_p3, %p5903_p2 }
  0x3a   :  { %5911 = shalt.err (!%p5908_p4)
}
  0x3b   :  { %s5912_s1 = scalar_lea.vmem %s92_s3, 16  ;;  %s5916_s5 = scalar_lea.vmem %s92_s3, 32 }
  0x3c   :  { %p5913_p5 = scmp.ne.s32.totalorder %s92_s3, %s5912_s1  ;;  %p5917_p6 = scmp.lt.s32.totalorder %s92_s3, %s92_s3 }
  0x3d   :  { %p5918_p7 = scmp.lt.s32.totalorder %s5916_s5, %s5912_s1 }
  0x3f   :  { %p5919_p8 = por %p5918_p7, %p5917_p6 }
  0x41   :  { %p5920_p9 = pnand %p5919_p8, %p5913_p5 }
  0x43   :  { %5923 = shalt.err (!%p5920_p9)
}
  0x44   :  { %94 = dma.hbm_to_vmem [thread:$0]  %s7042_s18, 16, %s92_s3, [#allocation11]  }
  0x45   :  { %s5924_s29 = scalar_lea.hbm %s7044_s20, 16 }
  0x46   :  { %p5925_p10 = scmp.ne.s32.totalorder %s7044_s20, %s5924_s29  ;;  %p5928_p11 = scmp.lt.u32.totalorder %s5924_s29, %s7044_s20 }
  0x48   :  { %p5930_p12 = pnand %p5928_p11, %p5925_p10 }
  0x4a   :  { %5933 = shalt.err (!%p5930_p12)
}
  0x4b   :  { %s5934_s2 = scalar_lea.vmem %s104_s4, 16  ;;  %s5938_s6 = scalar_lea.vmem %s104_s4, 32 }
  0x4c   :  { %p5935_p13 = scmp.ne.s32.totalorder %s104_s4, %s5934_s2  ;;  %p5939_p0 = scmp.lt.s32.totalorder %s104_s4, %s104_s4 }
  0x4d   :  { %p5940_p1 = scmp.lt.s32.totalorder %s5938_s6, %s5934_s2 }
  0x4f   :  { %p5941_p2 = por %p5940_p1, %p5939_p0 }
  0x51   :  { %p5942_p3 = pnand %p5941_p2, %p5935_p13 }
  0x53   :  { %5945 = shalt.err (!%p5942_p3)
}
  0x54   :  { %106 = dma.hbm_to_vmem [thread:$0]  %s7044_s20, 16, %s104_s4, [#allocation14]  }
  0x55   :  { %5946 = dma.done.wait [#allocation9], 16  }
  0x56   :  { %5947 = vsyncadd [#allocation9], 4294967280 }
  0x57   :  { %5948 = dma.done.wait [#allocation11], 32  }
  0x58   :  { %5949 = vsyncadd [#allocation11], 4294967264 }
  0x59   :  { %5950 = dma.done.wait [#allocation14], 16  }
  0x5a   :  { %5951 = vsyncadd [#allocation14], 4294967280  ;;  %v5956_v1 = vmov 0.0|0.0   ;;  %v5957_v2 = vmov 0.0   ;;  %vm5958_vm0 = vmmov 0   ;;  %s7064_s1 = sld [smem:[#allocation19_spill]]  ;;  %v131_v23 = vlaneseq }
  0x5b   :  { %5329 = vmatprep.subr.bf16.mxu1 %v5956_v1  ;;  %212 = vmatprep.mubr.f32.mxu0 %v5957_v2  ;;  %s7065_s22 = sld [smem:[#allocation21_spill]]  ;;  %s7066_s7 = sld [smem:[#allocation22_spill]]  ;;  %vm141_vm1 = vcmask 130048   ;;  %vm233_vm2 = vcmask 261120   ;;  %vm434_vm3 = vcmask 254976   ;;  %vm440_vm4 = vcmask 261126  }
  0x5c   :  { %4895 = vmatprep.mubr.msk.f32.mxu1 %vm5958_vm0, %v5957_v2  ;;  %s7067_s28 = sld [smem:[#allocation18_spill]]  ;;  %v6217_v24 = vshrl.u32 %v131_v23, 7  ;;  %s7068_s2 = sld [smem:[#allocation20_spill]]  ;;  %vm655_vm5 = vcmask 257026   ;;  %vm661_vm6 = vcmask 259076   ;;  %vm4196_vm7 = vcmask 123904  }
  0x5d   :  { %s5959_s6 = smov 64   ;;  %s5960_s18 = smov 32   ;;  %vm4202_vm8 = vcmask 257154   ;;  %vm4207_vm9 = vcmask 390404   ;;  %vm4212_vm10 = vcmask 523654   ;;  %vm4244_vm11 = vcmask 523264  }
  0x5e   :  { %v137_v25 = vsub.s32 1, %v6217_v24  ;;  %v133_v28 = vsub.s32 0, %v6217_v24  ;;  %s7070_s29 = sld [smem:[#allocation23_spill]]  ;;  %vm4519_vm13 = vcmask 64512   ;;  %vm4593_vm14 = vcmask 3072  }
  0x60   :  { %v126_v3 = vld [vmem:[%s7064_s1 + $0x8] sm:$0xff]  ;;  %v128_v4 = vld [vmem:[%s7064_s1 + $0x18] sm:$0xff]  ;;  %v125_v8 = vld [vmem:[%s7064_s1] sm:$0xff] }
  0x61   :  { %v225_v5 = vld [vmem:[%s7065_s22] sm:$0xff]  ;;  %v5325_v6 = vpack.c.bf16 %v128_v4, %v126_v3  ;;  %v226_v7 = vld [vmem:[%s7065_s22 + $0x8] sm:$0xff]  ;;  %v127_v9 = vld [vmem:[%s7064_s1 + $0x10] sm:$0xff] }
  0x62   :  { %v6157_v10 = vpack.c.bf16 %v226_v7, %v225_v5  ;;  %v5327_v11 = vpack.c.bf16 %v127_v9, %v125_v8  ;;  %v227_v12 = vld [vmem:[%s7065_s22 + $0x10] sm:$0xff]  ;;  %v228_v13 = vld [vmem:[%s7065_s22 + $0x18] sm:$0xff]  ;;  %v229_v14 = vld [vmem:[%s7066_s7] sm:$0xff] }
  0x63   :  { %5326 = vmatprep.subr.bf16.mxu0 %v5325_v6  ;;  %v230_v15 = vld [vmem:[%s7066_s7 + $0x8] sm:$0xff]  ;;  %v123_v16 = vld [vmem:[%s7067_s28] sm:$0xff]  ;;  %v6175_v17 = vpack.c.bf16 %v228_v13, %v227_v12  ;;  %v231_v19 = vld [vmem:[%s7066_s7 + $0x10] sm:$0xff] }
  0x64   :  { %5331 = vmatpush3.bf16.msra.mxu1 %v6157_v10  ;;  %5328 = vmatpush1.bf16.msra.mxu0 %v5327_v11  ;;  %v6177_v18 = vpack.c.bf16 %v230_v15, %v229_v14  ;;  %v232_v20 = vld [vmem:[%s7066_s7 + $0x18] sm:$0xff]  ;;  %v124_v21 = vld [vmem:[%s7067_s28 + $0x8] sm:$0xff]  ;;  %v129_v26 = vld [vmem:[%s7068_s2] sm:$0x3]  ;;  %s7069_s7 = sld [smem:[#allocation24_spill]] }
  0x65   :  { %5332 = vmatprep.subr.bf16.mxu1 %v5956_v1  ;;  %5335 = vmatprep.subr.bf16.mxu0 %v5956_v1  ;;  %v6193_v22 = vpack.c.bf16 %v232_v20, %v231_v19  ;;  %v138_v27 = vrot.slane %v129_v26, %v137_v25  ;;  %v134_v32 = vrot.slane %v129_v26, %v133_v28 }
  0x67   :  { %4602 = vmatmul.mubr.msk.f32.vlgmr.msra.gmra.mrb[0].mxu0 %vm141_vm1, %v123_v16 }
  0x68   :  { %5334 = vmatpush3.bf16.msra.mxu1 %v6175_v17  ;;  %5337 = vmatpush3.bf16.msra.mxu0 %v6177_v18 }
  0x69   :  { %218 = vmatprep.mubr.f32.mxu0 %v5957_v2  ;;  %5338 = vmatprep.subr.bf16.mxu0 %v5956_v1 }
  0x6a   :  { %5341 = vmatprep.subr.bf16.mxu1 %v5956_v1 }
  0x6b   :  { %4896 = vmatmul.mubr.f32.vlgmr.msra.gmra.mrb[0].mxu1 %v5957_v2  ;;  %4603 = vmatmul.mubr.msk.f32.gmra.mrb[2].mxu0 %vm141_vm1, %v124_v21 }
  0x6c   :  { %5340 = vmatpush3.bf16.msra.mxu0 %v6193_v22  ;;  %4906 = vmatprep.mubr.msk.f32.mxu0 %vm5958_vm0, %v5957_v2 }
  0x6d   :  { %5347 = vmatprep.subr.bf16.mxu0 %v5956_v1  ;;  %5343 = vmatpush3.bf16.msra.mxu1 %v6157_v10 }
  0x6e   :  { %5344 = vmatprep.subr.bf16.mxu1 %v5956_v1  ;;  %4917 = vmatprep.mubr.msk.f32.mxu1 %vm5958_vm0, %v5957_v2 }
  0x6f   :  { %4907 = vmatmul.mubr.f32.vlgmr.msra.gmra.mrb[4].mxu0 %v5957_v2 }
  0x70   :  { %5349 = vmatpush3.bf16.msra.mxu0 %v6177_v18  ;;  %4928 = vmatprep.mubr.msk.f32.mxu0 %vm5958_vm0, %v5957_v2 }
  0x71   :  { %5350 = vmatprep.subr.bf16.mxu0 %v5956_v1  ;;  %5346 = vmatpush3.bf16.msra.mxu1 %v6175_v17 }
  0x72   :  { %5353 = vmatprep.subr.bf16.mxu1 %v5956_v1 }
  0x74   :  { %5352 = vmatpush3.bf16.msra.mxu0 %v6193_v22 }
  0x75   :  { %5359 = vmatprep.subr.bf16.mxu0 %v5956_v1 }
 0x13a   :  { %v214_v29 = vpop.f32.mrb[0].mxu0 }
 0x13b   :  { %v216_v30 = vpop.f32.mrb[1].mxu0  ;;  %v6232_v39 = vadd.f32 %v214_v29, %v134_v32 }
 0x13c   :  { %v6226_v31 = vadd.f32 %v216_v30, %v138_v27 }
 0x13e   :  { %v303_v33 = vpop.f32.mrb[0].mxu1  ;;  %v220_v34 = vpop.f32.mrb[2].mxu0 }
 0x13f   :  { %v6230_v35 = vadd.f32 %v220_v34, %v134_v32  ;;  %v222_v36 = vpop.f32.mrb[3].mxu0  ;;  %v4897_v37 = vpop.f32.mrb[1].mxu1  ;;  %v307_v44 = vadd.f32 %v303_v33, %v6232_v39 }
 0x140   :  { %v6234_v40 = vadd.f32 %v222_v36, %v138_v27 }
 0x141   :  { %v4604_v48 = vmul.f32 -1.442695, %v307_v44 }
 0x142   :  { %v398_v38 = vpop.f32.mrb[4].mxu0 }
 0x143   :  { %v403_v41 = vrot.slane %v398_v38, 2  ;;  %v4908_v42 = vpop.f32.mrb[5].mxu0 }
 0x145   :  { %v405_v43 = vadd.f32 %v403_v41, %v6234_v40 }
 0x147   :  { %5598 = vtanh.f32 %v405_v43  ;;  %v4605_v47 = vmul.f32 -1.442695, %v405_v43 }
 0x148   :  { %5600 = vtanh.f32 %v307_v44 }
 0x149   :  { %5602 = vpow2.f32 %v4605_v47 }
 0x14a   :  { %5604 = vpow2.f32 %v4604_v48 }
 0x151   :  { %v5599_v45 = vpop.eup %5598 }
 0x152   :  { %415 = vrot.lane.b32.xlu0 %v5599_v45, %s5959_s6  ;;  %v5601_v46 = vpop.eup %5600 }
 0x153   :  { %v5603_v49 = vpop.eup %5602 }
 0x154   :  { %v409_v50 = vadd.f32 1.0, %v5603_v49  ;;  %v5605_v51 = vpop.eup %5604 }
 0x155   :  { %v311_v52 = vadd.f32 1.0, %v5605_v51 }
 0x156   :  { %317 = vrot.lane.b32.xlu0 %v5601_v46, %s5959_s6  ;;  %5606 = vrcp.f32 %v409_v50 }
 0x157   :  { %5608 = vrcp.f32 %v311_v52 }
 0x160   :  { %v5607_v53 = vpop.eup %5606 }
 0x161   :  { %v5609_v56 = vpop.eup %5608  ;;  %v413_v59 = vmul.f32 0.0, %v5607_v53 }
 0x162   :  { %v315_v62 = vmul.f32 0.0, %v5609_v56 }
 0x1c4   :  { %v416_v54 = vpop.permute.xlu0 %415 }
 0x1c5   :  { %v418_v55 = vmul.f32 %v5607_v53, %v416_v54 }
 0x1c7   :  { %420 = vrot.lane.b32.xlu1 %v418_v55, %s5960_s18 }
 0x1c8   :  { %v318_v57 = vpop.permute.xlu0 %317 }
 0x1c9   :  { %v320_v58 = vmul.f32 %v5609_v56, %v318_v57 }
 0x1cb   :  { %322 = vrot.lane.b32.xlu1 %v320_v58, %s5960_s18 }
 0x239   :  { %v421_v60 = vpop.permute.xlu1 %420 }
 0x23a   :  { %v6242_v61 = vadd.f32 %v421_v60, %v413_v59 }
 0x23c   :  { %5610 = vtanh.f32 %v6242_v61  ;;  %v632_v45 = vrot.slane %v6242_v61, 2 }
 0x23d   :  { %v323_v63 = vpop.permute.xlu1 %322 }
 0x23e   :  { %v6245_v0 = vadd.f32 %v323_v63, %v315_v62 }
 0x240   :  { %5612 = vtanh.f32 %v6245_v0  ;;  %v526_v47 = vrot.slane %v6245_v0, 6 }
 0x246   :  { %v5611_v3 = vpop.eup %5610 }
 0x247   :  { %426 = vrot.lane.b32.xlu0 %v5611_v3, %s5959_s6 }
 0x24a   :  { %v5613_v4 = vpop.eup %5612 }
 0x24b   :  { %328 = vrot.lane.b32.xlu1 %v5613_v4, %s5959_s6 }
 0x2b9   :  { %v427_v5 = vpop.permute.xlu0 %426 }
 0x2ba   :  { %v6250_v6 = vmul.f32 %v5607_v53, %v427_v5 }
 0x2bc   :  { %v545_v7 = vrot.slane %v6250_v6, 6 }
 0x2bd   :  { %v329_v8 = vpop.permute.xlu1 %328 }
 0x2be   :  { %v331_v9 = vmul.f32 %v5609_v56, %v329_v8  ;;  %546 = vrot.lane.b32.xlu0 %v545_v7, %s5960_s18 }
 0x2c0   :  { %431 = vrot.lane.b32.xlu1 %v331_v9, %s5960_s18 }
 0x330   :  { %v547_v11 = vpop.permute.xlu0 %546 }
 0x331   :  { %4929 = vmatmul.mubr.msk.f32.vlgmr.msra.gmra.mrb[6].mxu0 %vm233_vm2, %v547_v11 }
 0x332   :  { %v432_v12 = vpop.permute.xlu1 %431  ;;  %5361 = vmatpush3.bf16.msra.mxu0 %v6177_v18  ;;  %4950 = vmatprep.mubr.msk.f32.mxu0 %vm5958_vm0, %v5957_v2 }
 0x333   :  { %435 = vst.msk [vmem:[#allocation2] sm:$0x3] %vm434_vm3, %v432_v12  ;;  %4918 = vmatmul.mubr.msk.f32.vlgmr.msra.gmra.mrb[2].mxu1 %vm233_vm2, %v432_v12  ;;  %5362 = vmatprep.subr.bf16.mxu0 %v5956_v1 }
 0x334   :  { %5355 = vmatpush3.bf16.msra.mxu1 %v6157_v10  ;;  %4939 = vmatprep.mubr.msk.f32.mxu1 %vm5958_vm0, %v5957_v2 }
 0x335   :  { %5356 = vmatprep.subr.bf16.mxu1 %v5956_v1 }
 0x336   :  { %5364 = vmatpush3.bf16.msra.mxu0 %v6193_v22 }
 0x337   :  { %5371 = vmatprep.subr.bf16.mxu0 %v5956_v1 }
 0x338   :  { %5358 = vmatpush3.bf16.msra.mxu1 %v6175_v17 }
 0x339   :  { %5365 = vmatprep.subr.bf16.mxu1 %v5956_v1 }
 0x404   :  { %v616_v13 = vpop.f32.mrb[6].mxu0 }
 0x405   :  { %v621_v14 = vrot.slane %v616_v13, 4  ;;  %v4930_v15 = vpop.f32.mrb[7].mxu0 }
 0x406   :  { %v510_v16 = vpop.f32.mrb[2].mxu1 }
 0x407   :  { %v623_v19 = vadd.f32 %v621_v14, %v6234_v40  ;;  %v515_v20 = vrot.slane %v510_v16, 6  ;;  %v4919_v21 = vpop.f32.mrb[3].mxu1 }
 0x409   :  { %5614 = vtanh.f32 %v623_v19  ;;  %v517_v23 = vadd.f32 %v515_v20, %v6232_v39  ;;  %v4609_v29 = vmul.f32 -1.442695, %v623_v19 }
 0x40b   :  { %5616 = vtanh.f32 %v517_v23  ;;  %v4607_v30 = vmul.f32 -1.442695, %v517_v23 }
 0x40c   :  { %5618 = vpow2.f32 %v4609_v29 }
 0x40d   :  { %5620 = vpow2.f32 %v4607_v30 }
 0x413   :  { %v5615_v26 = vpop.eup %5614 }
 0x414   :  { %636 = vrot.lane.b32.xlu0 %v5615_v26, %s5959_s6 }
 0x415   :  { %v5617_v27 = vpop.eup %5616 }
 0x416   :  { %530 = vrot.lane.b32.xlu1 %v5617_v27, %s5959_s6  ;;  %v5619_v32 = vpop.eup %5618 }
 0x417   :  { %v5621_v33 = vpop.eup %5620  ;;  %v627_v34 = vadd.f32 1.0, %v5619_v32 }
 0x418   :  { %v521_v36 = vadd.f32 1.0, %v5621_v33 }
 0x419   :  { %5622 = vrcp.f32 %v627_v34 }
 0x41a   :  { %5624 = vrcp.f32 %v521_v36 }
 0x423   :  { %v5623_v37 = vpop.eup %5622 }
 0x424   :  { %v5625_v42 = vpop.eup %5624  ;;  %v634_v46 = vmul.f32 %v5623_v37, %v632_v45 }
 0x425   :  { %v528_v50 = vmul.f32 %v5625_v42, %v526_v47 }
 0x486   :  { %v637_v38 = vpop.permute.xlu0 %636 }
 0x487   :  { %v639_v41 = vmul.f32 %v5623_v37, %v637_v38 }
 0x488   :  { %v531_v43 = vpop.permute.xlu1 %530 }
 0x489   :  { %641 = vrot.lane.b32.xlu0 %v639_v41, %s5960_s18  ;;  %v533_v44 = vmul.f32 %v5625_v42, %v531_v43 }
 0x48b   :  { %535 = vrot.lane.b32.xlu1 %v533_v44, %s5960_s18 }
 0x4fb   :  { %v642_v48 = vpop.permute.xlu0 %641 }
 0x4fc   :  { %v6278_v49 = vadd.f32 %v642_v48, %v634_v46 }
 0x4fd   :  { %v536_v51 = vpop.permute.xlu1 %535 }
 0x4fe   :  { %5626 = vtanh.f32 %v6278_v49  ;;  %v6281_v52 = vadd.f32 %v536_v51, %v528_v50  ;;  %v856_v32 = vrot.slane %v6278_v49, 2 }
 0x500   :  { %5628 = vtanh.f32 %v6281_v52  ;;  %v750_v34 = vrot.slane %v6281_v52, 6 }
 0x508   :  { %v5627_v53 = vpop.eup %5626 }
 0x509   :  { %647 = vrot.lane.b32.xlu0 %v5627_v53, %s5959_s6 }
 0x50a   :  { %v5629_v54 = vpop.eup %5628 }
 0x50b   :  { %541 = vrot.lane.b32.xlu1 %v5629_v54, %s5959_s6 }
 0x57b   :  { %v648_v55 = vpop.permute.xlu0 %647 }
 0x57c   :  { %v6286_v56 = vmul.f32 %v5623_v37, %v648_v55 }
 0x57d   :  { %v542_v58 = vpop.permute.xlu1 %541 }
 0x57e   :  { %v769_v57 = vrot.slane %v6286_v56, 4  ;;  %v6289_v59 = vmul.f32 %v5625_v42, %v542_v58 }
 0x580   :  { %770 = vrot.lane.b32.xlu0 %v769_v57, %s5960_s18  ;;  %v663_v60 = vrot.slane %v6289_v59, 2 }
 0x582   :  { %664 = vrot.lane.b32.xlu1 %v663_v60, %s5960_s18 }
 0x5f2   :  { %v771_v61 = vpop.permute.xlu0 %770 }
 0x5f3   :  { %4951 = vmatmul.mubr.msk.f32.vlgmr.msra.gmra.mrb[8].mxu0 %vm233_vm2, %v771_v61 }
 0x5f4   :  { %5373 = vmatpush3.bf16.msra.mxu0 %v6177_v18  ;;  %4972 = vmatprep.mubr.msk.f32.mxu0 %vm5958_vm0, %v5957_v2  ;;  %v665_v62 = vpop.permute.xlu1 %664 }
 0x5f5   :  { %5374 = vmatprep.subr.bf16.mxu0 %v5956_v1  ;;  %4940 = vmatmul.mubr.msk.f32.vlgmr.msra.gmra.mrb[4].mxu1 %vm233_vm2, %v665_v62 }
 0x5f6   :  { %5367 = vmatpush3.bf16.msra.mxu1 %v6157_v10  ;;  %4961 = vmatprep.mubr.msk.f32.mxu1 %vm5958_vm0, %v5957_v2 }
 0x5f7   :  { %5368 = vmatprep.subr.bf16.mxu1 %v5956_v1 }
 0x5f8   :  { %5376 = vmatpush3.bf16.msra.mxu0 %v6193_v22 }
 0x5f9   :  { %5383 = vmatprep.subr.bf16.mxu0 %v5956_v1 }
 0x5fa   :  { %5370 = vmatpush3.bf16.msra.mxu1 %v6175_v17 }
 0x5fb   :  { %5377 = vmatprep.subr.bf16.mxu1 %v5956_v1 }
 0x6c6   :  { %v840_v63 = vpop.f32.mrb[8].mxu0 }
 0x6c7   :  { %v845_v0 = vrot.slane %v840_v63, 6  ;;  %v4952_v3 = vpop.f32.mrb[9].mxu0 }
 0x6c8   :  { %v734_v5 = vpop.f32.mrb[4].mxu1 }
 0x6c9   :  { %v847_v4 = vadd.f32 %v845_v0, %v6234_v40  ;;  %v739_v7 = vrot.slane %v734_v5, 4  ;;  %v4941_v8 = vpop.f32.mrb[5].mxu1 }
 0x6cb   :  { %5630 = vtanh.f32 %v847_v4  ;;  %v741_v9 = vadd.f32 %v739_v7, %v6232_v39  ;;  %v4613_v13 = vmul.f32 -1.442695, %v847_v4 }
 0x6cd   :  { %5632 = vtanh.f32 %v741_v9  ;;  %v4611_v14 = vmul.f32 -1.442695, %v741_v9 }
 0x6ce   :  { %5634 = vpow2.f32 %v4613_v13 }
 0x6cf   :  { %5636 = vpow2.f32 %v4611_v14 }
 0x6d5   :  { %v5631_v11 = vpop.eup %5630 }
 0x6d6   :  { %860 = vrot.lane.b32.xlu0 %v5631_v11, %s5959_s6 }
 0x6d7   :  { %v5633_v12 = vpop.eup %5632 }
 0x6d8   :  { %754 = vrot.lane.b32.xlu1 %v5633_v12, %s5959_s6  ;;  %v5635_v15 = vpop.eup %5634 }
 0x6d9   :  { %v5637_v16 = vpop.eup %5636  ;;  %v851_v19 = vadd.f32 1.0, %v5635_v15 }
 0x6da   :  { %v745_v20 = vadd.f32 1.0, %v5637_v16 }
 0x6db   :  { %5638 = vrcp.f32 %v851_v19 }
 0x6dc   :  { %5640 = vrcp.f32 %v745_v20 }
 0x6e5   :  { %v5639_v21 = vpop.eup %5638 }
 0x6e6   :  { %v5641_v27 = vpop.eup %5640  ;;  %v858_v33 = vmul.f32 %v5639_v21, %v856_v32 }
 0x6e7   :  { %v752_v38 = vmul.f32 %v5641_v27, %v750_v34 }
 0x748   :  { %v861_v23 = vpop.permute.xlu0 %860 }
 0x749   :  { %v863_v26 = vmul.f32 %v5639_v21, %v861_v23 }
 0x74a   :  { %v755_v29 = vpop.permute.xlu1 %754 }
 0x74b   :  { %865 = vrot.lane.b32.xlu0 %v863_v26, %s5960_s18  ;;  %v757_v30 = vmul.f32 %v5641_v27, %v755_v29 }
 0x74d   :  { %759 = vrot.lane.b32.xlu1 %v757_v30, %s5960_s18 }
 0x7bd   :  { %v866_v36 = vpop.permute.xlu0 %865 }
 0x7be   :  { %v6316_v37 = vadd.f32 %v866_v36, %v858_v33 }
 0x7bf   :  { %v760_v41 = vpop.permute.xlu1 %759 }
 0x7c0   :  { %5642 = vtanh.f32 %v6316_v37  ;;  %v6319_v42 = vadd.f32 %v760_v41, %v752_v38  ;;  %v1075_v14 = vrot.slane %v6316_v37, 2 }
 0x7c2   :  { %5644 = vtanh.f32 %v6319_v42  ;;  %v972_v20 = vrot.slane %v6319_v42, 6 }
 0x7ca   :  { %v5643_v43 = vpop.eup %5642 }
 0x7cb   :  { %871 = vrot.lane.b32.xlu0 %v5643_v43, %s5959_s6 }
 0x7cc   :  { %v5645_v44 = vpop.eup %5644 }
 0x7cd   :  { %765 = vrot.lane.b32.xlu1 %v5645_v44, %s5959_s6 }
 0x83d   :  { %v872_v45 = vpop.permute.xlu0 %871 }
 0x83e   :  { %v6324_v46 = vmul.f32 %v5639_v21, %v872_v45 }
 0x83f   :  { %v766_v48 = vpop.permute.xlu1 %765 }
 0x840   :  { %v991_v47 = vrot.slane %v6324_v46, 2  ;;  %v6327_v49 = vmul.f32 %v5641_v27, %v766_v48 }
 0x842   :  { %992 = vrot.lane.b32.xlu0 %v991_v47, %s5960_s18  ;;  %v885_v50 = vrot.slane %v6327_v49, 4 }
 0x844   :  { %886 = vrot.lane.b32.xlu1 %v885_v50, %s5960_s18 }
 0x8b4   :  { %v993_v51 = vpop.permute.xlu0 %992 }
 0x8b5   :  { %4973 = vmatmul.mubr.msk.f32.vlgmr.msra.gmra.mrb[10].mxu0 %vm233_vm2, %v993_v51 }
 0x8b6   :  { %5385 = vmatpush3.bf16.msra.mxu0 %v6177_v18  ;;  %4994 = vmatprep.mubr.msk.f32.mxu0 %vm5958_vm0, %v5957_v2  ;;  %v887_v52 = vpop.permute.xlu1 %886 }
 0x8b7   :  { %5386 = vmatprep.subr.bf16.mxu0 %v5956_v1  ;;  %4962 = vmatmul.mubr.msk.f32.vlgmr.msra.gmra.mrb[6].mxu1 %vm233_vm2, %v887_v52 }
 0x8b8   :  { %5379 = vmatpush3.bf16.msra.mxu1 %v6157_v10  ;;  %4983 = vmatprep.mubr.msk.f32.mxu1 %vm5958_vm0, %v5957_v2 }
 0x8b9   :  { %5380 = vmatprep.subr.bf16.mxu1 %v5956_v1 }
 0x8ba   :  { %5388 = vmatpush3.bf16.msra.mxu0 %v6193_v22 }
 0x8bb   :  { %5395 = vmatprep.subr.bf16.mxu0 %v5956_v1 }
 0x8bc   :  { %5382 = vmatpush3.bf16.msra.mxu1 %v6175_v17 }
 0x8bd   :  { %5389 = vmatprep.subr.bf16.mxu1 %v5956_v1 }
 0x988   :  { %v1062_v53 = vpop.f32.mrb[10].mxu0 }
 0x989   :  { %v1066_v54 = vadd.f32 %v1062_v53, %v6234_v40  ;;  %v4974_v55 = vpop.f32.mrb[11].mxu0 }
 0x98a   :  { %v956_v57 = vpop.f32.mrb[6].mxu1 }
 0x98b   :  { %5646 = vtanh.f32 %v1066_v54  ;;  %v961_v58 = vrot.slane %v956_v57, 2  ;;  %v4963_v60 = vpop.f32.mrb[7].mxu1  ;;  %v4617_v0 = vmul.f32 -1.442695, %v1066_v54 }
 0x98d   :  { %v963_v61 = vadd.f32 %v961_v58, %v6232_v39 }
 0x98f   :  { %5648 = vtanh.f32 %v963_v61  ;;  %v4615_v3 = vmul.f32 -1.442695, %v963_v61 }
 0x990   :  { %5650 = vpow2.f32 %v4617_v0 }
 0x991   :  { %5652 = vpow2.f32 %v4615_v3 }
 0x995   :  { %v5647_v62 = vpop.eup %5646 }
 0x996   :  { %1079 = vrot.lane.b32.xlu0 %v5647_v62, %s5959_s6 }
 0x999   :  { %v5649_v63 = vpop.eup %5648 }
 0x99a   :  { %976 = vrot.lane.b32.xlu1 %v5649_v63, %s5959_s6  ;;  %v5651_v4 = vpop.eup %5650 }
 0x99b   :  { %v1070_v40 = vadd.f32 1.0, %v5651_v4  ;;  %v5653_v5 = vpop.eup %5652 }
 0x99c   :  { %v967_v7 = vadd.f32 1.0, %v5653_v5 }
 0x99d   :  { %5654 = vrcp.f32 %v1070_v40 }
 0x99e   :  { %5656 = vrcp.f32 %v967_v7 }
 0x9a7   :  { %v5655_v8 = vpop.eup %5654 }
 0x9a8   :  { %v5657_v11 = vpop.eup %5656  ;;  %v1077_v15 = vmul.f32 %v5655_v8, %v1075_v14 }
 0x9a9   :  { %v974_v21 = vmul.f32 %v5657_v11, %v972_v20 }
 0xa08   :  { %v1080_v9 = vpop.permute.xlu0 %1079 }
 0xa09   :  { %v1082_v39 = vmul.f32 %v5655_v8, %v1080_v9 }
 0xa0b   :  { %1084 = vrot.lane.b32.xlu0 %v1082_v39, %s5960_s18 }
 0xa0c   :  { %v977_v12 = vpop.permute.xlu1 %976 }
 0xa0d   :  { %v979_v13 = vmul.f32 %v5657_v11, %v977_v12 }
 0xa0f   :  { %981 = vrot.lane.b32.xlu1 %v979_v13, %s5960_s18 }
 0xa7d   :  { %v1085_v16 = vpop.permute.xlu0 %1084 }
 0xa7e   :  { %v6353_v19 = vadd.f32 %v1085_v16, %v1077_v15 }
 0xa80   :  { %5658 = vtanh.f32 %v6353_v19  ;;  %v1291_v4 = vrot.slane %v6353_v19, 2 }
 0xa81   :  { %v982_v23 = vpop.permute.xlu1 %981 }
 0xa82   :  { %v6357_v26 = vadd.f32 %v982_v23, %v974_v21 }
 0xa84   :  { %5660 = vtanh.f32 %v6357_v26 }
 0xa8a   :  { %v5659_v27 = vpop.eup %5658 }
 0xa8b   :  { %1090 = vrot.lane.b32.xlu0 %v5659_v27, %s5959_s6 }
 0xa8e   :  { %v5661_v29 = vpop.eup %5660 }
 0xa8f   :  { %987 = vrot.lane.b32.xlu1 %v5661_v29, %s5959_s6 }
 0xafd   :  { %v1091_v30 = vpop.permute.xlu0 %1090 }
 0xafe   :  { %v1093_v32 = vmul.f32 %v5655_v8, %v1091_v30  ;;  %v1188_v8 = vrot.slane %v6357_v26, 6 }
 0xb00   :  { %1100 = vrot.lane.b32.xlu0 %v1093_v32, %s5960_s18 }
 0xb01   :  { %v988_v33 = vpop.permute.xlu1 %987 }
 0xb02   :  { %v6363_v34 = vmul.f32 %v5657_v11, %v988_v33 }
 0xb04   :  { %v1104_v36 = vrot.slane %v6363_v34, 6 }
 0xb06   :  { %1105 = vrot.lane.b32.xlu1 %v1104_v36, %s5960_s18 }
 0xb72   :  { %v1101_v37 = vpop.permute.xlu0 %1100 }
 0xb73   :  { %1103 = vst.msk [vmem:[#allocation3 + $0x8] sm:$0x3] %vm434_vm3, %v1101_v37  ;;  %4995 = vmatmul.mubr.msk.f32.vlgmr.msra.gmra.mrb[12].mxu0 %vm233_vm2, %v1101_v37 }
 0xb74   :  { %5397 = vmatpush3.bf16.msra.mxu0 %v6177_v18  ;;  %5016 = vmatprep.mubr.msk.f32.mxu0 %vm5958_vm0, %v5957_v2 }
 0xb75   :  { %5398 = vmatprep.subr.bf16.mxu0 %v5956_v1 }
 0xb78   :  { %5400 = vmatpush3.bf16.msra.mxu0 %v6193_v22  ;;  %v1106_v38 = vpop.permute.xlu1 %1105 }
 0xb79   :  { %5407 = vmatprep.subr.bf16.mxu0 %v5956_v1  ;;  %4984 = vmatmul.mubr.msk.f32.vlgmr.msra.gmra.mrb[8].mxu1 %vm233_vm2, %v1106_v38 }
 0xb7a   :  { %5391 = vmatpush3.bf16.msra.mxu1 %v6157_v10  ;;  %5005 = vmatprep.mubr.msk.f32.mxu1 %vm5958_vm0, %v5957_v2 }
 0xb7b   :  { %5392 = vmatprep.subr.bf16.mxu1 %v5956_v1 }
 0xb7e   :  { %5394 = vmatpush3.bf16.msra.mxu1 %v6175_v17 }
 0xb7f   :  { %5401 = vmatprep.subr.bf16.mxu1 %v5956_v1 }
 0xc46   :  { %v1275_v41 = vpop.f32.mrb[12].mxu0 }
 0xc47   :  { %v1280_v42 = vrot.slane %v1275_v41, 2  ;;  %v4996_v43 = vpop.f32.mrb[13].mxu0 }
 0xc49   :  { %v1282_v44 = vadd.f32 %v1280_v42, %v6226_v31 }
 0xc4b   :  { %5662 = vtanh.f32 %v1282_v44  ;;  %v4621_v52 = vmul.f32 -1.442695, %v1282_v44 }
 0xc4c   :  { %v1175_v45 = vpop.f32.mrb[8].mxu1 }
 0xc4d   :  { %v1179_v47 = vadd.f32 %v1175_v45, %v6230_v35  ;;  %v4985_v48 = vpop.f32.mrb[9].mxu1 }
 0xc4f   :  { %5664 = vtanh.f32 %v1179_v47  ;;  %v4619_v53 = vmul.f32 -1.442695, %v1179_v47 }
 0xc50   :  { %5666 = vpow2.f32 %v4621_v52 }
 0xc51   :  { %5668 = vpow2.f32 %v4619_v53 }
 0xc55   :  { %v5663_v50 = vpop.eup %5662 }
 0xc56   :  { %1295 = vrot.lane.b32.xlu0 %v5663_v50, %s5959_s6 }
 0xc59   :  { %v5665_v51 = vpop.eup %5664 }
 0xc5a   :  { %1192 = vrot.lane.b32.xlu1 %v5665_v51, %s5959_s6  ;;  %v5667_v54 = vpop.eup %5666 }
 0xc5b   :  { %v1286_v55 = vadd.f32 1.0, %v5667_v54  ;;  %v5669_v57 = vpop.eup %5668 }
 0xc5c   :  { %v1183_v58 = vadd.f32 1.0, %v5669_v57 }
 0xc5d   :  { %5670 = vrcp.f32 %v1286_v55 }
 0xc5e   :  { %5672 = vrcp.f32 %v1183_v58 }
 0xc67   :  { %v5671_v60 = vpop.eup %5670 }
 0xc68   :  { %v5673_v63 = vpop.eup %5672  ;;  %v1293_v40 = vmul.f32 %v5671_v60, %v1291_v4 }
 0xc69   :  { %v1190_v9 = vmul.f32 %v5673_v63, %v1188_v8 }
 0xcc8   :  { %v1296_v61 = vpop.permute.xlu0 %1295 }
 0xcc9   :  { %v1298_v62 = vmul.f32 %v5671_v60, %v1296_v61 }
 0xccb   :  { %1300 = vrot.lane.b32.xlu0 %v1298_v62, %s5960_s18 }
 0xccc   :  { %v1193_v0 = vpop.permute.xlu1 %1192 }
 0xccd   :  { %v1195_v3 = vmul.f32 %v5673_v63, %v1193_v0 }
 0xccf   :  { %1197 = vrot.lane.b32.xlu1 %v1195_v3, %s5960_s18 }
 0xd3d   :  { %v1301_v5 = vpop.permute.xlu0 %1300 }
 0xd3e   :  { %v6389_v7 = vadd.f32 %v1301_v5, %v1293_v40 }
 0xd40   :  { %5674 = vtanh.f32 %v6389_v7  ;;  %v1510_v57 = vrot.slane %v6389_v7, 2 }
 0xd41   :  { %v1198_v39 = vpop.permute.xlu1 %1197 }
 0xd42   :  { %v6393_v11 = vadd.f32 %v1198_v39, %v1190_v9 }
 0xd44   :  { %5676 = vtanh.f32 %v6393_v11 }
 0xd4a   :  { %v5675_v12 = vpop.eup %5674 }
 0xd4b   :  { %1306 = vrot.lane.b32.xlu0 %v5675_v12, %s5959_s6 }
 0xd4e   :  { %v5677_v13 = vpop.eup %5676 }
 0xd4f   :  { %1203 = vrot.lane.b32.xlu1 %v5677_v13, %s5959_s6 }
 0xdbd   :  { %v1307_v14 = vpop.permute.xlu0 %1306 }
 0xdbe   :  { %v6398_v15 = vmul.f32 %v5671_v60, %v1307_v14  ;;  %v1404_v60 = vrot.slane %v6393_v11, 6 }
 0xdc0   :  { %v1423_v16 = vrot.slane %v6398_v15, 6 }
 0xdc1   :  { %v1204_v19 = vpop.permute.xlu1 %1203 }
 0xdc2   :  { %1424 = vrot.lane.b32.xlu0 %v1423_v16, %s5960_s18  ;;  %v1206_v20 = vmul.f32 %v5673_v63, %v1204_v19 }
 0xdc4   :  { %1311 = vrot.lane.b32.xlu1 %v1206_v20, %s5960_s18 }
 0xe34   :  { %v1425_v21 = vpop.permute.xlu0 %1424 }
 0xe35   :  { %5017 = vmatmul.mubr.msk.f32.vlgmr.msra.gmra.mrb[14].mxu0 %vm233_vm2, %v1425_v21 }
 0xe36   :  { %5409 = vmatpush3.bf16.msra.mxu0 %v6177_v18  ;;  %5038 = vmatprep.mubr.msk.f32.mxu0 %vm5958_vm0, %v5957_v2  ;;  %v1312_v23 = vpop.permute.xlu1 %1311 }
 0xe37   :  { %5410 = vmatprep.subr.bf16.mxu0 %v5956_v1  ;;  %1314 = vst.msk [vmem:[#allocation2 + $0x8] sm:$0x3] %vm434_vm3, %v1312_v23  ;;  %5006 = vmatmul.mubr.msk.f32.vlgmr.msra.gmra.mrb[10].mxu1 %vm233_vm2, %v1312_v23 }
 0xe38   :  { %5403 = vmatpush3.bf16.msra.mxu1 %v6157_v10  ;;  %5027 = vmatprep.mubr.msk.f32.mxu1 %vm5958_vm0, %v5957_v2 }
 0xe39   :  { %5404 = vmatprep.subr.bf16.mxu1 %v5956_v1 }
 0xe3a   :  { %5412 = vmatpush3.bf16.msra.mxu0 %v6193_v22 }
 0xe3b   :  { %5419 = vmatprep.subr.bf16.mxu0 %v5956_v1 }
 0xe3c   :  { %5406 = vmatpush3.bf16.msra.mxu1 %v6175_v17 }
 0xe3d   :  { %5413 = vmatprep.subr.bf16.mxu1 %v5956_v1 }
 0xf08   :  { %v1494_v26 = vpop.f32.mrb[14].mxu0 }
 0xf09   :  { %v1499_v27 = vrot.slane %v1494_v26, 4  ;;  %v5018_v29 = vpop.f32.mrb[15].mxu0 }
 0xf0a   :  { %v1388_v32 = vpop.f32.mrb[10].mxu1 }
 0xf0b   :  { %v1501_v30 = vadd.f32 %v1499_v27, %v6226_v31  ;;  %v1393_v33 = vrot.slane %v1388_v32, 6  ;;  %v5007_v36 = vpop.f32.mrb[11].mxu1 }
 0xf0d   :  { %5678 = vtanh.f32 %v1501_v30  ;;  %v1395_v37 = vadd.f32 %v1393_v33, %v6230_v35  ;;  %v4625_v42 = vmul.f32 -1.442695, %v1501_v30 }
 0xf0f   :  { %5680 = vtanh.f32 %v1395_v37  ;;  %v4623_v43 = vmul.f32 -1.442695, %v1395_v37 }
 0xf10   :  { %5682 = vpow2.f32 %v4625_v42 }
 0xf11   :  { %5684 = vpow2.f32 %v4623_v43 }
 0xf17   :  { %v5679_v38 = vpop.eup %5678 }
 0xf18   :  { %1514 = vrot.lane.b32.xlu0 %v5679_v38, %s5959_s6 }
 0xf19   :  { %v5681_v41 = vpop.eup %5680 }
 0xf1a   :  { %1408 = vrot.lane.b32.xlu1 %v5681_v41, %s5959_s6  ;;  %v5683_v44 = vpop.eup %5682 }
 0xf1b   :  { %v5685_v45 = vpop.eup %5684  ;;  %v1505_v47 = vadd.f32 1.0, %v5683_v44 }
 0xf1c   :  { %v1399_v48 = vadd.f32 1.0, %v5685_v45 }
 0xf1d   :  { %5686 = vrcp.f32 %v1505_v47 }
 0xf1e   :  { %5688 = vrcp.f32 %v1399_v48 }
 0xf27   :  { %v5687_v50 = vpop.eup %5686 }
 0xf28   :  { %v5689_v53 = vpop.eup %5688  ;;  %v1512_v58 = vmul.f32 %v5687_v50, %v1510_v57 }
 0xf29   :  { %v1406_v63 = vmul.f32 %v5689_v53, %v1404_v60 }
 0xf8a   :  { %v1515_v51 = vpop.permute.xlu0 %1514 }
 0xf8b   :  { %v1517_v52 = vmul.f32 %v5687_v50, %v1515_v51 }
 0xf8c   :  { %v1409_v54 = vpop.permute.xlu1 %1408 }
 0xf8d   :  { %1519 = vrot.lane.b32.xlu0 %v1517_v52, %s5960_s18  ;;  %v1411_v55 = vmul.f32 %v5689_v53, %v1409_v54 }
 0xf8f   :  { %1413 = vrot.lane.b32.xlu1 %v1411_v55, %s5960_s18 }
 0xfff   :  { %v1520_v61 = vpop.permute.xlu0 %1519 }
0x1000   :  { %v6426_v62 = vadd.f32 %v1520_v61, %v1512_v58 }
0x1001   :  { %v1414_v0 = vpop.permute.xlu1 %1413 }
0x1002   :  { %5690 = vtanh.f32 %v6426_v62  ;;  %v6429_v3 = vadd.f32 %v1414_v0, %v1406_v63  ;;  %v1732_v44 = vrot.slane %v6426_v62, 2 }
0x1004   :  { %5692 = vtanh.f32 %v6429_v3  ;;  %v1626_v47 = vrot.slane %v6429_v3, 6 }
0x100c   :  { %v5691_v4 = vpop.eup %5690 }
0x100d   :  { %1525 = vrot.lane.b32.xlu0 %v5691_v4, %s5959_s6 }
0x100e   :  { %v5693_v40 = vpop.eup %5692 }
0x100f   :  { %1419 = vrot.lane.b32.xlu1 %v5693_v40, %s5959_s6 }
0x107f   :  { %v1526_v5 = vpop.permute.xlu0 %1525 }
0x1080   :  { %v6434_v7 = vmul.f32 %v5687_v50, %v1526_v5 }
0x1081   :  { %v1420_v9 = vpop.permute.xlu1 %1419 }
0x1082   :  { %v1645_v8 = vrot.slane %v6434_v7, 4  ;;  %v6437_v39 = vmul.f32 %v5689_v53, %v1420_v9 }
0x1084   :  { %1646 = vrot.lane.b32.xlu0 %v1645_v8, %s5960_s18  ;;  %v1539_v11 = vrot.slane %v6437_v39, 2 }
0x1086   :  { %1540 = vrot.lane.b32.xlu1 %v1539_v11, %s5960_s18 }
0x10f6   :  { %v1647_v12 = vpop.permute.xlu0 %1646 }
0x10f7   :  { %5039 = vmatmul.mubr.msk.f32.vlgmr.msra.gmra.mrb[16].mxu0 %vm233_vm2, %v1647_v12 }
0x10f8   :  { %5421 = vmatpush3.bf16.msra.mxu0 %v6177_v18  ;;  %5060 = vmatprep.mubr.msk.f32.mxu0 %vm5958_vm0, %v5957_v2  ;;  %v1541_v13 = vpop.permute.xlu1 %1540 }
0x10f9   :  { %5422 = vmatprep.subr.bf16.mxu0 %v5956_v1  ;;  %5028 = vmatmul.mubr.msk.f32.vlgmr.msra.gmra.mrb[12].mxu1 %vm233_vm2, %v1541_v13 }
0x10fa   :  { %5415 = vmatpush3.bf16.msra.mxu1 %v6157_v10  ;;  %5049 = vmatprep.mubr.msk.f32.mxu1 %vm5958_vm0, %v5957_v2 }
0x10fb   :  { %5416 = vmatprep.subr.bf16.mxu1 %v5956_v1 }
0x10fc   :  { %5424 = vmatpush3.bf16.msra.mxu0 %v6193_v22 }
0x10fe   :  { %5418 = vmatpush3.bf16.msra.mxu1 %v6175_v17 }
0x11ca   :  { %v1716_v18 = vpop.f32.mrb[16].mxu0 }
0x11cb   :  { %v1721_v14 = vrot.slane %v1716_v18, 6  ;;  %v5040_v16 = vpop.f32.mrb[17].mxu0 }
0x11cc   :  { %v1610_v20 = vpop.f32.mrb[12].mxu1 }
0x11cd   :  { %v1723_v19 = vadd.f32 %v1721_v14, %v6226_v31  ;;  %v1615_v21 = vrot.slane %v1610_v20, 4  ;;  %v5029_v23 = vpop.f32.mrb[13].mxu1 }
0x11cf   :  { %5694 = vtanh.f32 %v1723_v19  ;;  %v1617_v10 = vadd.f32 %v1615_v21, %v6230_v35  ;;  %v4629_v27 = vmul.f32 -1.442695, %v1723_v19 }
0x11d1   :  { %5696 = vtanh.f32 %v1617_v10  ;;  %v4627_v17 = vmul.f32 -1.442695, %v1617_v10 }
0x11d2   :  { %5698 = vpow2.f32 %v4629_v27 }
0x11d3   :  { %5700 = vpow2.f32 %v4627_v17 }
0x11d9   :  { %v5695_v26 = vpop.eup %5694 }
0x11da   :  { %1736 = vrot.lane.b32.xlu0 %v5695_v26, %s5959_s6 }
0x11db   :  { %v5697_v22 = vpop.eup %5696 }
0x11dc   :  { %1630 = vrot.lane.b32.xlu1 %v5697_v22, %s5959_s6  ;;  %v5699_v29 = vpop.eup %5698 }
0x11dd   :  { %v5701_v30 = vpop.eup %5700  ;;  %v1727_v32 = vadd.f32 1.0, %v5699_v29 }
0x11de   :  { %v1621_v33 = vadd.f32 1.0, %v5701_v30 }
0x11df   :  { %5702 = vrcp.f32 %v1727_v32 }
0x11e0   :  { %5704 = vrcp.f32 %v1621_v33 }
0x11e9   :  { %v5703_v36 = vpop.eup %5702 }
0x11ea   :  { %v5705_v41 = vpop.eup %5704  ;;  %v1734_v45 = vmul.f32 %v5703_v36, %v1732_v44  ;;  %v1983_v44 = vld [vmem:[%s7070_s29 + $0x8] sm:$0xff] }
0x11eb   :  { %v1628_v51 = vmul.f32 %v5705_v41, %v1626_v47 }
0x124c   :  { %v1737_v37 = vpop.permute.xlu0 %1736 }
0x124d   :  { %v1739_v38 = vmul.f32 %v5703_v36, %v1737_v37 }
0x124e   :  { %v1631_v42 = vpop.permute.xlu1 %1630 }
0x124f   :  { %1741 = vrot.lane.b32.xlu0 %v1739_v38, %s5960_s18  ;;  %v1633_v43 = vmul.f32 %v5705_v41, %v1631_v42 }
0x1251   :  { %1635 = vrot.lane.b32.xlu1 %v1633_v43, %s5960_s18  ;;  %v1982_v43 = vld [vmem:[%s7070_s29] sm:$0xff] }
0x1252   :  { %v5433_v47 = vpack.c.bf16 %v1983_v44, %v1982_v43 }
0x12c1   :  { %v1742_v48 = vpop.permute.xlu0 %1741 }
0x12c2   :  { %v1744_v50 = vadd.f32 %v1742_v48, %v1734_v45 }
0x12c3   :  { %v1636_v52 = vpop.permute.xlu1 %1635 }
0x12c4   :  { %5706 = vtanh.f32 %v1744_v50  ;;  %v1638_v53 = vadd.f32 %v1636_v52, %v1628_v51  ;;  %v1951_v17 = vrot.slane %v1744_v50, 2 }
0x12c6   :  { %5708 = vtanh.f32 %v1638_v53  ;;  %v1848_v33 = vrot.slane %v1638_v53, 6 }
0x12ce   :  { %v5707_v54 = vpop.eup %5706 }
0x12cf   :  { %1747 = vrot.lane.b32.xlu0 %v5707_v54, %s5959_s6  ;;  %v2164_v54 = vld [vmem:[%s7032_s8 + $0x8] sm:$0xff] }
0x12d0   :  { %v5709_v55 = vpop.eup %5708 }
0x12d1   :  { %1641 = vrot.lane.b32.xlu1 %v5709_v55, %s5959_s6  ;;  %v2166_v55 = vld [vmem:[%s7032_s8 + $0x18] sm:$0xff] }
0x1341   :  { %v1748_v57 = vpop.permute.xlu0 %1747 }
0x1342   :  { %v1750_v58 = vmul.f32 %v5703_v36, %v1748_v57  ;;  %v5441_v57 = vpack.c.bf16 %v2166_v55, %v2164_v54 }
0x1343   :  { %v1642_v61 = vpop.permute.xlu1 %1641 }
0x1344   :  { %v1867_v60 = vrot.slane %v1750_v58, 2  ;;  %v6464_v62 = vmul.f32 %v5705_v41, %v1642_v61  ;;  %5442 = vmatprep.subr.bf16.mxu0 %v5441_v57 }
0x1346   :  { %1868 = vrot.lane.b32.xlu0 %v1867_v60, %s5960_s18  ;;  %v1761_v63 = vrot.slane %v6464_v62, 4 }
0x1348   :  { %1762 = vrot.lane.b32.xlu1 %v1761_v63, %s5960_s18 }
0x13b8   :  { %v1869_v0 = vpop.permute.xlu0 %1868 }
0x13b9   :  { %5061 = vmatmul.mubr.msk.f32.vlgmr.msra.gmra.mrb[18].mxu0 %vm233_vm2, %v1869_v0 }
0x13ba   :  { %2253 = vmatprep.mubr.f32.mxu0 %v5957_v2  ;;  %v1763_v3 = vpop.permute.xlu1 %1762 }
0x13bb   :  { %5050 = vmatmul.mubr.msk.f32.vlgmr.msra.gmra.mrb[14].mxu1 %vm233_vm2, %v1763_v3 }
0x148c   :  { %v1938_v4 = vpop.f32.mrb[18].mxu0 }
0x148d   :  { %v1942_v40 = vadd.f32 %v1938_v4, %v6226_v31  ;;  %v5062_v5 = vpop.f32.mrb[19].mxu0 }
0x148e   :  { %v1832_v8 = vpop.f32.mrb[14].mxu1 }
0x148f   :  { %5710 = vtanh.f32 %v1942_v40  ;;  %v1837_v9 = vrot.slane %v1832_v8, 2  ;;  %v5051_v11 = vpop.f32.mrb[15].mxu1  ;;  %v4633_v14 = vmul.f32 -1.442695, %v1942_v40  ;;  %v1985_v8 = vld [vmem:[%s7070_s29 + $0x18] sm:$0xff] }
0x1491   :  { %v1839_v12 = vadd.f32 %v1837_v9, %v6230_v35 }
0x1493   :  { %5712 = vtanh.f32 %v1839_v12  ;;  %v4631_v16 = vmul.f32 -1.442695, %v1839_v12 }
0x1494   :  { %5714 = vpow2.f32 %v4633_v14 }
0x1495   :  { %5716 = vpow2.f32 %v4631_v16 }
0x1499   :  { %v5711_v13 = vpop.eup %5710 }
0x149a   :  { %1955 = vrot.lane.b32.xlu0 %v5711_v13, %s5959_s6 }
0x149d   :  { %v5713_v18 = vpop.eup %5712 }
0x149e   :  { %1852 = vrot.lane.b32.xlu1 %v5713_v18, %s5959_s6  ;;  %v5715_v19 = vpop.eup %5714 }
0x149f   :  { %v1946_v31 = vadd.f32 1.0, %v5715_v19  ;;  %v5717_v20 = vpop.eup %5716  ;;  %v2168_v19 = vld [vmem:[%s7032_s8 + $0x28] sm:$0xff] }
0x14a0   :  { %v1843_v21 = vadd.f32 1.0, %v5717_v20 }
0x14a1   :  { %5718 = vrcp.f32 %v1946_v31  ;;  %v2170_v31 = vld [vmem:[%s7032_s8 + $0x38] sm:$0xff] }
0x14a2   :  { %5720 = vrcp.f32 %v1843_v21  ;;  %v5445_v20 = vpack.c.bf16 %v2170_v31, %v2168_v19  ;;  %v2167_v21 = vld [vmem:[%s7032_s8 + $0x20] sm:$0xff] }
0x14ab   :  { %v5719_v23 = vpop.eup %5718 }
0x14ac   :  { %v5721_v26 = vpop.eup %5720  ;;  %v1953_v29 = vmul.f32 %v5719_v23, %v1951_v17  ;;  %v2273_v17 = vld [vmem:[%s7035_s11 + $0x18] sm:$0xff] }
0x14ad   :  { %v1850_v36 = vmul.f32 %v5721_v26, %v1848_v33  ;;  %v4638_v33 = vld [vmem:[#allocation8] ss:$0 sm:$0xff] }
0x150c   :  { %v1956_v10 = vpop.permute.xlu0 %1955 }
0x150d   :  { %v1958_v35 = vmul.f32 %v5719_v23, %v1956_v10  ;;  %v2270_v10 = vld [vmem:[%s7035_s11] sm:$0xff] }
0x150f   :  { %1960 = vrot.lane.b32.xlu0 %v1958_v35, %s5960_s18 }
0x1510   :  { %v1853_v22 = vpop.permute.xlu1 %1852 }
0x1511   :  { %v1855_v27 = vmul.f32 %v5721_v26, %v1853_v22 }
0x1513   :  { %1857 = vrot.lane.b32.xlu1 %v1855_v27, %s5960_s18  ;;  %v2272_v27 = vld [vmem:[%s7035_s11 + $0x10] sm:$0xff] }
0x1581   :  { %v1961_v30 = vpop.permute.xlu0 %1960 }
0x1582   :  { %v1963_v32 = vadd.f32 %v1961_v30, %v1953_v29  ;;  %v6588_v29 = vpack.c.bf16 %v2273_v17, %v2272_v27  ;;  %v2266_v30 = vld [vmem:[%s7034_s10] sm:$0xff] }
0x1584   :  { %5722 = vtanh.f32 %v1963_v32  ;;  %v2267_v32 = vld [vmem:[%s7034_s10 + $0x8] sm:$0xff] }
0x1585   :  { %v1858_v37 = vpop.permute.xlu1 %1857 }
0x1586   :  { %v1860_v38 = vadd.f32 %v1858_v37, %v1850_v36 }
0x1588   :  { %5724 = vtanh.f32 %v1860_v38  ;;  %v6605_v38 = vpack.c.bf16 %v2267_v32, %v2266_v30 }
0x158e   :  { %v5723_v41 = vpop.eup %5722 }
0x158f   :  { %1966 = vrot.lane.b32.xlu0 %v5723_v41, %s5959_s6 }
0x1592   :  { %v5725_v42 = vpop.eup %5724 }
0x1593   :  { %1316 = vrot.lane.b32.xlu0 %v6398_v15, %s5960_s18  ;;  %1863 = vrot.lane.b32.xlu1 %v5725_v42, %s5959_s6  ;;  %v1988_v15 = vld [vmem:[%s7069_s7] sm:$0xff]  ;;  %v2268_v42 = vld [vmem:[%s7034_s10 + $0x10] sm:$0xff] }
0x1597   :  { %1757 = vrot.lane.b32.xlu0 %v1750_v58, %s5960_s18  ;;  %1535 = vrot.lane.b32.xlu1 %v6434_v7, %s5960_s18  ;;  %v2165_v58 = vld [vmem:[%s7032_s8 + $0x10] sm:$0xff] }
0x159b   :  { %437 = vrot.lane.b32.xlu0 %v6250_v6, %s5960_s18  ;;  %658 = vrot.lane.b32.xlu1 %v6286_v56, %s5960_s18  ;;  %v1989_v6 = vld [vmem:[%s7069_s7 + $0x8] sm:$0xff]  ;;  %v1990_v56 = vld [vmem:[%s7069_s7 + $0x10] sm:$0xff] }
0x159c   :  { %v5425_v7 = vpack.c.bf16 %v1989_v6, %v1988_v15  ;;  %v2269_v15 = vld [vmem:[%s7034_s10 + $0x18] sm:$0xff] }
0x159d   :  { %v6616_v6 = vpack.c.bf16 %v2269_v15, %v2268_v42 }
0x159e   :  { %5426 = vmatprep.subr.bf16.mxu1 %v5425_v7 }
0x159f   :  { %881 = vrot.lane.b32.xlu0 %v6324_v46, %s5960_s18  ;;  %5428 = vmatpush3.bf16.msra.mxu1 %v5425_v7  ;;  %v1991_v46 = vld [vmem:[%s7069_s7 + $0x18] sm:$0xff] }
0x15a3   :  { %876 = vrot.lane.b32.xlu0 %v6327_v49, %s5960_s18  ;;  %v5429_v49 = vpack.c.bf16 %v1991_v46, %v1990_v56 }
0x15a5   :  { %5430 = vmatprep.subr.bf16.mxu1 %v5429_v49 }
0x15a6   :  { %5432 = vmatpush3.bf16.msra.mxu1 %v5429_v49  ;;  %v2171_v49 = vld [vmem:[%s7033_s9] sm:$0x3] }
0x15a7   :  { %1530 = vrot.lane.b32.xlu0 %v6437_v39, %s5960_s18  ;;  %5434 = vmatprep.subr.bf16.mxu1 %v5433_v47 }
0x1601   :  { %v1967_v39 = vpop.permute.xlu0 %1966 }
0x1602   :  { %v1969_v45 = vmul.f32 %v5719_v23, %v1967_v39  ;;  %v2169_v23 = vld [vmem:[%s7032_s8 + $0x30] sm:$0xff]  ;;  %v2180_v39 = vrot.slane %v2171_v49, %v137_v25 }
0x1603   :  { %v5447_v35 = vpack.c.bf16 %v2169_v23, %v2167_v21 }
0x1604   :  { %1976 = vrot.lane.b32.xlu1 %v1969_v45, %s5960_s18 }
0x1605   :  { %v1317_v48 = vpop.permute.xlu0 %1316  ;;  %v1864_v50 = vpop.permute.xlu1 %1863 }
0x1606   :  { %1319 = vst.msk [vmem:[#allocation3] sm:$0xc0] %vm440_vm4, %v1317_v48  ;;  %v1866_v51 = vmul.f32 %v5721_v26, %v1864_v50  ;;  %v2271_v26 = vld [vmem:[%s7035_s11 + $0x8] sm:$0xff]  ;;  %s5962_s11 = smov 48  }
0x1607   :  { %v6577_v22 = vpack.c.bf16 %v2271_v26, %v2270_v10 }
0x1608   :  { %652 = vrot.lane.b32.xlu1 %v6289_v59, %s5960_s18  ;;  %1971 = vrot.lane.b32.xlu0 %v1866_v51, %s5960_s18  ;;  %v2163_v59 = vld [vmem:[%s7032_s8] sm:$0xff] }
0x1609   :  { %v1758_v52 = vpop.permute.xlu0 %1757  ;;  %v1536_v53 = vpop.permute.xlu1 %1535  ;;  %v5443_v61 = vpack.c.bf16 %v2165_v58, %v2163_v59 }
0x160a   :  { %1760 = vst.msk [vmem:[#allocation3] sm:$0xc] %vm655_vm5, %v1758_v52 }
0x160b   :  { %1538 = vst.msk [vmem:[#allocation3] sm:$0x30] %vm661_vm6, %v1536_v53  ;;  %5444 = vmatpush1.bf16.msra.mxu0 %v5443_v61 }
0x160c   :  { %1095 = vrot.lane.b32.xlu1 %v6363_v34, %s5960_s18  ;;  %5446 = vmatprep.subr.bf16.mxu0 %v5445_v20 }
0x160d   :  { %v438_v60 = vpop.permute.xlu0 %437  ;;  %v659_v63 = vpop.permute.xlu1 %658 }
0x160e   :  { %441 = vst.msk [vmem:[#allocation3 + $0x8] sm:$0xc0] %vm440_vm4, %v438_v60 }
0x160f   :  { %662 = vst.msk [vmem:[#allocation3 + $0x8] sm:$0x30] %vm661_vm6, %v659_v63  ;;  %5448 = vmatpush1.bf16.msra.mxu0 %v5447_v35 }
0x1610   :  { %1752 = vrot.lane.b32.xlu1 %v6464_v62, %s5960_s18  ;;  %v1984_v62 = vld [vmem:[%s7070_s29 + $0x10] sm:$0xff]  ;;  %5449 = vmatprep.subr.bf16.mxu0 %v5956_v1 }
0x1611   :  { %v882_v0 = vpop.permute.xlu0 %881  ;;  %v5437_v12 = vpack.c.bf16 %v1985_v8, %v1984_v62 }
0x1612   :  { %884 = vst.msk [vmem:[#allocation3 + $0x8] sm:$0xc] %vm655_vm5, %v882_v0 }
0x1615   :  { %v877_v34 = vpop.permute.xlu0 %876 }
0x1616   :  { %879 = vst.msk [vmem:[#allocation2] sm:$0x30] %vm661_vm6, %v877_v34 }
0x1619   :  { %v1531_v3 = vpop.permute.xlu0 %1530  ;;  %v1987_v13 = vld [vmem:[#allocation3 + $0x8] sm:$0xff] }
0x161a   :  { %1533 = vst.msk [vmem:[#allocation2 + $0x8] sm:$0xc] %vm655_vm5, %v1531_v3 }
0x1676   :  { %v1977_v4 = vpop.permute.xlu1 %1976 }
0x1677   :  { %1979 = vst.msk [vmem:[#allocation3] sm:$0x3] %vm434_vm3, %v1977_v4 }
0x167a   :  { %v653_v40 = vpop.permute.xlu1 %652  ;;  %v1972_v5 = vpop.permute.xlu0 %1971 }
0x167b   :  { %656 = vst.msk [vmem:[#allocation2] sm:$0xc] %vm655_vm5, %v653_v40 }
0x167c   :  { %1974 = vst.msk [vmem:[#allocation2 + $0x8] sm:$0xc0] %vm440_vm4, %v1972_v5 }
0x167e   :  { %v1096_v9 = vpop.permute.xlu1 %1095  ;;  %v1986_v11 = vld [vmem:[#allocation3] sm:$0xff] }
0x167f   :  { %1098 = vst.msk [vmem:[#allocation2] sm:$0xc0] %vm440_vm4, %v1096_v9  ;;  %5071 = vmatprep.mubr.msk.f32.mxu1 %vm233_vm2, %v1986_v11 }
0x1680   :  { %5072 = vmatmul.mubr.msk.f32.vlgmr.msra.gmra.mrb[16].mxu1 %vm233_vm2, %v1987_v13 }
0x1681   :  { %5436 = vmatpush3.bf16.msra.mxu1 %v5433_v47  ;;  %v2176_v47 = vrot.slane %v2171_v49, %v133_v28 }
0x1682   :  { %v1753_v18 = vpop.permute.xlu1 %1752  ;;  %5438 = vmatprep.subr.bf16.mxu1 %v5437_v12 }
0x1683   :  { %1755 = vst.msk [vmem:[#allocation2 + $0x8] sm:$0x30] %vm661_vm6, %v1753_v18 }
0x1685   :  { %5440 = vmatpush3.bf16.msra.mxu1 %v5437_v12 }
0x1686   :  { %v1980_v14 = vld [vmem:[#allocation2] sm:$0xff]  ;;  %5455 = vmatprep.subr.bf16.mxu1 %v5956_v1 }
0x1687   :  { %5082 = vmatprep.mubr.msk.f32.mxu1 %vm233_vm2, %v1980_v14 }
0x168a   :  { %v1981_v16 = vld [vmem:[#allocation2 + $0x8] sm:$0xff] }
0x168b   :  { %5083 = vmatmul.mubr.msk.f32.vlgmr.msra.gmra.mrb[16].mxu1 %vm233_vm2, %v1981_v16 }
0x168c   :  { %5104 = vmatprep.mubr.msk.f32.mxu1 %vm5958_vm0, %v5957_v2  ;;  %5457 = vmatpush3.bf16.msra.mxu1 %v6577_v22 }
0x168d   :  { %5458 = vmatprep.subr.bf16.mxu1 %v5956_v1 }
0x1690   :  { %5460 = vmatpush3.bf16.msra.mxu1 %v6588_v29 }
0x1691   :  { %5467 = vmatprep.subr.bf16.mxu1 %v5956_v1 }
0x1693   :  { %5105 = vmatmul.mubr.f32.vlgmr.msra.gmra.mrb[18].mxu1 %v5957_v2 }
0x1694   :  { %5469 = vmatpush3.bf16.msra.mxu1 %v6577_v22  ;;  %5126 = vmatprep.mubr.msk.f32.mxu1 %vm5958_vm0, %v5957_v2 }
0x1695   :  { %5470 = vmatprep.subr.bf16.mxu1 %v5956_v1 }
0x1698   :  { %5472 = vmatpush3.bf16.msra.mxu1 %v6588_v29 }
0x1699   :  { %5479 = vmatprep.subr.bf16.mxu1 %v5956_v1 }
0x175e   :  { %v5084_v36 = vpop.f32.mrb[16].mxu1 }
0x175f   :  { %v2145_v37 = vpop.f32.mrb[17].mxu1  ;;  %v2162_v7 = vadd.f32 %v5084_v36, %v4638_v33 }
0x1760   :  { %v2161_v41 = vadd.f32 %v4638_v33, %v2145_v37 }
0x1762   :  { %4639 = vmatmul.mubr.msk.f32.vlgmr.msra.gmra.mrb[20].mxu0 %vm233_vm2, %v2161_v41 }
0x1763   :  { %5451 = vmatpush3.bf16.msra.mxu0 %v6605_v38  ;;  %2259 = vmatprep.mubr.f32.mxu0 %v5957_v2 }
0x1764   :  { %5452 = vmatprep.subr.bf16.mxu0 %v5956_v1 }
0x1766   :  { %4640 = vmatmul.mubr.msk.f32.gmra.mrb[22].mxu0 %vm233_vm2, %v2162_v7  ;;  %v2435_v56 = vpop.f32.mrb[18].mxu1 }
0x1767   :  { %5454 = vmatpush3.bf16.msra.mxu0 %v6616_v6  ;;  %5093 = vmatprep.mubr.msk.f32.mxu0 %vm5958_vm0, %v5957_v2  ;;  %v5106_v46 = vpop.f32.mrb[19].mxu1  ;;  %v2440_v50 = vrot.slane %v2435_v56, 2 }
0x1768   :  { %5461 = vmatprep.subr.bf16.mxu0 %v5956_v1 }
0x176a   :  { %5094 = vmatmul.mubr.f32.vlgmr.msra.gmra.mrb[24].mxu0 %v5957_v2 }
0x176b   :  { %5463 = vmatpush3.bf16.msra.mxu0 %v6605_v38  ;;  %5115 = vmatprep.mubr.msk.f32.mxu0 %vm5958_vm0, %v5957_v2 }
0x176c   :  { %5464 = vmatprep.subr.bf16.mxu0 %v5956_v1 }
0x176f   :  { %5466 = vmatpush3.bf16.msra.mxu0 %v6616_v6 }
0x1770   :  { %5473 = vmatprep.subr.bf16.mxu0 %v5956_v1 }
0x1835   :  { %v2255_v43 = vpop.f32.mrb[20].mxu0 }
0x1836   :  { %v2257_v44 = vpop.f32.mrb[21].mxu0  ;;  %v6644_v54 = vadd.f32 %v2255_v43, %v2176_v47 }
0x1837   :  { %v6636_v45 = vadd.f32 %v2257_v44, %v2180_v39 }
0x1839   :  { %v2261_v48 = vpop.f32.mrb[22].mxu0 }
0x183a   :  { %v6640_v51 = vadd.f32 %v2261_v48, %v2176_v47  ;;  %v2263_v52 = vpop.f32.mrb[23].mxu0 }
0x183b   :  { %v6642_v53 = vadd.f32 %v2263_v52, %v2180_v39 }
0x183d   :  { %v2442_v55 = vadd.f32 %v2440_v50, %v6642_v53  ;;  %v2340_v59 = vpop.f32.mrb[24].mxu0 }
0x183e   :  { %v2344_v25 = vadd.f32 %v2340_v59, %v6644_v54  ;;  %v5095_v57 = vpop.f32.mrb[25].mxu0 }
0x183f   :  { %5726 = vtanh.f32 %v2442_v55  ;;  %v4642_v28 = vmul.f32 -1.442695, %v2442_v55 }
0x1840   :  { %5728 = vtanh.f32 %v2344_v25  ;;  %v4641_v60 = vmul.f32 -1.442695, %v2344_v25 }
0x1841   :  { %5730 = vpow2.f32 %v4642_v28 }
0x1842   :  { %5732 = vpow2.f32 %v4641_v60 }
0x1849   :  { %v5727_v58 = vpop.eup %5726 }
0x184a   :  { %v5729_v24 = vpop.eup %5728  ;;  %2452 = vrot.lane.b32.xlu1 %v5727_v58, %s5959_s6 }
0x184b   :  { %2354 = vrot.lane.b32.xlu0 %v5729_v24, %s5959_s6  ;;  %v5731_v61 = vpop.eup %5730 }
0x184c   :  { %v5733_v63 = vpop.eup %5732  ;;  %v2446_v0 = vadd.f32 1.0, %v5731_v61 }
0x184d   :  { %v2348_v34 = vadd.f32 1.0, %v5733_v63 }
0x184e   :  { %5734 = vrcp.f32 %v2446_v0 }
0x184f   :  { %5736 = vrcp.f32 %v2348_v34 }
0x1858   :  { %v5735_v3 = vpop.eup %5734 }
0x1859   :  { %v5737_v40 = vpop.eup %5736  ;;  %v2450_v9 = vmul.f32 0.0, %v5735_v3 }
0x185a   :  { %v2352_v12 = vmul.f32 0.0, %v5737_v40 }
0x18bc   :  { %v2453_v4 = vpop.permute.xlu1 %2452 }
0x18bd   :  { %v2455_v5 = vmul.f32 %v5735_v3, %v2453_v4  ;;  %v2355_v62 = vpop.permute.xlu0 %2354 }
0x18be   :  { %v2357_v8 = vmul.f32 %v5737_v40, %v2355_v62 }
0x18bf   :  { %2457 = vrot.lane.b32.xlu1 %v2455_v5, %s5960_s18 }
0x18c0   :  { %2359 = vrot.lane.b32.xlu0 %v2357_v8, %s5960_s18 }
0x1931   :  { %v2458_v11 = vpop.permute.xlu1 %2457 }
0x1932   :  { %v6652_v13 = vadd.f32 %v2458_v11, %v2450_v9  ;;  %v2360_v18 = vpop.permute.xlu0 %2359 }
0x1933   :  { %v6654_v14 = vadd.f32 %v2360_v18, %v2352_v12 }
0x1934   :  { %5738 = vtanh.f32 %v6652_v13  ;;  %v2667_v25 = vrot.slane %v6652_v13, 2 }
0x1935   :  { %5740 = vtanh.f32 %v6654_v14  ;;  %v2561_v59 = vrot.slane %v6654_v14, 6 }
0x193e   :  { %v5739_v16 = vpop.eup %5738 }
0x193f   :  { %v5741_v19 = vpop.eup %5740  ;;  %2463 = vrot.lane.b32.xlu1 %v5739_v16, %s5959_s6 }
0x1940   :  { %2365 = vrot.lane.b32.xlu0 %v5741_v19, %s5959_s6 }
0x19b1   :  { %v2464_v31 = vpop.permute.xlu1 %2463 }
0x19b2   :  { %v6660_v20 = vmul.f32 %v5735_v3, %v2464_v31  ;;  %v2366_v21 = vpop.permute.xlu0 %2365 }
0x19b3   :  { %v2368_v23 = vmul.f32 %v5737_v40, %v2366_v21 }
0x19b4   :  { %v2580_v10 = vrot.slane %v6660_v20, 6 }
0x19b5   :  { %2468 = vrot.lane.b32.xlu0 %v2368_v23, %s5960_s18 }
0x19b6   :  { %2581 = vrot.lane.b32.xlu1 %v2580_v10, %s5960_s18 }
0x1a27   :  { %v2469_v35 = vpop.permute.xlu0 %2468 }
0x1a28   :  { %2471 = vst.msk [vmem:[#allocation4] sm:$0x3] %vm434_vm3, %v2469_v35  ;;  %v2582_v26 = vpop.permute.xlu1 %2581  ;;  %5116 = vmatmul.mubr.msk.f32.vlgmr.msra.gmra.mrb[26].mxu0 %vm233_vm2, %v2469_v35 }
0x1a29   :  { %5127 = vmatmul.mubr.msk.f32.vlgmr.msra.gmra.mrb[20].mxu1 %vm233_vm2, %v2582_v26  ;;  %5475 = vmatpush3.bf16.msra.mxu0 %v6605_v38 }
0x1a2a   :  { %5481 = vmatpush3.bf16.msra.mxu1 %v6577_v22  ;;  %5476 = vmatprep.subr.bf16.mxu0 %v5956_v1 }
0x1a2b   :  { %5482 = vmatprep.subr.bf16.mxu1 %v5956_v1  ;;  %5137 = vmatprep.mubr.msk.f32.mxu0 %vm5958_vm0, %v5957_v2 }
0x1a2c   :  { %5148 = vmatprep.mubr.msk.f32.mxu1 %vm5958_vm0, %v5957_v2 }
0x1a2d   :  { %5478 = vmatpush3.bf16.msra.mxu0 %v6616_v6 }
0x1a2e   :  { %5484 = vmatpush3.bf16.msra.mxu1 %v6588_v29  ;;  %5485 = vmatprep.subr.bf16.mxu0 %v5956_v1 }
0x1a2f   :  { %5491 = vmatprep.subr.bf16.mxu1 %v5956_v1 }
0x1afb   :  { %v2545_v27 = vpop.f32.mrb[26].mxu0 }
0x1afc   :  { %v2550_v17 = vrot.slane %v2545_v27, 6  ;;  %v5117_v30 = vpop.f32.mrb[27].mxu0  ;;  %v2651_v32 = vpop.f32.mrb[20].mxu1 }
0x1afd   :  { %v2656_v33 = vrot.slane %v2651_v32, 4  ;;  %v5128_v36 = vpop.f32.mrb[21].mxu1 }
0x1afe   :  { %v2552_v37 = vadd.f32 %v2550_v17, %v6644_v54 }
0x1aff   :  { %v2658_v41 = vadd.f32 %v2656_v33, %v6642_v53 }
0x1b00   :  { %5742 = vtanh.f32 %v2552_v37  ;;  %v4644_v7 = vmul.f32 -1.442695, %v2552_v37 }
0x1b01   :  { %5744 = vtanh.f32 %v2658_v41  ;;  %v4646_v56 = vmul.f32 -1.442695, %v2658_v41 }
0x1b02   :  { %5746 = vpow2.f32 %v4644_v7 }
0x1b03   :  { %5748 = vpow2.f32 %v4646_v56 }
0x1b0a   :  { %v5743_v42 = vpop.eup %5742 }
0x1b0b   :  { %v5745_v15 = vpop.eup %5744  ;;  %2565 = vrot.lane.b32.xlu0 %v5743_v42, %s5959_s6 }
0x1b0c   :  { %2671 = vrot.lane.b32.xlu1 %v5745_v15, %s5959_s6  ;;  %v5747_v46 = vpop.eup %5746 }
0x1b0d   :  { %v5749_v49 = vpop.eup %5748  ;;  %v2556_v39 = vadd.f32 1.0, %v5747_v46 }
0x1b0e   :  { %v2662_v43 = vadd.f32 1.0, %v5749_v49 }
0x1b0f   :  { %5750 = vrcp.f32 %v2556_v39 }
0x1b10   :  { %5752 = vrcp.f32 %v2662_v43 }
0x1b19   :  { %v5751_v44 = vpop.eup %5750 }
0x1b1a   :  { %v5753_v48 = vpop.eup %5752  ;;  %v2563_v57 = vmul.f32 %v5751_v44, %v2561_v59 }
0x1b1b   :  { %v2669_v24 = vmul.f32 %v5753_v48, %v2667_v25 }
0x1b7d   :  { %v2566_v47 = vpop.permute.xlu0 %2565 }
0x1b7e   :  { %v2568_v50 = vmul.f32 %v5751_v44, %v2566_v47  ;;  %v2672_v52 = vpop.permute.xlu1 %2671 }
0x1b7f   :  { %v2674_v55 = vmul.f32 %v5753_v48, %v2672_v52 }
0x1b80   :  { %2570 = vrot.lane.b32.xlu0 %v2568_v50, %s5960_s18 }
0x1b81   :  { %2676 = vrot.lane.b32.xlu1 %v2674_v55, %s5960_s18 }
0x1bf2   :  { %v2571_v58 = vpop.permute.xlu0 %2570 }
0x1bf3   :  { %v6688_v28 = vadd.f32 %v2571_v58, %v2563_v57  ;;  %v2677_v60 = vpop.permute.xlu1 %2676 }
0x1bf4   :  { %v6690_v61 = vadd.f32 %v2677_v60, %v2669_v24 }
0x1bf5   :  { %5754 = vtanh.f32 %v6688_v28  ;;  %v2783_v15 = vrot.slane %v6688_v28, 6 }
0x1bf6   :  { %5756 = vtanh.f32 %v6690_v61  ;;  %v2889_v7 = vrot.slane %v6690_v61, 2 }
0x1bff   :  { %v5755_v63 = vpop.eup %5754 }
0x1c00   :  { %v5757_v0 = vpop.eup %5756  ;;  %2576 = vrot.lane.b32.xlu0 %v5755_v63, %s5959_s6 }
0x1c01   :  { %2682 = vrot.lane.b32.xlu1 %v5757_v0, %s5959_s6 }
0x1c72   :  { %v2577_v34 = vpop.permute.xlu0 %2576 }
0x1c73   :  { %v6696_v3 = vmul.f32 %v5751_v44, %v2577_v34  ;;  %v2683_v4 = vpop.permute.xlu1 %2682 }
0x1c74   :  { %v6698_v40 = vmul.f32 %v5753_v48, %v2683_v4 }
0x1c75   :  { %v2696_v5 = vrot.slane %v6696_v3, 2 }
0x1c76   :  { %v2802_v62 = vrot.slane %v6698_v40, 4 }
0x1c77   :  { %2697 = vrot.lane.b32.xlu0 %v2696_v5, %s5960_s18 }
0x1c78   :  { %2803 = vrot.lane.b32.xlu1 %v2802_v62, %s5960_s18 }
0x1ce9   :  { %v2698_v8 = vpop.permute.xlu0 %2697 }
0x1cea   :  { %v2804_v9 = vpop.permute.xlu1 %2803  ;;  %5138 = vmatmul.mubr.msk.f32.vlgmr.msra.gmra.mrb[28].mxu0 %vm233_vm2, %v2698_v8 }
0x1ceb   :  { %5149 = vmatmul.mubr.msk.f32.vlgmr.msra.gmra.mrb[22].mxu1 %vm233_vm2, %v2804_v9  ;;  %5487 = vmatpush3.bf16.msra.mxu0 %v6605_v38 }
0x1cec   :  { %5493 = vmatpush3.bf16.msra.mxu1 %v6577_v22  ;;  %5488 = vmatprep.subr.bf16.mxu0 %v5956_v1 }
0x1ced   :  { %5494 = vmatprep.subr.bf16.mxu1 %v5956_v1  ;;  %5159 = vmatprep.mubr.msk.f32.mxu0 %vm5958_vm0, %v5957_v2 }
0x1cee   :  { %5170 = vmatprep.mubr.msk.f32.mxu1 %vm5958_vm0, %v5957_v2 }
0x1cef   :  { %5490 = vmatpush3.bf16.msra.mxu0 %v6616_v6 }
0x1cf0   :  { %5496 = vmatpush3.bf16.msra.mxu1 %v6588_v29  ;;  %5497 = vmatprep.subr.bf16.mxu0 %v5956_v1 }
0x1cf1   :  { %5503 = vmatprep.subr.bf16.mxu1 %v5956_v1 }
0x1dbd   :  { %v2767_v11 = vpop.f32.mrb[28].mxu0 }
0x1dbe   :  { %v2772_v12 = vrot.slane %v2767_v11, 4  ;;  %v5139_v13 = vpop.f32.mrb[29].mxu0  ;;  %v2873_v18 = vpop.f32.mrb[22].mxu1 }
0x1dbf   :  { %v2878_v14 = vrot.slane %v2873_v18, 6  ;;  %v5150_v16 = vpop.f32.mrb[23].mxu1 }
0x1dc0   :  { %v2774_v19 = vadd.f32 %v2772_v12, %v6644_v54 }
0x1dc1   :  { %v2880_v31 = vadd.f32 %v2878_v14, %v6642_v53 }
0x1dc2   :  { %5758 = vtanh.f32 %v2774_v19  ;;  %v4648_v10 = vmul.f32 -1.442695, %v2774_v19 }
0x1dc3   :  { %5760 = vtanh.f32 %v2880_v31  ;;  %v4650_v35 = vmul.f32 -1.442695, %v2880_v31 }
0x1dc4   :  { %5762 = vpow2.f32 %v4648_v10 }
0x1dc5   :  { %5764 = vpow2.f32 %v4650_v35 }
0x1dcc   :  { %v5759_v21 = vpop.eup %5758 }
0x1dcd   :  { %v5761_v23 = vpop.eup %5760  ;;  %2787 = vrot.lane.b32.xlu0 %v5759_v21, %s5959_s6 }
0x1dce   :  { %2893 = vrot.lane.b32.xlu1 %v5761_v23, %s5959_s6  ;;  %v5763_v26 = vpop.eup %5762 }
0x1dcf   :  { %v5765_v27 = vpop.eup %5764  ;;  %v2778_v17 = vadd.f32 1.0, %v5763_v26 }
0x1dd0   :  { %v2884_v30 = vadd.f32 1.0, %v5765_v27 }
0x1dd1   :  { %5766 = vrcp.f32 %v2778_v17 }
0x1dd2   :  { %5768 = vrcp.f32 %v2884_v30 }
0x1ddb   :  { %v5767_v32 = vpop.eup %5766 }
0x1ddc   :  { %v5769_v36 = vpop.eup %5768  ;;  %v2785_v56 = vmul.f32 %v5767_v32, %v2783_v15 }
0x1ddd   :  { %v2891_v49 = vmul.f32 %v5769_v36, %v2889_v7 }
0x1e3f   :  { %v2788_v33 = vpop.permute.xlu0 %2787 }
0x1e40   :  { %v2790_v37 = vmul.f32 %v5767_v32, %v2788_v33  ;;  %v2894_v41 = vpop.permute.xlu1 %2893 }
0x1e41   :  { %v2896_v42 = vmul.f32 %v5769_v36, %v2894_v41 }
0x1e42   :  { %2792 = vrot.lane.b32.xlu0 %v2790_v37, %s5960_s18 }
0x1e43   :  { %2898 = vrot.lane.b32.xlu1 %v2896_v42, %s5960_s18 }
0x1eb4   :  { %v2793_v46 = vpop.permute.xlu0 %2792 }
0x1eb5   :  { %v6726_v39 = vadd.f32 %v2793_v46, %v2785_v56  ;;  %v2899_v43 = vpop.permute.xlu1 %2898 }
0x1eb6   :  { %v6728_v44 = vadd.f32 %v2899_v43, %v2891_v49 }
0x1eb7   :  { %5770 = vtanh.f32 %v6726_v39  ;;  %v3005_v23 = vrot.slane %v6726_v39, 6 }
0x1eb8   :  { %5772 = vtanh.f32 %v6728_v44  ;;  %v3108_v21 = vrot.slane %v6728_v44, 2 }
0x1ec1   :  { %v5771_v47 = vpop.eup %5770 }
0x1ec2   :  { %v5773_v48 = vpop.eup %5772  ;;  %2798 = vrot.lane.b32.xlu0 %v5771_v47, %s5959_s6 }
0x1ec3   :  { %2904 = vrot.lane.b32.xlu1 %v5773_v48, %s5959_s6 }
0x1f34   :  { %v2799_v50 = vpop.permute.xlu0 %2798 }
0x1f35   :  { %v6734_v52 = vmul.f32 %v5767_v32, %v2799_v50  ;;  %v2905_v55 = vpop.permute.xlu1 %2904 }
0x1f36   :  { %v6736_v59 = vmul.f32 %v5769_v36, %v2905_v55 }
0x1f37   :  { %v2918_v25 = vrot.slane %v6734_v52, 4 }
0x1f38   :  { %v3024_v57 = vrot.slane %v6736_v59, 2 }
0x1f39   :  { %2919 = vrot.lane.b32.xlu0 %v2918_v25, %s5960_s18 }
0x1f3a   :  { %3025 = vrot.lane.b32.xlu1 %v3024_v57, %s5960_s18 }
0x1fab   :  { %v2920_v58 = vpop.permute.xlu0 %2919 }
0x1fac   :  { %v3026_v24 = vpop.permute.xlu1 %3025  ;;  %5160 = vmatmul.mubr.msk.f32.vlgmr.msra.gmra.mrb[30].mxu0 %vm233_vm2, %v2920_v58 }
0x1fad   :  { %5171 = vmatmul.mubr.msk.f32.vlgmr.msra.gmra.mrb[24].mxu1 %vm233_vm2, %v3026_v24  ;;  %5499 = vmatpush3.bf16.msra.mxu0 %v6605_v38 }
0x1fae   :  { %5505 = vmatpush3.bf16.msra.mxu1 %v6577_v22  ;;  %5192 = vmatprep.mubr.msk.f32.mxu1 %vm5958_vm0, %v5957_v2 }
0x1faf   :  { %5506 = vmatprep.subr.bf16.mxu1 %v5956_v1  ;;  %5500 = vmatprep.subr.bf16.mxu0 %v5956_v1 }
0x1fb0   :  { %5181 = vmatprep.mubr.msk.f32.mxu0 %vm5958_vm0, %v5957_v2 }
0x1fb1   :  { %5502 = vmatpush3.bf16.msra.mxu0 %v6616_v6 }
0x1fb2   :  { %5508 = vmatpush3.bf16.msra.mxu1 %v6588_v29  ;;  %5509 = vmatprep.subr.bf16.mxu0 %v5956_v1 }
0x1fb3   :  { %5515 = vmatprep.subr.bf16.mxu1 %v5956_v1 }
0x207f   :  { %v2989_v28 = vpop.f32.mrb[30].mxu0 }
0x2080   :  { %v2994_v60 = vrot.slane %v2989_v28, 2  ;;  %v5161_v61 = vpop.f32.mrb[31].mxu0  ;;  %v3095_v63 = vpop.f32.mrb[24].mxu1 }
0x2081   :  { %v3099_v0 = vadd.f32 %v3095_v63, %v6642_v53  ;;  %v5172_v34 = vpop.f32.mrb[25].mxu1 }
0x2082   :  { %v2996_v4 = vadd.f32 %v2994_v60, %v6644_v54 }
0x2083   :  { %5774 = vtanh.f32 %v3099_v0  ;;  %v4654_v8 = vmul.f32 -1.442695, %v3099_v0 }
0x2084   :  { %5776 = vtanh.f32 %v2996_v4  ;;  %v4652_v9 = vmul.f32 -1.442695, %v2996_v4 }
0x2085   :  { %5778 = vpow2.f32 %v4654_v8 }
0x2086   :  { %5780 = vpow2.f32 %v4652_v9 }
0x208d   :  { %v5775_v5 = vpop.eup %5774 }
0x208e   :  { %v5777_v62 = vpop.eup %5776  ;;  %3112 = vrot.lane.b32.xlu1 %v5775_v5, %s5959_s6 }
0x208f   :  { %3009 = vrot.lane.b32.xlu0 %v5777_v62, %s5959_s6  ;;  %v5779_v11 = vpop.eup %5778 }
0x2090   :  { %v5781_v12 = vpop.eup %5780  ;;  %v3103_v13 = vadd.f32 1.0, %v5779_v11 }
0x2091   :  { %v3000_v18 = vadd.f32 1.0, %v5781_v12 }
0x2092   :  { %5782 = vrcp.f32 %v3103_v13 }
0x2093   :  { %5784 = vrcp.f32 %v3000_v18 }
0x209c   :  { %v5783_v53 = vpop.eup %5782 }
0x209d   :  { %v5785_v14 = vpop.eup %5784  ;;  %v3110_v10 = vmul.f32 %v5783_v53, %v3108_v21 }
0x209e   :  { %v3007_v26 = vmul.f32 %v5785_v14, %v3005_v23 }
0x2100   :  { %v3113_v54 = vpop.permute.xlu1 %3112 }
0x2101   :  { %v3115_v16 = vmul.f32 %v5783_v53, %v3113_v54  ;;  %v3010_v19 = vpop.permute.xlu0 %3009 }
0x2102   :  { %v3012_v31 = vmul.f32 %v5785_v14, %v3010_v19 }
0x2103   :  { %3117 = vrot.lane.b32.xlu1 %v3115_v16, %s5960_s18 }
0x2104   :  { %3014 = vrot.lane.b32.xlu0 %v3012_v31, %s5960_s18 }
0x2175   :  { %v3118_v35 = vpop.permute.xlu1 %3117 }
0x2176   :  { %v6764_v27 = vadd.f32 %v3118_v35, %v3110_v10  ;;  %v3015_v17 = vpop.permute.xlu0 %3014 }
0x2177   :  { %v6766_v30 = vadd.f32 %v3015_v17, %v3007_v26 }
0x2178   :  { %5786 = vtanh.f32 %v6764_v27  ;;  %v3324_v62 = vrot.slane %v6764_v27, 2 }
0x2179   :  { %5788 = vtanh.f32 %v6766_v30  ;;  %v3221_v8 = vrot.slane %v6766_v30, 6 }
0x2182   :  { %v5787_v32 = vpop.eup %5786 }
0x2183   :  { %v5789_v33 = vpop.eup %5788  ;;  %3123 = vrot.lane.b32.xlu1 %v5787_v32, %s5959_s6 }
0x2184   :  { %3020 = vrot.lane.b32.xlu0 %v5789_v33, %s5959_s6 }
0x21f5   :  { %v3124_v36 = vpop.permute.xlu1 %3123 }
0x21f6   :  { %v3126_v37 = vmul.f32 %v5783_v53, %v3124_v36  ;;  %v3021_v41 = vpop.permute.xlu0 %3020 }
0x21f7   :  { %v6772_v42 = vmul.f32 %v5785_v14, %v3021_v41 }
0x21f8   :  { %3133 = vrot.lane.b32.xlu1 %v3126_v37, %s5960_s18 }
0x21f9   :  { %v3137_v15 = vrot.slane %v6772_v42, 6 }
0x21fb   :  { %3138 = vrot.lane.b32.xlu0 %v3137_v15, %s5960_s18 }
0x226a   :  { %v3134_v7 = vpop.permute.xlu1 %3133 }
0x226b   :  { %3136 = vst.msk [vmem:[#allocation5 + $0x8] sm:$0x3] %vm434_vm3, %v3134_v7  ;;  %5193 = vmatmul.mubr.msk.f32.vlgmr.msra.gmra.mrb[26].mxu1 %vm233_vm2, %v3134_v7 }
0x226c   :  { %5517 = vmatpush3.bf16.msra.mxu1 %v6577_v22  ;;  %5214 = vmatprep.mubr.msk.f32.mxu1 %vm5958_vm0, %v5957_v2 }
0x226d   :  { %v3139_v56 = vpop.permute.xlu0 %3138  ;;  %5518 = vmatprep.subr.bf16.mxu1 %v5956_v1 }
0x226e   :  { %5182 = vmatmul.mubr.msk.f32.vlgmr.msra.gmra.mrb[32].mxu0 %vm233_vm2, %v3139_v56 }
0x226f   :  { %5511 = vmatpush3.bf16.msra.mxu0 %v6605_v38  ;;  %5203 = vmatprep.mubr.msk.f32.mxu0 %vm5958_vm0, %v5957_v2 }
0x2270   :  { %5512 = vmatprep.subr.bf16.mxu0 %v5956_v1  ;;  %5520 = vmatpush3.bf16.msra.mxu1 %v6588_v29 }
0x2271   :  { %5527 = vmatprep.subr.bf16.mxu1 %v5956_v1 }
0x2273   :  { %5514 = vmatpush3.bf16.msra.mxu0 %v6616_v6 }
0x2274   :  { %5521 = vmatprep.subr.bf16.mxu0 %v5956_v1 }
0x233e   :  { %v3308_v46 = vpop.f32.mrb[26].mxu1 }
0x233f   :  { %v3313_v49 = vrot.slane %v3308_v46, 2  ;;  %v5194_v39 = vpop.f32.mrb[27].mxu1 }
0x2341   :  { %v3315_v43 = vadd.f32 %v3313_v49, %v6636_v45  ;;  %v3208_v44 = vpop.f32.mrb[32].mxu0 }
0x2342   :  { %v3212_v47 = vadd.f32 %v3208_v44, %v6640_v51  ;;  %v5183_v48 = vpop.f32.mrb[33].mxu0 }
0x2343   :  { %5790 = vtanh.f32 %v3315_v43  ;;  %v4658_v25 = vmul.f32 -1.442695, %v3315_v43 }
0x2344   :  { %5792 = vtanh.f32 %v3212_v47  ;;  %v4656_v57 = vmul.f32 -1.442695, %v3212_v47 }
0x2345   :  { %5794 = vpow2.f32 %v4658_v25 }
0x2346   :  { %5796 = vpow2.f32 %v4656_v57 }
0x234d   :  { %v5791_v50 = vpop.eup %5790 }
0x234e   :  { %v5793_v55 = vpop.eup %5792  ;;  %3328 = vrot.lane.b32.xlu1 %v5791_v50, %s5959_s6 }
0x234f   :  { %3225 = vrot.lane.b32.xlu0 %v5793_v55, %s5959_s6  ;;  %v5795_v58 = vpop.eup %5794 }
0x2350   :  { %v5797_v24 = vpop.eup %5796  ;;  %v3319_v28 = vadd.f32 1.0, %v5795_v58 }
0x2351   :  { %v3216_v60 = vadd.f32 1.0, %v5797_v24 }
0x2352   :  { %5798 = vrcp.f32 %v3319_v28 }
0x2353   :  { %5800 = vrcp.f32 %v3216_v60 }
0x235c   :  { %v5799_v61 = vpop.eup %5798 }
0x235d   :  { %v5801_v0 = vpop.eup %5800  ;;  %v3326_v9 = vmul.f32 %v5799_v61, %v3324_v62 }
0x235e   :  { %v3223_v12 = vmul.f32 %v5801_v0, %v3221_v8 }
0x23c0   :  { %v3329_v63 = vpop.permute.xlu1 %3328 }
0x23c1   :  { %v3331_v34 = vmul.f32 %v5799_v61, %v3329_v63  ;;  %v3226_v4 = vpop.permute.xlu0 %3225 }
0x23c2   :  { %v3228_v5 = vmul.f32 %v5801_v0, %v3226_v4 }
0x23c3   :  { %3333 = vrot.lane.b32.xlu1 %v3331_v34, %s5960_s18 }
0x23c4   :  { %3230 = vrot.lane.b32.xlu0 %v3228_v5, %s5960_s18 }
0x2435   :  { %v3334_v11 = vpop.permute.xlu1 %3333 }
0x2436   :  { %v6800_v13 = vadd.f32 %v3334_v11, %v3326_v9  ;;  %v3231_v18 = vpop.permute.xlu0 %3230 }
0x2437   :  { %v6802_v53 = vadd.f32 %v3231_v18, %v3223_v12 }
0x2438   :  { %5802 = vtanh.f32 %v6800_v13  ;;  %v3543_v58 = vrot.slane %v6800_v13, 2 }
0x2439   :  { %5804 = vtanh.f32 %v6802_v53  ;;  %v3437_v57 = vrot.slane %v6802_v53, 6 }
0x2442   :  { %v5803_v54 = vpop.eup %5802 }
0x2443   :  { %v5805_v14 = vpop.eup %5804  ;;  %3339 = vrot.lane.b32.xlu1 %v5803_v54, %s5959_s6 }
0x2444   :  { %3236 = vrot.lane.b32.xlu0 %v5805_v14, %s5959_s6 }
0x24b5   :  { %v3340_v16 = vpop.permute.xlu1 %3339 }
0x24b6   :  { %v6808_v19 = vmul.f32 %v5799_v61, %v3340_v16  ;;  %v3237_v31 = vpop.permute.xlu0 %3236 }
0x24b7   :  { %v3239_v21 = vmul.f32 %v5801_v0, %v3237_v31 }
0x24b8   :  { %v3456_v23 = vrot.slane %v6808_v19, 6 }
0x24b9   :  { %3344 = vrot.lane.b32.xlu0 %v3239_v21, %s5960_s18 }
0x24ba   :  { %3457 = vrot.lane.b32.xlu1 %v3456_v23, %s5960_s18 }
0x252b   :  { %v3345_v10 = vpop.permute.xlu0 %3344 }
0x252c   :  { %3347 = vst.msk [vmem:[#allocation4 + $0x8] sm:$0x3] %vm434_vm3, %v3345_v10  ;;  %v3458_v35 = vpop.permute.xlu1 %3457  ;;  %5204 = vmatmul.mubr.msk.f32.vlgmr.msra.gmra.mrb[34].mxu0 %vm233_vm2, %v3345_v10 }
0x252d   :  { %5215 = vmatmul.mubr.msk.f32.vlgmr.msra.gmra.mrb[28].mxu1 %vm233_vm2, %v3458_v35  ;;  %5523 = vmatpush3.bf16.msra.mxu0 %v6605_v38 }
0x252e   :  { %5529 = vmatpush3.bf16.msra.mxu1 %v6577_v22  ;;  %5524 = vmatprep.subr.bf16.mxu0 %v5956_v1 }
0x252f   :  { %5530 = vmatprep.subr.bf16.mxu1 %v5956_v1  ;;  %5225 = vmatprep.mubr.msk.f32.mxu0 %vm5958_vm0, %v5957_v2 }
0x2530   :  { %5236 = vmatprep.mubr.msk.f32.mxu1 %vm5958_vm0, %v5957_v2 }
0x2531   :  { %5526 = vmatpush3.bf16.msra.mxu0 %v6616_v6 }
0x2532   :  { %5532 = vmatpush3.bf16.msra.mxu1 %v6588_v29  ;;  %5533 = vmatprep.subr.bf16.mxu0 %v5956_v1 }
0x2533   :  { %5539 = vmatprep.subr.bf16.mxu1 %v5956_v1 }
0x25ff   :  { %v3421_v26 = vpop.f32.mrb[34].mxu0 }
0x2600   :  { %v3426_v27 = vrot.slane %v3421_v26, 6  ;;  %v5205_v17 = vpop.f32.mrb[35].mxu0  ;;  %v3527_v30 = vpop.f32.mrb[28].mxu1 }
0x2601   :  { %v3532_v32 = vrot.slane %v3527_v30, 4  ;;  %v5216_v33 = vpop.f32.mrb[29].mxu1 }
0x2602   :  { %v3428_v36 = vadd.f32 %v3426_v27, %v6640_v51 }
0x2603   :  { %v3534_v37 = vadd.f32 %v3532_v32, %v6636_v45 }
0x2604   :  { %5806 = vtanh.f32 %v3428_v36  ;;  %v4660_v7 = vmul.f32 -1.442695, %v3428_v36 }
0x2605   :  { %5808 = vtanh.f32 %v3534_v37  ;;  %v4662_v56 = vmul.f32 -1.442695, %v3534_v37 }
0x2606   :  { %5810 = vpow2.f32 %v4660_v7 }
0x2607   :  { %5812 = vpow2.f32 %v4662_v56 }
0x260e   :  { %v5807_v41 = vpop.eup %5806 }
0x260f   :  { %v5809_v15 = vpop.eup %5808  ;;  %3441 = vrot.lane.b32.xlu0 %v5807_v41, %s5959_s6 }
0x2610   :  { %3547 = vrot.lane.b32.xlu1 %v5809_v15, %s5959_s6  ;;  %v5811_v46 = vpop.eup %5810 }
0x2611   :  { %v5813_v49 = vpop.eup %5812  ;;  %v3432_v39 = vadd.f32 1.0, %v5811_v46 }
0x2612   :  { %v3538_v43 = vadd.f32 1.0, %v5813_v49 }
0x2613   :  { %5814 = vrcp.f32 %v3432_v39 }
0x2614   :  { %5816 = vrcp.f32 %v3538_v43 }
0x261d   :  { %v5815_v44 = vpop.eup %5814 }
0x261e   :  { %v5817_v48 = vpop.eup %5816  ;;  %v3439_v24 = vmul.f32 %v5815_v44, %v3437_v57 }
0x261f   :  { %v3545_v60 = vmul.f32 %v5817_v48, %v3543_v58 }
0x2681   :  { %v3442_v47 = vpop.permute.xlu0 %3441 }
0x2682   :  { %v3444_v50 = vmul.f32 %v5815_v44, %v3442_v47  ;;  %v3548_v55 = vpop.permute.xlu1 %3547 }
0x2683   :  { %v3550_v25 = vmul.f32 %v5817_v48, %v3548_v55 }
0x2684   :  { %3446 = vrot.lane.b32.xlu0 %v3444_v50, %s5960_s18 }
0x2685   :  { %3552 = vrot.lane.b32.xlu1 %v3550_v25, %s5960_s18 }
0x26f6   :  { %v3447_v28 = vpop.permute.xlu0 %3446 }
0x26f7   :  { %v6836_v61 = vadd.f32 %v3447_v28, %v3439_v24  ;;  %v3553_v63 = vpop.permute.xlu1 %3552 }
0x26f8   :  { %v6838_v0 = vadd.f32 %v3553_v63, %v3545_v60 }
0x26f9   :  { %5818 = vtanh.f32 %v6836_v61  ;;  %v3659_v15 = vrot.slane %v6836_v61, 6 }
0x26fa   :  { %5820 = vtanh.f32 %v6838_v0  ;;  %v3765_v7 = vrot.slane %v6838_v0, 2 }
0x2703   :  { %v5819_v34 = vpop.eup %5818 }
0x2704   :  { %v5821_v4 = vpop.eup %5820  ;;  %3452 = vrot.lane.b32.xlu0 %v5819_v34, %s5959_s6 }
0x2705   :  { %3558 = vrot.lane.b32.xlu1 %v5821_v4, %s5959_s6 }
0x2776   :  { %v3453_v5 = vpop.permute.xlu0 %3452 }
0x2777   :  { %v6844_v62 = vmul.f32 %v5815_v44, %v3453_v5  ;;  %v3559_v8 = vpop.permute.xlu1 %3558 }
0x2778   :  { %v6846_v9 = vmul.f32 %v5817_v48, %v3559_v8 }
0x2779   :  { %v3572_v11 = vrot.slane %v6844_v62, 2 }
0x277a   :  { %v3678_v12 = vrot.slane %v6846_v9, 4 }
0x277b   :  { %3573 = vrot.lane.b32.xlu0 %v3572_v11, %s5960_s18 }
0x277c   :  { %3679 = vrot.lane.b32.xlu1 %v3678_v12, %s5960_s18 }
0x27ed   :  { %v3574_v13 = vpop.permute.xlu0 %3573 }
0x27ee   :  { %v3680_v18 = vpop.permute.xlu1 %3679  ;;  %5226 = vmatmul.mubr.msk.f32.vlgmr.msra.gmra.mrb[36].mxu0 %vm233_vm2, %v3574_v13 }
0x27ef   :  { %5237 = vmatmul.mubr.msk.f32.vlgmr.msra.gmra.mrb[30].mxu1 %vm233_vm2, %v3680_v18  ;;  %5535 = vmatpush3.bf16.msra.mxu0 %v6605_v38 }
0x27f0   :  { %5541 = vmatpush3.bf16.msra.mxu1 %v6577_v22  ;;  %5536 = vmatprep.subr.bf16.mxu0 %v5956_v1 }
0x27f1   :  { %5542 = vmatprep.subr.bf16.mxu1 %v5956_v1  ;;  %5247 = vmatprep.mubr.msk.f32.mxu0 %vm5958_vm0, %v5957_v2 }
0x27f2   :  { %5258 = vmatprep.mubr.msk.f32.mxu1 %vm5958_vm0, %v5957_v2 }
0x27f3   :  { %5538 = vmatpush3.bf16.msra.mxu0 %v6616_v6 }
0x27f4   :  { %5544 = vmatpush3.bf16.msra.mxu1 %v6588_v29 }
0x27f5   :  { %5561 = vmatprep.subr.bf16.mxu1 %v5956_v1 }
0x28c1   :  { %v3643_v53 = vpop.f32.mrb[36].mxu0 }
0x28c2   :  { %v3648_v38 = vrot.slane %v3643_v53, 4  ;;  %v5227_v54 = vpop.f32.mrb[37].mxu0  ;;  %v3749_v22 = vpop.f32.mrb[30].mxu1 }
0x28c3   :  { %v3754_v14 = vrot.slane %v3749_v22, 6  ;;  %v5238_v16 = vpop.f32.mrb[31].mxu1 }
0x28c4   :  { %v3650_v31 = vadd.f32 %v3648_v38, %v6640_v51 }
0x28c5   :  { %v3756_v21 = vadd.f32 %v3754_v14, %v6636_v45 }
0x28c6   :  { %5822 = vtanh.f32 %v3650_v31  ;;  %v4664_v29 = vmul.f32 -1.442695, %v3650_v31 }
0x28c7   :  { %5824 = vtanh.f32 %v3756_v21  ;;  %v4666_v6 = vmul.f32 -1.442695, %v3756_v21 }
0x28c8   :  { %5826 = vpow2.f32 %v4664_v29 }
0x28c9   :  { %5828 = vpow2.f32 %v4666_v6 }
0x28d0   :  { %v5823_v23 = vpop.eup %5822 }
0x28d1   :  { %v5825_v10 = vpop.eup %5824  ;;  %3663 = vrot.lane.b32.xlu0 %v5823_v23, %s5959_s6 }
0x28d2   :  { %3769 = vrot.lane.b32.xlu1 %v5825_v10, %s5959_s6  ;;  %v5827_v35 = vpop.eup %5826 }
0x28d3   :  { %v5829_v26 = vpop.eup %5828  ;;  %v3654_v27 = vadd.f32 1.0, %v5827_v35 }
0x28d4   :  { %v3760_v17 = vadd.f32 1.0, %v5829_v26 }
0x28d5   :  { %5830 = vrcp.f32 %v3654_v27 }
0x28d6   :  { %5832 = vrcp.f32 %v3760_v17 }
0x28df   :  { %v5831_v30 = vpop.eup %5830 }
0x28e0   :  { %v5833_v33 = vpop.eup %5832  ;;  %v3661_v56 = vmul.f32 %v5831_v30, %v3659_v15 }
0x28e1   :  { %v3767_v49 = vmul.f32 %v5833_v33, %v3765_v7 }
0x2943   :  { %v3664_v32 = vpop.permute.xlu0 %3663 }
0x2944   :  { %v3666_v36 = vmul.f32 %v5831_v30, %v3664_v32  ;;  %v3770_v37 = vpop.permute.xlu1 %3769 }
0x2945   :  { %v3772_v41 = vmul.f32 %v5833_v33, %v3770_v37 }
0x2946   :  { %3668 = vrot.lane.b32.xlu0 %v3666_v36, %s5960_s18  ;;  %v4016_v36 = vld [vmem:[%s7036_s12 + $0x8] sm:$0xff] }
0x2947   :  { %3774 = vrot.lane.b32.xlu1 %v3772_v41, %s5960_s18 }
0x29b8   :  { %v3669_v46 = vpop.permute.xlu0 %3668 }
0x29b9   :  { %v3671_v39 = vadd.f32 %v3669_v46, %v3661_v56  ;;  %v3775_v43 = vpop.permute.xlu1 %3774 }
0x29ba   :  { %v3777_v44 = vadd.f32 %v3775_v43, %v3767_v49 }
0x29bb   :  { %5834 = vtanh.f32 %v3671_v39  ;;  %v3881_v10 = vrot.slane %v3671_v39, 6 }
0x29bc   :  { %5836 = vtanh.f32 %v3777_v44  ;;  %v3984_v23 = vrot.slane %v3777_v44, 2 }
0x29c5   :  { %v5835_v47 = vpop.eup %5834 }
0x29c6   :  { %v5837_v48 = vpop.eup %5836  ;;  %3674 = vrot.lane.b32.xlu0 %v5835_v47, %s5959_s6 }
0x29c7   :  { %3780 = vrot.lane.b32.xlu1 %v5837_v48, %s5959_s6 }
0x2a38   :  { %v3675_v50 = vpop.permute.xlu0 %3674 }
0x2a39   :  { %v6875_v55 = vmul.f32 %v5831_v30, %v3675_v50  ;;  %v3781_v25 = vpop.permute.xlu1 %3780 }
0x2a3a   :  { %v3783_v57 = vmul.f32 %v5833_v33, %v3781_v25  ;;  %v4015_v33 = vld [vmem:[%s7036_s12] sm:$0xff]  ;;  %v4018_v25 = vld [vmem:[%s7036_s12 + $0x18] sm:$0xff] }
0x2a3b   :  { %v3794_v58 = vrot.slane %v6875_v55, 4  ;;  %v5553_v15 = vpack.c.bf16 %v4016_v36, %v4015_v33  ;;  %v4678_v33 = vld [vmem:[#allocation12] ss:$0 sm:$0xff] }
0x2a3c   :  { %v3900_v24 = vrot.slane %v3783_v57, 2 }
0x2a3d   :  { %3795 = vrot.lane.b32.xlu0 %v3794_v58, %s5960_s18 }
0x2a3e   :  { %3901 = vrot.lane.b32.xlu1 %v3900_v24, %s5960_s18 }
0x2aaf   :  { %v3796_v28 = vpop.permute.xlu0 %3795 }
0x2ab0   :  { %v3902_v60 = vpop.permute.xlu1 %3901  ;;  %5248 = vmatmul.mubr.msk.f32.vlgmr.msra.gmra.mrb[38].mxu0 %vm233_vm2, %v3796_v28 }
0x2ab1   :  { %5259 = vmatmul.mubr.msk.f32.vlgmr.msra.gmra.mrb[32].mxu1 %vm233_vm2, %v3902_v60 }
0x2ab2   :  { %5299 = vmatprep.mubr.msk.f32.mxu1 %vm5958_vm0, %v5957_v2 }
0x2b83   :  { %v3865_v61 = vpop.f32.mrb[38].mxu0 }
0x2b84   :  { %v3870_v63 = vrot.slane %v3865_v61, 2  ;;  %v5249_v0 = vpop.f32.mrb[39].mxu0  ;;  %v3971_v34 = vpop.f32.mrb[32].mxu1 }
0x2b85   :  { %v3975_v4 = vadd.f32 %v3971_v34, %v6636_v45  ;;  %v5260_v5 = vpop.f32.mrb[33].mxu1  ;;  %v4229_v0 = vld [vmem:[%s7039_s15] sm:$0xff]  ;;  %v4230_v34 = vld [vmem:[%s7039_s15 + $0x8] sm:$0xff] }
0x2b86   :  { %v3872_v8 = vadd.f32 %v3870_v63, %v6640_v51  ;;  %v4231_v5 = vld [vmem:[%s7039_s15 + $0x10] sm:$0xff] }
0x2b87   :  { %5838 = vtanh.f32 %v3975_v4  ;;  %v4670_v13 = vmul.f32 -1.442695, %v3975_v4  ;;  %v5562_v4 = vpack.c.bf16 %v4230_v34, %v4229_v0 }
0x2b88   :  { %5840 = vtanh.f32 %v3872_v8  ;;  %v4668_v18 = vmul.f32 -1.442695, %v3872_v8  ;;  %v4232_v8 = vld [vmem:[%s7039_s15 + $0x18] sm:$0xff] }
0x2b89   :  { %5842 = vpow2.f32 %v4670_v13  ;;  %5563 = vmatpush3.bf16.msra.mxu1 %v5562_v4  ;;  %v4233_v13 = vld [vmem:[%s7039_s15 + $0x20] sm:$0xff] }
0x2b8a   :  { %5844 = vpow2.f32 %v4668_v18  ;;  %5564 = vmatprep.subr.bf16.mxu1 %v5956_v1  ;;  %v4234_v18 = vld [vmem:[%s7039_s15 + $0x28] sm:$0xff] }
0x2b91   :  { %v5839_v11 = vpop.eup %5838 }
0x2b92   :  { %v5841_v12 = vpop.eup %5840  ;;  %3988 = vrot.lane.b32.xlu1 %v5839_v11, %s5959_s6  ;;  %v5565_v11 = vpack.c.bf16 %v4232_v8, %v4231_v5  ;;  %v4511_v5 = vld [vmem:[%s7045_s21] sm:$0xff]  ;;  %v4680_v8 = vld [vmem:[#allocation13] ss:$0 sm:$0xff] }
0x2b93   :  { %3885 = vrot.lane.b32.xlu0 %v5841_v12, %s5959_s6  ;;  %v5843_v53 = vpop.eup %5842  ;;  %v4675_v12 = vld [vmem:[%s7038_s14] ss:$0 sm:$0xff]  ;;  %s5961_s14 = smov 16  }
0x2b94   :  { %v5845_v38 = vpop.eup %5844  ;;  %v3979_v54 = vadd.f32 1.0, %v5843_v53  ;;  %5566 = vmatpush3.bf16.msra.mxu1 %v5565_v11  ;;  %v5568_v53 = vpack.c.bf16 %v4234_v18, %v4233_v13  ;;  %v4682_v18 = vld [vmem:[#allocation7] ss:$0 sm:$0xff] }
0x2b95   :  { %v3876_v22 = vadd.f32 1.0, %v5845_v38  ;;  %5567 = vmatprep.subr.bf16.mxu1 %v5956_v1  ;;  %v4235_v38 = vld [vmem:[%s7039_s15 + $0x30] sm:$0xff] }
0x2b96   :  { %5846 = vrcp.f32 %v3979_v54  ;;  %v4236_v54 = vld [vmem:[%s7039_s15 + $0x38] sm:$0xff] }
0x2b97   :  { %5848 = vrcp.f32 %v3876_v22 }
0x2b98   :  { %5569 = vmatpush3.bf16.msra.mxu1 %v5568_v53 }
0x2b99   :  { %5570 = vmatprep.subr.bf16.mxu1 %v5956_v1 }
0x2ba0   :  { %v5847_v45 = vpop.eup %5846 }
0x2ba1   :  { %v5849_v14 = vpop.eup %5848  ;;  %v3986_v29 = vmul.f32 %v5847_v45, %v3984_v23 }
0x2ba2   :  { %v3883_v35 = vmul.f32 %v5849_v14, %v3881_v10 }
0x2c04   :  { %v3989_v51 = vpop.permute.xlu1 %3988 }
0x2c05   :  { %v3991_v16 = vmul.f32 %v5847_v45, %v3989_v51  ;;  %v3886_v31 = vpop.permute.xlu0 %3885 }
0x2c06   :  { %v3888_v21 = vmul.f32 %v5849_v14, %v3886_v31  ;;  %v4318_v31 = vld [vmem:[%s7041_s17] sm:$0xff] }
0x2c07   :  { %3993 = vrot.lane.b32.xlu1 %v3991_v16, %s5960_s18 }
0x2c08   :  { %3890 = vrot.lane.b32.xlu0 %v3888_v21, %s5960_s18  ;;  %v4319_v21 = vld [vmem:[%s7041_s17 + $0x8] sm:$0xff] }
0x2c09   :  { %v5574_v23 = vpack.c.bf16 %v4319_v21, %v4318_v31 }
0x2c79   :  { %v3994_v6 = vpop.permute.xlu1 %3993 }
0x2c7a   :  { %v3996_v26 = vadd.f32 %v3994_v6, %v3986_v29  ;;  %v3891_v27 = vpop.permute.xlu0 %3890 }
0x2c7b   :  { %v3893_v17 = vadd.f32 %v3891_v27, %v3883_v35 }
0x2c7c   :  { %5850 = vtanh.f32 %v3996_v26 }
0x2c7d   :  { %5852 = vtanh.f32 %v3893_v17 }
0x2c86   :  { %v5851_v30 = vpop.eup %5850 }
0x2c87   :  { %v5853_v32 = vpop.eup %5852  ;;  %3999 = vrot.lane.b32.xlu1 %v5851_v30, %s5959_s6  ;;  %v4321_v30 = vld [vmem:[%s7041_s17 + $0x18] sm:$0xff] }
0x2c88   :  { %3896 = vrot.lane.b32.xlu0 %v5853_v32, %s5959_s6 }
0x2c8b   :  { %3349 = vrot.lane.b32.xlu1 %v6808_v19, %s5960_s18  ;;  %v4021_v19 = vld [vmem:[%s7037_s13] sm:$0xff] }
0x2c8c   :  { %3568 = vrot.lane.b32.xlu0 %v6846_v9, %s5960_s18 }
0x2c8f   :  { %3790 = vrot.lane.b32.xlu1 %v3783_v57, %s5960_s18 }
0x2c90   :  { %2692 = vrot.lane.b32.xlu0 %v6698_v40, %s5960_s18  ;;  %v4022_v40 = vld [vmem:[%s7037_s13 + $0x8] sm:$0xff] }
0x2c91   :  { %v5545_v9 = vpack.c.bf16 %v4022_v40, %v4021_v19  ;;  %v4676_v19 = vld [vmem:[#allocation10] ss:$0 sm:$0xff] }
0x2c93   :  { %2473 = vrot.lane.b32.xlu1 %v6660_v20, %s5960_s18  ;;  %5546 = vmatprep.subr.bf16.mxu0 %v5545_v9  ;;  %v4023_v20 = vld [vmem:[%s7037_s13 + $0x10] sm:$0xff] }
0x2c94   :  { %5548 = vmatpush3.bf16.msra.mxu0 %v5545_v9 }
0x2c97   :  { %2914 = vrot.lane.b32.xlu1 %v6736_v59, %s5960_s18 }
0x2c9b   :  { %2909 = vrot.lane.b32.xlu1 %v6734_v52, %s5960_s18  ;;  %v4024_v52 = vld [vmem:[%s7037_s13 + $0x18] sm:$0xff] }
0x2c9c   :  { %v5549_v59 = vpack.c.bf16 %v4024_v52, %v4023_v20  ;;  %v4429_v52 = vld [vmem:[%s7043_s19] sm:$0xff] }
0x2c9e   :  { %5550 = vmatprep.subr.bf16.mxu0 %v5549_v59 }
0x2c9f   :  { %3563 = vrot.lane.b32.xlu1 %v6844_v62, %s5960_s18  ;;  %5552 = vmatpush3.bf16.msra.mxu0 %v5549_v59  ;;  %v4430_v59 = vld [vmem:[%s7043_s19 + $0x8] sm:$0xff] }
0x2ca0   :  { %5554 = vmatprep.subr.bf16.mxu0 %v5553_v15 }
0x2cf9   :  { %v4000_v62 = vpop.permute.xlu1 %3999 }
0x2cfa   :  { %v4002_v37 = vmul.f32 %v5847_v45, %v4000_v62  ;;  %v3897_v41 = vpop.permute.xlu0 %3896  ;;  %v5580_v62 = vpack.c.bf16 %v4430_v59, %v4429_v52 }
0x2cfb   :  { %v3899_v7 = vmul.f32 %v5849_v14, %v3897_v41  ;;  %v5571_v14 = vpack.c.bf16 %v4236_v54, %v4235_v38 }
0x2cfc   :  { %4009 = vrot.lane.b32.xlu0 %v4002_v37, %s5960_s18 }
0x2cfd   :  { %v3350_v56 = vpop.permute.xlu1 %3349  ;;  %4004 = vrot.lane.b32.xlu1 %v3899_v7, %s5960_s18  ;;  %5572 = vmatpush3.bf16.msra.mxu1 %v5571_v14 }
0x2cfe   :  { %3352 = vst.msk [vmem:[#allocation5] sm:$0xc0] %vm440_vm4, %v3350_v56  ;;  %v3569_v46 = vpop.permute.xlu0 %3568  ;;  %5579 = vmatprep.subr.bf16.mxu1 %v5956_v1 }
0x2cff   :  { %3571 = vst.msk [vmem:[#allocation5] sm:$0x30] %vm661_vm6, %v3569_v46 }
0x2d00   :  { %2687 = vrot.lane.b32.xlu0 %v6696_v3, %s5960_s18 }
0x2d01   :  { %v3791_v49 = vpop.permute.xlu1 %3790 }
0x2d02   :  { %3793 = vst.msk [vmem:[#allocation5] sm:$0xc] %vm655_vm5, %v3791_v49  ;;  %v2693_v39 = vpop.permute.xlu0 %2692 }
0x2d03   :  { %2695 = vst.msk [vmem:[#allocation5 + $0x8] sm:$0x30] %vm661_vm6, %v2693_v39 }
0x2d04   :  { %3128 = vrot.lane.b32.xlu0 %v6772_v42, %s5960_s18 }
0x2d05   :  { %v2474_v43 = vpop.permute.xlu1 %2473 }
0x2d06   :  { %2476 = vst.msk [vmem:[#allocation5 + $0x8] sm:$0xc0] %vm440_vm4, %v2474_v43 }
0x2d08   :  { %3785 = vrot.lane.b32.xlu0 %v6875_v55, %s5960_s18  ;;  %v4017_v55 = vld [vmem:[%s7036_s12 + $0x10] sm:$0xff] }
0x2d09   :  { %v2915_v44 = vpop.permute.xlu1 %2914  ;;  %v5557_v24 = vpack.c.bf16 %v4018_v25, %v4017_v55 }
0x2d0a   :  { %2917 = vst.msk [vmem:[#allocation5 + $0x8] sm:$0xc] %vm655_vm5, %v2915_v44 }
0x2d0d   :  { %v2910_v47 = vpop.permute.xlu1 %2909 }
0x2d0e   :  { %2912 = vst.msk [vmem:[#allocation4] sm:$0x30] %vm661_vm6, %v2910_v47 }
0x2d11   :  { %v3564_v3 = vpop.permute.xlu1 %3563  ;;  %v4020_v28 = vld [vmem:[#allocation5 + $0x8] sm:$0xff] }
0x2d12   :  { %3566 = vst.msk [vmem:[#allocation4 + $0x8] sm:$0xc] %vm655_vm5, %v3564_v3 }
0x2d6e   :  { %v4010_v48 = vpop.permute.xlu0 %4009 }
0x2d6f   :  { %4012 = vst.msk [vmem:[#allocation5] sm:$0x3] %vm434_vm3, %v4010_v48  ;;  %v4005_v50 = vpop.permute.xlu1 %4004 }
0x2d70   :  { %4007 = vst.msk [vmem:[#allocation4 + $0x8] sm:$0xc0] %vm440_vm4, %v4005_v50 }
0x2d72   :  { %v2688_v42 = vpop.permute.xlu0 %2687 }
0x2d73   :  { %2690 = vst.msk [vmem:[#allocation4] sm:$0xc] %vm655_vm5, %v2688_v42 }
0x2d76   :  { %v3129_v57 = vpop.permute.xlu0 %3128  ;;  %v4019_v58 = vld [vmem:[#allocation5] sm:$0xff] }
0x2d77   :  { %3131 = vst.msk [vmem:[#allocation4] sm:$0xc0] %vm440_vm4, %v3129_v57  ;;  %5269 = vmatprep.mubr.msk.f32.mxu0 %vm233_vm2, %v4019_v58 }
0x2d78   :  { %5270 = vmatmul.mubr.msk.f32.vlgmr.msra.gmra.mrb[40].mxu0 %vm233_vm2, %v4020_v28 }
0x2d79   :  { %5556 = vmatpush3.bf16.msra.mxu0 %v5553_v15 }
0x2d7a   :  { %v3786_v60 = vpop.permute.xlu0 %3785  ;;  %5558 = vmatprep.subr.bf16.mxu0 %v5557_v24 }
0x2d7b   :  { %3788 = vst.msk [vmem:[#allocation4 + $0x8] sm:$0x30] %vm661_vm6, %v3786_v60  ;;  %v5963_v60 = vmov -1.0  }
0x2d7d   :  { %5560 = vmatpush3.bf16.msra.mxu0 %v5557_v24 }
0x2d7e   :  { %v4013_v61 = vld [vmem:[#allocation4] sm:$0xff]  ;;  %5573 = vmatprep.subr.bf16.mxu0 %v5956_v1 }
0x2d7f   :  { %5280 = vmatprep.mubr.msk.f32.mxu0 %vm233_vm2, %v4013_v61 }
0x2d82   :  { %v4014_v63 = vld [vmem:[#allocation4 + $0x8] sm:$0xff] }
0x2d83   :  { %5281 = vmatmul.mubr.msk.f32.vlgmr.msra.gmra.mrb[40].mxu0 %vm233_vm2, %v4014_v63 }
0x2d84   :  { %5310 = vmatprep.mubr.msk.f32.mxu0 %vm5958_vm0, %v5957_v2  ;;  %5575 = vmatpush3.bf16.msra.mxu0 %v5574_v23 }
0x2d85   :  { %5576 = vmatprep.subr.bf16.mxu0 %v5956_v1  ;;  %v4320_v1 = vld [vmem:[%s7041_s17 + $0x10] sm:$0xff] }
0x2d86   :  { %v5577_v32 = vpack.c.bf16 %v4321_v30, %v4320_v1 }
0x2d88   :  { %5578 = vmatpush3.bf16.msra.mxu0 %v5577_v32 }
0x2d89   :  { %5320 = vmatprep.subr.mxu0 %v5957_v2 }
0x2e56   :  { %v5282_v22 = vpop.f32.mrb[40].mxu0 }
0x2e57   :  { %v4195_v45 = vadd.f32 %v5282_v22, %v4675_v12  ;;  %v4178_v51 = vpop.f32.mrb[41].mxu0 }
0x2e58   :  { %v4194_v16 = vadd.f32 %v4675_v12, %v4178_v51 }
0x2e59   :  { %4216 = vrot.lane.b32.xlu1 %v4195_v45, %s5961_s14  ;;  %4214 = vst.msk [vmem:[#allocation6 + $0x2] sm:$0x3] %vm4196_vm7, %v4195_v45 }
0x2e5a   :  { %4199 = vrot.lane.b32.xlu0 %v4194_v16, %s5961_s14  ;;  %4197 = vst.msk [vmem:[#allocation6] sm:$0x3] %vm4196_vm7, %v4194_v16 }
0x2e5d   :  { %4220 = vrot.lane.b32.xlu1 %v4195_v45, %s5960_s18 }
0x2e5e   :  { %4204 = vrot.lane.b32.xlu0 %v4194_v16, %s5960_s18 }
0x2e61   :  { %4224 = vrot.lane.b32.xlu1 %v4195_v45, %s5962_s11 }
0x2e62   :  { %4209 = vrot.lane.b32.xlu0 %v4194_v16, %s5962_s11 }
0x2ecb   :  { %v4217_v10 = vpop.permute.xlu1 %4216 }
0x2ecc   :  { %4219 = vst.msk [vmem:[#allocation6] sm:$0xc] %vm4202_vm8, %v4217_v10  ;;  %v4200_v29 = vpop.permute.xlu0 %4199 }
0x2ecd   :  { %4203 = vst.msk [vmem:[#allocation6 - $0x2] sm:$0xc] %vm4202_vm8, %v4200_v29 }
0x2ecf   :  { %v4221_v6 = vpop.permute.xlu1 %4220 }
0x2ed0   :  { %4223 = vst.msk [vmem:[#allocation6 - $0x2] sm:$0x30] %vm4207_vm9, %v4221_v6  ;;  %v4205_v35 = vpop.permute.xlu0 %4204 }
0x2ed1   :  { %4208 = vst.msk [vmem:[#allocation6 - $0x4] sm:$0x30] %vm4207_vm9, %v4205_v35 }
0x2ed3   :  { %v4225_v26 = vpop.permute.xlu1 %4224 }
0x2ed4   :  { %4227 = vst.msk [vmem:[#allocation6 - $0x4] sm:$0xc0] %vm4212_vm10, %v4225_v26  ;;  %v4210_v27 = vpop.permute.xlu0 %4209 }
0x2ed5   :  { %4213 = vst.msk [vmem:[#allocation6 - $0x6] sm:$0xc0] %vm4212_vm10, %v4210_v27 }
0x2edc   :  { %v4228_v17 = vld [vmem:[#allocation6] sm:$0xf] }
0x2edd   :  { %5300 = vmatmul.mubr.msk.f32.vlgmr.msra.gmra.mrb[34].mxu1 %vm4244_vm11, %v4228_v17 }
0x2ede   :  { %5317 = vmatprep.mubr.msk.f32.mxu1 %vm5958_vm0, %v5957_v2  ;;  %5581 = vmatpush3.bf16.msra.mxu1 %v5580_v62 }
0x2fb0   :  { %v4314_v40 = vpop.f32.mrb[34].mxu1 }
0x2fb1   :  { %v4315_v9 = vadd.f32 %v4676_v19, %v4314_v40  ;;  %v5301_v20 = vpop.f32.mrb[35].mxu1 }
0x2fb3   :  { %5311 = vmatmul.mubr.msk.f32.vlgmr.msra.gmra.mrb[42].mxu0 %vm233_vm2, %v4315_v9 }
0x2fb4   :  { %5322 = vmatprep.mubr.msk.f32.mxu0 %vm5958_vm0, %v5957_v2  ;;  %5321 = vmatpush3.msra.mxu0 %v4511_v5 }
0x3086   :  { %v4398_v36 = vpop.f32.mrb[42].mxu0 }
0x3087   :  { %v4399_v37 = vadd.f32 %v4678_v33, %v4398_v36  ;;  %v5312_v41 = vpop.f32.mrb[43].mxu0 }
0x3089   :  { %v4403_v15 = vmul.f32 0.70710677, %v4399_v37  ;;  %v4402_v0 = vmul.f32 0.5, %v4399_v37 }
0x308b   :  { %v4406_v7 = vand.u32 2147483647, %v4403_v15  ;;  %vm4404_vm12 = vcmp.ge.f32.partialorder %v4403_v15, 0.0 }
0x308c   :  { %v4405_v61 = vsel %vm4404_vm12, 1.0, %v5963_v60 }
0x308d   :  { %v4407_v56 = vmul.f32 0.3275911, %v4406_v7  ;;  %v4420_v2 = vsub.f32 0.0, %v4406_v7 }
0x308f   :  { %v4408_v46 = vadd.f32 1.0, %v4407_v56  ;;  %v4421_v39 = vmul.f32 %v4420_v2, %v4406_v7 }
0x3091   :  { %5854 = vrcp.f32 %v4408_v46  ;;  %v4422_v47 = vmul.f32 1.442695, %v4421_v39 }
0x3093   :  { %5856 = vpow2.f32 %v4422_v47 }
0x309b   :  { %v5855_v49 = vpop.eup %5854 }
0x309c   :  { %v4411_v43 = vmul.f32 1.0614054, %v5855_v49 }
0x309d   :  { %v5857_v58 = vpop.eup %5856 }
0x309e   :  { %v4412_v44 = vadd.f32 -1.4531521, %v4411_v43 }
0x30a0   :  { %v4413_v3 = vmul.f32 %v5855_v49, %v4412_v44 }
0x30a2   :  { %v4414_v48 = vadd.f32 1.4214138, %v4413_v3 }
0x30a4   :  { %v4415_v50 = vmul.f32 %v5855_v49, %v4414_v48 }
0x30a6   :  { %v4416_v42 = vadd.f32 -0.28449672, %v4415_v50 }
0x30a8   :  { %v4417_v55 = vmul.f32 %v5855_v49, %v4416_v42 }
0x30aa   :  { %v4418_v25 = vadd.f32 0.2548296, %v4417_v55 }
0x30ac   :  { %v4419_v57 = vmul.f32 %v5855_v49, %v4418_v25 }
0x30ae   :  { %v4424_v24 = vmul.f32 %v5857_v58, %v4419_v57 }
0x30b0   :  { %v4425_v28 = vsub.f32 1.0, %v4424_v24 }
0x30b2   :  { %v4426_v63 = vmul.f32 %v4425_v28, %v4405_v61 }
0x30b4   :  { %v4427_v34 = vadd.f32 1.0, %v4426_v63 }
0x30b6   :  { %v4428_v4 = vmul.f32 %v4427_v34, %v4402_v0 }
0x30b8   :  { %5318 = vmatmul.mubr.msk.f32.vlgmr.msra.gmra.mrb[36].mxu1 %vm141_vm1, %v4428_v4 }
0x318b   :  { %v4507_v11 = vpop.f32.mrb[36].mxu1 }
0x318c   :  { %v4508_v12 = vadd.f32 %v4680_v8, %v4507_v11  ;;  %v5319_v13 = vpop.f32.mrb[37].mxu1 }
0x318e   :  { %5323 = vmatmul.mubr.msk.f32.vlgmr.msra.gmra.mrb[44].mxu0 %vm4519_vm13, %v4508_v12 }
0x3261   :  { %v4589_v53 = vpop.f32.mrb[44].mxu0 }
0x3262   :  { %v4590_v38 = vadd.f32 %v4682_v18, %v4589_v53  ;;  %v5324_v54 = vpop.f32.mrb[45].mxu0 }
0x3264   :  { %4594 = vst.msk [vmem:[%s7047_s23] sm:$0xf] %vm4593_vm14, %v4590_v38 }
0x3265   :  { %4599 = vsyncpa [#allocation9], 1 }
0x3266   :  { %4600 = vsyncpa [#allocation11], 1 }
0x3267   :  { %4601 = vsyncpa [#allocation14], 1 }

</bundles_post_ra>
